<compile_context>
chip_gen: v5e
topology: v5e:2x2
jax: 0.10.0
libtpu: 0.0.40
codegen_flags: <defaults>
</compile_context>

<pallas_src>
import functools
import math

import jax
import jax.numpy as jnp
from jax.experimental import pallas as pl
from jax.experimental.pallas import tpu as pltpu


def _lsa_kernel(x_ref, s_ref, wqvf_ref, wqvp_ref, bqv_ref, wof_ref, bof_ref,
                hmask_ref, out_ref, *, bt, n_nodes, d_hidden, scale):
    """BT (b*l) elements per grid step; all rows flattened to (BT*n, .) for the matmuls."""
    rows = bt * n_nodes

    xf = x_ref[...]                           # (rows, d_feat)  [compute dtype]
    sf = s_ref[...]                           # (rows, d_pos)

    # Fused Q|V projection without ever materializing concat(x, ste):
    #   concat(x, ste) @ Wqv == x @ Wqv[:d_feat] + ste @ Wqv[d_feat:]
    qv = (jnp.dot(xf, wqvf_ref[...], preferred_element_type=jnp.float32)
          + jnp.dot(sf, wqvp_ref[...], preferred_element_type=jnp.float32)
          + bqv_ref[...])                     # (rows, 2*D) = [Q | V], f32

    q = qv[:, :d_hidden]                      # (rows, D)
    v = qv[:, d_hidden:]                      # (rows, D)
    hmask = hmask_ref[...]                    # (D, D) block-diag ones ("same head" indicator)

    # --- per-head feature softmax (axis=-1 within each head block), all heads at once ---
    # Stabilized with the full-row max: it is constant within every head group, so the
    # result is mathematically identical to per-head-max stabilization.
    m1 = jnp.max(q, axis=-1, keepdims=True)
    e1 = jnp.exp(q - m1)
    seg = jnp.dot(e1, hmask, preferred_element_type=jnp.float32)   # per-head sums, lane-broadcast
    q1 = e1 * (pl.reciprocal(seg, approx=False) * scale)           # softmaxed + scaled Q

    # --- node-axis softmax of the (already softmaxed+scaled) q -> k (reference quirk) ---
    q3 = q1.reshape(bt, n_nodes, d_hidden)    # leading-dims-only reshape: free
    v3 = v.reshape(bt, n_nodes, d_hidden)
    m2 = jnp.max(q3, axis=1, keepdims=True)
    e2 = jnp.exp(q3 - m2)
    s2 = jnp.sum(e2, axis=1, keepdims=True)
    k3 = e2 * (pl.reciprocal(s2, approx=False) * scale)

    # --- fused-head linear attention: full-width contractions, block-diag masked context ---
    ctx = jnp.einsum('bnd,bne->bde', k3, v3, preferred_element_type=jnp.float32)   # (bt, D, D)
    ctx = ctx * hmask                                                               # keep per-head blocks
    attn = jnp.einsum('bnd,bde->bne', q3, ctx, preferred_element_type=jnp.float32)  # (bt, n, D)

    # --- folded epilogue:  relu( attn @ (Wo @ Wf) + (bo @ Wf + bf) )  (dropout = identity) ---
    attn2 = attn.reshape(rows, d_hidden)      # collapse leading dims: free
    y = jnp.dot(attn2, wof_ref[...], preferred_element_type=jnp.float32) + bof_ref[...]
    out_ref[...] = jnp.maximum(y, 0.0)


def _choose_bt(B, n, target_rows=8192):
    """Pick the number of (b*l) elements per grid step.

    Targets ~8K flattened rows per step (amortizes the ~0.35us/step pipeline overhead;
    per-step VMEM stays at a few MiB, far under the scoped defaults on v5e/v6e/v7x),
    keeps (bt*n) sublane(8)-aligned, and keeps the grid-step count even so both v7x
    TensorCores stay busy (harmless on v5e/v6e, which have a single TC)."""
    g = 8 // math.gcd(n, 8)                       # bt multiple of g  =>  (bt*n) % 8 == 0
    cap = max(1, target_rows // max(n, 1))
    steps = max(1, -(-B // cap))                  # cdiv
    if B > g:
        steps = max(steps, 2)                     # keep the pipeline / both v7x TCs busy
    if steps > 1 and steps % 2:
        steps += 1                                # even step count for v7x's 2 TensorCores
    bt = -(-B // steps)
    bt = -(-bt // g) * g                          # round up to sublane alignment
    return max(g, min(bt, -(-B // g) * g))


def linear_spatial_attention(x, ste, params, n_heads, *, block_bl=None,
                             compute_dtype=jnp.float32):
    b, l, n, d_feat = x.shape
    d_pos = ste.shape[-1]
    d_hidden = d_feat + d_pos
    assert d_hidden % n_heads == 0
    d_head = d_hidden // n_heads
    B = b * l
    f32 = jnp.float32

    # Fused Q|V weights, split into x-rows / ste-rows (tiny host-side packing, done once).
    wqv = jnp.concatenate([params['wq'], params['wv']], axis=1).astype(f32)   # (D, 2D)
    bqv = jnp.concatenate([params['bq'], params['bv']], axis=1).astype(f32)   # (1, 2D)
    wqv_f = wqv[:d_feat].astype(compute_dtype)
    wqv_p = wqv[d_feat:].astype(compute_dtype)

    if n_heads == 1:      # to_out is nn.Identity in that case
        wo = jnp.eye(d_hidden, dtype=f32)
        bo = jnp.zeros((1, d_hidden), f32)
    else:
        wo, bo = params['wo'].astype(f32), params['bo'].astype(f32)
    wf, bf = params['wf'].astype(f32), params['bf'].astype(f32)
    # Fold to_out -> fc_out: no nonlinearity between them (dropout is identity at eval).
    wof = wo @ wf                               # (D, d_feat)
    bof = bo @ wf + bf                          # (1, d_feat)

    # Same-head indicator mask (block-diagonal ones on the n_heads diagonal d_head blocks).
    head_id = jnp.arange(d_hidden) // d_head
    hmask = (head_id[:, None] == head_id[None, :]).astype(f32)                 # (D, D)

    # Flat, channels-last 2D row slabs (free reshapes of contiguous data — no HBM round trip).
    x2 = x.reshape(B * n, d_feat).astype(compute_dtype)
    s2 = ste.reshape(B * n, d_pos).astype(compute_dtype)

    bt = block_bl or _choose_bt(B, n)
    Bp = pl.cdiv(B, bt) * bt
    if Bp != B:           # pad whole (b*l) elements with zeros; padded outputs are sliced off
        x2 = jnp.pad(x2, ((0, (Bp - B) * n), (0, 0)))
        s2 = jnp.pad(s2, ((0, (Bp - B) * n), (0, 0)))

    scale = float(d_head) ** (-0.125)           # == (d_head ** 0.5) ** (-0.25)
    kernel = functools.partial(_lsa_kernel, bt=bt, n_nodes=n,
                               d_hidden=d_hidden, scale=scale)
    rowspec = lambda d: pl.BlockSpec((bt * n, d), lambda i: (i, 0))   # per-step row slab
    full = lambda r, c: pl.BlockSpec((r, c), lambda i: (0, 0))        # grid-invariant weights

    out = pl.pallas_call(
        kernel,
        out_shape=jax.ShapeDtypeStruct((Bp * n, d_feat), jnp.float32),
        grid=(Bp // bt,),
        in_specs=[
            rowspec(d_feat),                       # x rows
            rowspec(d_pos),                        # ste rows
            full(d_feat, 2 * d_hidden),            # Wqv (feature rows)
            full(d_pos, 2 * d_hidden),             # Wqv (pos rows)
            full(1, 2 * d_hidden),                 # bqv
            full(d_hidden, d_feat),                # Wof = Wo @ Wf   (folded epilogue)
            full(1, d_feat),                       # bof = bo @ Wf + bf
            full(d_hidden, d_hidden),              # block-diag head mask
        ],
        out_specs=rowspec(d_feat),
        compiler_params=pltpu.CompilerParams(dimension_semantics=("parallel",)),
    )(x2, s2, wqv_f, wqv_p, bqv, wof, bof, hmask)

    return out[:B * n].reshape(b, l, n, d_feat)


def linear_spatial_attention_ref(x, ste, params, n_heads):
    """Pure-JAX reference mirroring the PyTorch forward (eval mode)."""
    b, l, n, d_feat = x.shape
    h = jnp.concatenate([x, ste], axis=-1)
    d_hidden = h.shape[-1]
    d_head = d_hidden // n_heads
    B = b * l
    h = h.reshape(B, n, d_hidden)

    q = h @ params['wq'] + params['bq']
    v = h @ params['wv'] + params['bv']
    q = q.reshape(B, n, n_heads, d_head).transpose(0, 2, 1, 3)
    v = v.reshape(B, n, n_heads, d_head).transpose(0, 2, 1, 3)

    s = (d_head ** 0.5) ** (-0.25)
    q = jax.nn.softmax(q, axis=-1) * s
    k = jax.nn.softmax(q, axis=-2) * s
    ctx = jnp.einsum('bhnd,bhne->bhde', k, v)
    attn = jnp.einsum('bhnd,bhde->bhne', q, ctx)
    attn = attn.transpose(0, 2, 1, 3).reshape(B, n, d_hidden)

    if n_heads == 1:
        o = attn
    else:
        o = attn @ params['wo'] + params['bo']
    y = jnp.maximum(o @ params['wf'] + params['bf'], 0.0)
    return y.reshape(b, l, n, d_feat)


def _init_linear(key, fan_in, fan_out):
    """Deterministic torch-like init: U(-1/sqrt(fan_in), 1/sqrt(fan_in))."""
    kw, kb = jax.random.split(key)
    bound = 1.0 / (fan_in ** 0.5)
    w = jax.random.uniform(kw, (fan_in, fan_out), jnp.float32, -bound, bound)
    b = jax.random.uniform(kb, (1, fan_out), jnp.float32, -bound, bound)
    return w, b


if __name__ == "__main__":
    key = jax.random.PRNGKey(0)

    # Small shapes consistent with the module; b*l = 32 so the grid has 2 steps of
    # 16 (b*l) elements = 256 flattened rows each.
    b, l, n_nodes = 4, 8, 16
    d_hidden_feat, d_hidden_pos, n_heads = 24, 8, 4
    p_dropout = 0.1  # identity at inference
    d_hidden = d_hidden_feat + d_hidden_pos

    k_x, k_ste, kq, kk, kv, ko, kf = jax.random.split(key, 7)
    x = jax.random.normal(k_x, (b, l, n_nodes, d_hidden_feat), jnp.float32)
    ste = jax.random.normal(k_ste, (b, l, n_nodes, d_hidden_pos), jnp.float32)

    wq, bq = _init_linear(kq, d_hidden, d_hidden)
    wk, bk = _init_linear(kk, d_hidden, d_hidden)   # dead in the reference forward (k is overwritten)
    wv, bv = _init_linear(kv, d_hidden, d_hidden)
    wo, bo = _init_linear(ko, d_hidden, d_hidden)   # to_out[0]
    wf, bf = _init_linear(kf, d_hidden, d_hidden_feat)  # fc_out

    params = dict(wq=wq, bq=bq, wk=wk, bk=bk, wv=wv, bv=bv,
                  wo=wo, bo=bo, wf=wf, bf=bf)

    out = jax.block_until_ready(linear_spatial_attention(x, ste, params, n_heads))
    ref = jax.block_until_ready(linear_spatial_attention_ref(x, ste, params, n_heads))

    assert out.shape == (b, l, n_nodes, d_hidden_feat)
    assert jnp.allclose(out, ref, atol=1e-4, rtol=1e-4), "Pallas kernel mismatch vs JAX reference"

    print("KERNEL_OK")
</pallas_src>

<mosaic_0001>
module attributes {stable_mosaic.version = 11 : i64} {
  func.func @_lsa_kernel(%arg0: i32, %arg1: memref<256x24xf32, #tpu.memory_space<vmem>>, %arg2: memref<256x8xf32, #tpu.memory_space<vmem>>, %arg3: memref<24x64xf32, #tpu.memory_space<vmem>>, %arg4: memref<8x64xf32, #tpu.memory_space<vmem>>, %arg5: memref<1x64xf32, #tpu.memory_space<vmem>>, %arg6: memref<32x24xf32, #tpu.memory_space<vmem>>, %arg7: memref<1x24xf32, #tpu.memory_space<vmem>>, %arg8: memref<32x32xf32, #tpu.memory_space<vmem>>, %arg9: memref<256x24xf32, #tpu.memory_space<vmem>>) attributes {dimension_semantics = [#tpu.dimension_semantics<parallel>], iteration_bounds = array<i64: 2>, scalar_prefetch = 0 : i64, scratch_operands = 0 : i64, tpu.core_type = #tpu.core_type<tc>, window_params = [{transform_indices = @transform_0, window_bounds = array<i64: 256, 24>}, {transform_indices = @transform_1, window_bounds = array<i64: 256, 8>}, {pipeline_mode = #tpu.pipeline_mode<synchronous>, transform_indices = @transform_2, window_bounds = array<i64: 24, 64>}, {pipeline_mode = #tpu.pipeline_mode<synchronous>, transform_indices = @transform_3, window_bounds = array<i64: 8, 64>}, {pipeline_mode = #tpu.pipeline_mode<synchronous>, transform_indices = @transform_4, window_bounds = array<i64: 1, 64>}, {pipeline_mode = #tpu.pipeline_mode<synchronous>, transform_indices = @transform_5, window_bounds = array<i64: 32, 24>}, {pipeline_mode = #tpu.pipeline_mode<synchronous>, transform_indices = @transform_6, window_bounds = array<i64: 1, 24>}, {pipeline_mode = #tpu.pipeline_mode<synchronous>, transform_indices = @transform_7, window_bounds = array<i64: 32, 32>}, {transform_indices = @transform_8, window_bounds = array<i64: 256, 24>}]} {
    %c0 = arith.constant 0 : index
    %c0_0 = arith.constant 0 : index
    %0 = vector.load %arg1[%c0, %c0_0] : memref<256x24xf32, #tpu.memory_space<vmem>>, vector<256x24xf32>
    %c0_1 = arith.constant 0 : index
    %c0_2 = arith.constant 0 : index
    %1 = vector.load %arg2[%c0_1, %c0_2] : memref<256x8xf32, #tpu.memory_space<vmem>>, vector<256x8xf32>
    %c0_3 = arith.constant 0 : index
    %c0_4 = arith.constant 0 : index
    %2 = vector.load %arg3[%c0_3, %c0_4] : memref<24x64xf32, #tpu.memory_space<vmem>>, vector<24x64xf32>
    %cst = arith.constant dense<0.000000e+00> : vector<256x64xf32>
    %3 = tpu.matmul %0, %2, %cst {dimension_numbers = #tpu.dot_dimension_numbers<[1], [0], [0], [1], [0, 0, 1, 1], [], []>} : vector<256x24xf32>, vector<24x64xf32>, vector<256x64xf32> -> vector<256x64xf32>
    %c0_5 = arith.constant 0 : index
    %c0_6 = arith.constant 0 : index
    %4 = vector.load %arg4[%c0_5, %c0_6] : memref<8x64xf32, #tpu.memory_space<vmem>>, vector<8x64xf32>
    %cst_7 = arith.constant dense<0.000000e+00> : vector<256x64xf32>
    %5 = tpu.matmul %1, %4, %cst_7 {dimension_numbers = #tpu.dot_dimension_numbers<[1], [0], [0], [1], [0, 0, 1, 1], [], []>} : vector<256x8xf32>, vector<8x64xf32>, vector<256x64xf32> -> vector<256x64xf32>
    %6 = arith.addf %3, %5 : vector<256x64xf32>
    %c0_8 = arith.constant 0 : index
    %c0_9 = arith.constant 0 : index
    %7 = vector.load %arg5[%c0_8, %c0_9] : memref<1x64xf32, #tpu.memory_space<vmem>>, vector<1x64xf32>
    %8 = vector.broadcast %7 : vector<1x64xf32> to vector<256x64xf32>
    %9 = arith.addf %6, %8 : vector<256x64xf32>
    %10 = vector.extract_strided_slice %9 {offsets = [0, 0], sizes = [256, 32], strides = [1, 1]} : vector<256x64xf32> to vector<256x32xf32>
    %11 = vector.extract_strided_slice %9 {offsets = [0, 32], sizes = [256, 32], strides = [1, 1]} : vector<256x64xf32> to vector<256x32xf32>
    %c0_10 = arith.constant 0 : index
    %c0_11 = arith.constant 0 : index
    %12 = vector.load %arg8[%c0_10, %c0_11] : memref<32x32xf32, #tpu.memory_space<vmem>>, vector<32x32xf32>
    %cst_12 = arith.constant dense<0xFF800000> : vector<256xf32>
    %13 = vector.multi_reduction <maximumf>, %10, %cst_12 [1] : vector<256x32xf32> to vector<256xf32>
    %14 = vector.shape_cast %13 : vector<256xf32> to vector<256x1xf32>
    %15 = vector.broadcast %14 : vector<256x1xf32> to vector<256x32xf32>
    %16 = arith.subf %10, %15 : vector<256x32xf32>
    %17 = math.exp %16 : vector<256x32xf32>
    %cst_13 = arith.constant dense<0.000000e+00> : vector<256x32xf32>
    %18 = tpu.matmul %17, %12, %cst_13 {dimension_numbers = #tpu.dot_dimension_numbers<[1], [0], [0], [1], [0, 0, 1, 1], [], []>} : vector<256x32xf32>, vector<32x32xf32>, vector<256x32xf32> -> vector<256x32xf32>
    %19 = tpu.reciprocal %18 : vector<256x32xf32> -> vector<256x32xf32>
    %cst_14 = arith.constant 0.771105408 : f32
    %20 = vector.broadcast %cst_14 : f32 to vector<256x32xf32>
    %21 = arith.mulf %19, %20 : vector<256x32xf32>
    %22 = arith.mulf %17, %21 : vector<256x32xf32>
    %23 = vector.shape_cast %22 : vector<256x32xf32> to vector<16x16x32xf32>
    %24 = vector.shape_cast %11 : vector<256x32xf32> to vector<16x16x32xf32>
    %cst_15 = arith.constant dense<0xFF800000> : vector<16x32xf32>
    %25 = vector.multi_reduction <maximumf>, %23, %cst_15 [1] : vector<16x16x32xf32> to vector<16x32xf32>
    %26 = vector.shape_cast %25 : vector<16x32xf32> to vector<16x1x32xf32>
    %27 = vector.broadcast %26 : vector<16x1x32xf32> to vector<16x16x32xf32>
    %28 = arith.subf %23, %27 : vector<16x16x32xf32>
    %29 = math.exp %28 : vector<16x16x32xf32>
    %cst_16 = arith.constant dense<0.000000e+00> : vector<16x32xf32>
    %30 = vector.multi_reduction <add>, %29, %cst_16 [1] : vector<16x16x32xf32> to vector<16x32xf32>
    %31 = vector.shape_cast %30 : vector<16x32xf32> to vector<16x1x32xf32>
    %32 = tpu.reciprocal %31 : vector<16x1x32xf32> -> vector<16x1x32xf32>
    %cst_17 = arith.constant 0.771105408 : f32
    %33 = vector.broadcast %cst_17 : f32 to vector<16x1x32xf32>
    %34 = arith.mulf %32, %33 : vector<16x1x32xf32>
    %35 = vector.broadcast %34 : vector<16x1x32xf32> to vector<16x16x32xf32>
    %36 = arith.mulf %29, %35 : vector<16x16x32xf32>
    "tpu.trace_start"() <{level = 10 : i32, message = "bnd,bne->bde"}> : () -> ()
    %cst_18 = arith.constant dense<0.000000e+00> : vector<16x32x32xf32>
    %37 = tpu.matmul %36, %24, %cst_18 {dimension_numbers = #tpu.dot_dimension_numbers<[1], [1], [2], [2], [0, 0, 0, 2, 1, 2], [0], [0]>} : vector<16x16x32xf32>, vector<16x16x32xf32>, vector<16x32x32xf32> -> vector<16x32x32xf32>
    "tpu.trace_stop"() : () -> ()
    %38 = vector.shape_cast %12 : vector<32x32xf32> to vector<1x32x32xf32>
    %39 = vector.broadcast %38 : vector<1x32x32xf32> to vector<16x32x32xf32>
    %40 = arith.mulf %37, %39 : vector<16x32x32xf32>
    "tpu.trace_start"() <{level = 10 : i32, message = "bnd,bde->bne"}> : () -> ()
    %cst_19 = arith.constant dense<0.000000e+00> : vector<16x16x32xf32>
    %41 = tpu.matmul %23, %40, %cst_19 {dimension_numbers = #tpu.dot_dimension_numbers<[2], [1], [1], [2], [0, 0, 0, 1, 1, 2], [0], [0]>} : vector<16x16x32xf32>, vector<16x32x32xf32>, vector<16x16x32xf32> -> vector<16x16x32xf32>
    "tpu.trace_stop"() : () -> ()
    %42 = vector.shape_cast %41 : vector<16x16x32xf32> to vector<256x32xf32>
    %c0_20 = arith.constant 0 : index
    %c0_21 = arith.constant 0 : index
    %43 = vector.load %arg6[%c0_20, %c0_21] : memref<32x24xf32, #tpu.memory_space<vmem>>, vector<32x24xf32>
    %cst_22 = arith.constant dense<0.000000e+00> : vector<256x24xf32>
    %44 = tpu.matmul %42, %43, %cst_22 {dimension_numbers = #tpu.dot_dimension_numbers<[1], [0], [0], [1], [0, 0, 1, 1], [], []>} : vector<256x32xf32>, vector<32x24xf32>, vector<256x24xf32> -> vector<256x24xf32>
    %c0_23 = arith.constant 0 : index
    %c0_24 = arith.constant 0 : index
    %45 = vector.load %arg7[%c0_23, %c0_24] : memref<1x24xf32, #tpu.memory_space<vmem>>, vector<1x24xf32>
    %46 = vector.broadcast %45 : vector<1x24xf32> to vector<256x24xf32>
    %47 = arith.addf %44, %46 : vector<256x24xf32>
    %cst_25 = arith.constant 0.000000e+00 : f32
    %48 = vector.broadcast %cst_25 : f32 to vector<256x24xf32>
    %49 = arith.maximumf %47, %48 : vector<256x24xf32>
    %c0_26 = arith.constant 0 : index
    %c0_27 = arith.constant 0 : index
    %50 = vector.load %arg9[%c0_26, %c0_27] : memref<256x24xf32, #tpu.memory_space<vmem>>, vector<256x24xf32>
    tpu.vector_store %arg9[%c0_26, %c0_27], %49 {strides = array<i32>} : memref<256x24xf32, #tpu.memory_space<vmem>>, vector<256x24xf32>,
    return
  }
  func.func @transform_0(%arg0: i32) -> (i32, i32) {
    %c0_i32 = arith.constant 0 : i32
    %c0_i32_0 = arith.constant 0 : i32
    return %arg0, %c0_i32 : i32, i32
  }
  func.func @transform_1(%arg0: i32) -> (i32, i32) {
    %c0_i32 = arith.constant 0 : i32
    %c0_i32_0 = arith.constant 0 : i32
    return %arg0, %c0_i32 : i32, i32
  }
  func.func @transform_2(%arg0: i32) -> (i32, i32) {
    %c0_i32 = arith.constant 0 : i32
    %c0_i32_0 = arith.constant 0 : i32
    %c0_i32_1 = arith.constant 0 : i32
    return %c0_i32, %c0_i32_0 : i32, i32
  }
  func.func @transform_3(%arg0: i32) -> (i32, i32) {
    %c0_i32 = arith.constant 0 : i32
    %c0_i32_0 = arith.constant 0 : i32
    %c0_i32_1 = arith.constant 0 : i32
    return %c0_i32, %c0_i32_0 : i32, i32
  }
  func.func @transform_4(%arg0: i32) -> (i32, i32) {
    %c0_i32 = arith.constant 0 : i32
    %c0_i32_0 = arith.constant 0 : i32
    %c0_i32_1 = arith.constant 0 : i32
    return %c0_i32, %c0_i32_0 : i32, i32
  }
  func.func @transform_5(%arg0: i32) -> (i32, i32) {
    %c0_i32 = arith.constant 0 : i32
    %c0_i32_0 = arith.constant 0 : i32
    %c0_i32_1 = arith.constant 0 : i32
    return %c0_i32, %c0_i32_0 : i32, i32
  }
  func.func @transform_6(%arg0: i32) -> (i32, i32) {
    %c0_i32 = arith.constant 0 : i32
    %c0_i32_0 = arith.constant 0 : i32
    %c0_i32_1 = arith.constant 0 : i32
    return %c0_i32, %c0_i32_0 : i32, i32
  }
  func.func @transform_7(%arg0: i32) -> (i32, i32) {
    %c0_i32 = arith.constant 0 : i32
    %c0_i32_0 = arith.constant 0 : i32
    %c0_i32_1 = arith.constant 0 : i32
    return %c0_i32, %c0_i32_0 : i32, i32
  }
  func.func @transform_8(%arg0: i32) -> (i32, i32) {
    %c0_i32 = arith.constant 0 : i32
    %c0_i32_0 = arith.constant 0 : i32
    return %arg0, %c0_i32 : i32, i32
  }
}

</mosaic_0001>

<bundles_post_ra>
// kernel: tpu_custom_call.1
= control target key start
LH: loop header
LB: loop body
LE: loop exit
PB: predicated region body
PF: predicated region fallthrough
CT: control target
= control target key end

     0   :  { %s5217_s27 = smov 0   ;;  %s7320_s0 = inlined_call_operand.vmem [shape: f32[512,24], index: 0, kind: input, shape index: {}]   ;;  %s7321_s1 = inlined_call_operand.vmem [shape: f32[512,8], index: 1, kind: input, shape index: {}]   ;;  %s7322_s2 = inlined_call_operand.vmem [shape: f32[24,64], index: 2, kind: input, shape index: {}]   ;;  %s7323_s3 = inlined_call_operand.vmem [shape: f32[8,64], index: 3, kind: input, shape index: {}]   ;;  %s7324_s4 = inlined_call_operand.vmem [shape: f32[1,64], index: 4, kind: input, shape index: {}]   ;;  %s7325_s5 = inlined_call_operand.vmem [shape: f32[32,24], index: 5, kind: input, shape index: {}]   ;;  %s7326_s6 = inlined_call_operand.vmem [shape: f32[1,24], index: 6, kind: input, shape index: {}]   ;;  %s7327_s7 = inlined_call_operand.vmem [shape: f32[32,32], index: 7, kind: input, shape index: {}]   ;;  %s7328_s8 = inlined_call_operand.vmem [shape: f32[512,24], index: 8, kind: output, shape index: {}]  }
   0x1 LB: > { %s4603_s28 = sadd.s32 4294967295, %s5169_s27   ;;  %p4607_p0 = scmp.ge.s32.totalorder %s5169_s27, 1  ;;  %s5169_s27 = sphi %s5217_s27, %s18_s27  }
   0x2   : > { %p274_p1 = scmp.lt.s32.totalorder %s5169_s27, 3 }
   0x4   : > { %p275_p2 = pnand %p4607_p0, %p274_p1 }
   0x6   : > { %278 = sbr.rel (%p275_p2) target bundleno = 1669 (0x685), region = 52 }
   0xb   : > { %v398_v0 = vld [vmem:[%s7323_s3] sm:$0xff]  ;;  %s4608_s9 = sshll.u32 %s4603_s28, 5  ;;  %v397_v1 = vld [vmem:[%s7322_s2 + $0x10] sm:$0xff]  ;;  %vm399_vm0 = vcmask 64512   ;;  %v396_v5 = vld [vmem:[%s7322_s2 + $0x8] sm:$0xff]  ;;  %vm609_vm1 = vcmask 195584  }
   0xc   : > { %4840 = vmatpush.msra.mxu1 %v398_v0  ;;  %p314_p3 = scmp.lt.s32.totalorder %s4608_s9, 63  ;;  %511 = vmatpush.msra.mxu0 %v398_v0  ;;  %v395_v7 = vld [vmem:[%s7322_s2] sm:$0xff]  ;;  %vm859_vm2 = vcmask 261120   ;;  %s5171_s25 = smov 96  }
   0xd   : > { %4841 = vmatpush.msra.mxu2 %v398_v0  ;;  %4842 = vmatpush.msra.mxu3 %v398_v0  ;;  %v5339_v49 = vld [vmem:[%s7324_s4] ss:$0 sm:$0xff] }
   0xe   : > { %719 = vmatpush.msrb.mxu1 %v397_v1  ;;  %s7479_s9 = smov (!%p314_p3, %s4608_s9), 63 }
   0xf   : > { %s5231_s12 = sshll.u32 %s7479_s9, 3 }
  0x10   : > { %s5237_s15 = scalar_lea.vmem %s7321_s1, %s5231_s12  ;;  %720 = vmatpush.msrb.mxu1 %v396_v5  ;;  %s5275_s22 = scalar_lea.vmem %s7320_s0, %s5231_s12 }
  0x11   : > { %v371_v2 = vld [vmem:[%s5237_s15 + $0x40] sm:$0xff]  ;;  %v372_v3 = vld [vmem:[%s5237_s15 + $0x48] sm:$0xff]  ;;  %v373_v4 = vld [vmem:[%s5237_s15 + $0x50] sm:$0xff]  ;;  %s7195_s14 = scalar_lea.vmem %s7328_s8, %s5231_s12 }
  0x12   : > { %4622 = vmatmul.msk.f32.vlgmr.msra.gmra.mxu1 %vm399_vm0, %v371_v2  ;;  %v374_v6 = vld [vmem:[%s5237_s15 + $0x58] sm:$0xff]  ;;  %v363_v8 = vld [vmem:[%s5237_s15] sm:$0xff]  ;;  %v364_v10 = vld [vmem:[%s5237_s15 + $0x8] sm:$0xff] }
  0x13   : > { %721 = vmatpush.msrb.mxu1 %v395_v7  ;;  %4614 = vmatmul.msk.f32.vlgmr.msra.gmra.mxu0 %vm399_vm0, %v363_v8  ;;  %v375_v9 = vld [vmem:[%s5237_s15 + $0x60] sm:$0xff]  ;;  %v376_v11 = vld [vmem:[%s5237_s15 + $0x68] sm:$0xff]  ;;  %v365_v12 = vld [vmem:[%s5237_s15 + $0x10] sm:$0xff] }
  0x14   : > { %v377_v13 = vld [vmem:[%s5237_s15 + $0x70] sm:$0xff]  ;;  %v366_v14 = vld [vmem:[%s5237_s15 + $0x18] sm:$0xff]  ;;  %v367_v16 = vld [vmem:[%s5237_s15 + $0x20] sm:$0xff] }
  0x15   : > { %v378_v15 = vld [vmem:[%s5237_s15 + $0x78] sm:$0xff]  ;;  %v331_v17 = vld [vmem:[%s5275_s22] sm:$0xff]  ;;  %v368_v18 = vld [vmem:[%s5237_s15 + $0x28] sm:$0xff] }
  0x16   : > { %v332_v19 = vld [vmem:[%s5275_s22 + $0x8] sm:$0xff]  ;;  %v369_v20 = vld [vmem:[%s5237_s15 + $0x30] sm:$0xff]  ;;  %v370_v22 = vld [vmem:[%s5237_s15 + $0x38] sm:$0xff] }
  0x17   : > { %v333_v21 = vld [vmem:[%s5275_s22 + $0x10] sm:$0xff]  ;;  %v334_v23 = vld [vmem:[%s5275_s22 + $0x18] sm:$0xff]  ;;  %v335_v24 = vld [vmem:[%s5275_s22 + $0x20] sm:$0xff] }
  0x18   : > { %v336_v25 = vld [vmem:[%s5275_s22 + $0x28] sm:$0xff]  ;;  %v337_v26 = vld [vmem:[%s5275_s22 + $0x30] sm:$0xff]  ;;  %v338_v27 = vld [vmem:[%s5275_s22 + $0x38] sm:$0xff] }
  0x19   : > { %v339_v29 = vld [vmem:[%s5275_s22 + $0x40] sm:$0xff]  ;;  %v340_v31 = vld [vmem:[%s5275_s22 + $0x48] sm:$0xff]  ;;  %v341_v33 = vld [vmem:[%s5275_s22 + $0x50] sm:$0xff] }
  0x1a   : > { %4623 = vmatmul.msk.f32.gmra.mxu1 %vm399_vm0, %v372_v3  ;;  %v342_v35 = vld [vmem:[%s5275_s22 + $0x58] sm:$0xff]  ;;  %v343_v37 = vld [vmem:[%s5275_s22 + $0x60] sm:$0xff]  ;;  %v344_v39 = vld [vmem:[%s5275_s22 + $0x68] sm:$0xff] }
  0x1b   : > { %4615 = vmatmul.msk.f32.gmra.mxu0 %vm399_vm0, %v364_v10  ;;  %v379_v40 = vld [vmem:[%s5237_s15 + $0x80] sm:$0xff]  ;;  %v345_v42 = vld [vmem:[%s5275_s22 + $0x70] sm:$0xff]  ;;  %v380_v44 = vld [vmem:[%s5237_s15 + $0x88] sm:$0xff] }
  0x1c   : > { %4630 = vmatmul.msk.f32.vlgmr.msra.gmra.mxu2 %vm399_vm0, %v379_v40  ;;  %v346_v46 = vld [vmem:[%s5275_s22 + $0x78] sm:$0xff]  ;;  %v381_v48 = vld [vmem:[%s5237_s15 + $0x90] sm:$0xff]  ;;  %v347_v51 = vld [vmem:[%s5275_s22 + $0x80] sm:$0xff] }
  0x1d   : > { %v382_v56 = vld [vmem:[%s5237_s15 + $0x98] sm:$0xff]  ;;  %v348_v58 = vld [vmem:[%s5275_s22 + $0x88] sm:$0xff]  ;;  %v383_v59 = vld [vmem:[%s5237_s15 + $0xa0] sm:$0xff] }
  0x1e   : > { %v349_v63 = vld [vmem:[%s5275_s22 + $0x90] sm:$0xff]  ;;  %v384_v3 = vld [vmem:[%s5237_s15 + $0xa8] sm:$0xff]  ;;  %v350_v8 = vld [vmem:[%s5275_s22 + $0x98] sm:$0xff] }
  0x1f   : > { %v390_v40 = vld [vmem:[%s5237_s15 + $0xd8] sm:$0xff] }
  0x22   : > { %4624 = vmatmul.msk.f32.gmra.mxu1 %vm399_vm0, %v373_v4 }
  0x23   : > { %4616 = vmatmul.msk.f32.gmra.mxu0 %vm399_vm0, %v365_v12  ;;  %v385_v12 = vld [vmem:[%s5237_s15 + $0xb0] sm:$0xff] }
  0x24   : > { %4631 = vmatmul.msk.f32.gmra.mxu2 %vm399_vm0, %v380_v44 }
  0x2a   : > { %4625 = vmatmul.msk.f32.gmra.mxu1 %vm399_vm0, %v374_v6 }
  0x2b   : > { %4617 = vmatmul.msk.f32.gmra.mxu0 %vm399_vm0, %v366_v14  ;;  %v351_v14 = vld [vmem:[%s5275_s22 + $0xa0] sm:$0xff] }
  0x2c   : > { %4632 = vmatmul.msk.f32.gmra.mxu2 %vm399_vm0, %v381_v48  ;;  %v391_v48 = vld [vmem:[%s5237_s15 + $0xe0] sm:$0xff] }
  0x32   : > { %4626 = vmatmul.msk.f32.gmra.mxu1 %vm399_vm0, %v375_v9 }
  0x33   : > { %4618 = vmatmul.msk.f32.gmra.mxu0 %vm399_vm0, %v367_v16  ;;  %v387_v16 = vld [vmem:[%s5237_s15 + $0xc0] sm:$0xff] }
  0x34   : > { %4633 = vmatmul.msk.f32.gmra.mxu2 %vm399_vm0, %v382_v56  ;;  %4638 = vmatmul.msk.f32.vlgmr.msra.gmra.mxu3 %vm399_vm0, %v387_v16 }
  0x3a   : > { %4627 = vmatmul.msk.f32.gmra.mxu1 %vm399_vm0, %v376_v11 }
  0x3b   : > { %4619 = vmatmul.msk.f32.gmra.mxu0 %vm399_vm0, %v368_v18 }
  0x3c   : > { %4634 = vmatmul.msk.f32.gmra.mxu2 %vm399_vm0, %v383_v59 }
  0x42   : > { %4628 = vmatmul.msk.f32.gmra.mxu1 %vm399_vm0, %v377_v13 }
  0x43   : > { %4620 = vmatmul.msk.f32.gmra.mxu0 %vm399_vm0, %v369_v20 }
  0x44   : > { %4635 = vmatmul.msk.f32.gmra.mxu2 %vm399_vm0, %v384_v3 }
  0x4a   : > { %4629 = vmatmul.msk.f32.gmra.mxu1 %vm399_vm0, %v378_v15 }
  0x4b   : > { %4621 = vmatmul.msk.f32.gmra.mxu0 %vm399_vm0, %v370_v22  ;;  %v352_v22 = vld [vmem:[%s5275_s22 + $0xa8] sm:$0xff] }
  0x4c   : > { %4636 = vmatmul.msk.f32.gmra.mxu2 %vm399_vm0, %v385_v12 }
  0x52   : > { %4646 = vmatmul.msk.f32.vlgmr.msrb.gmra.mxu1 %vm609_vm1, %v331_v17 }
  0x5a   : > { %4647 = vmatmul.msk.f32.gmra.mxu1 %vm609_vm1, %v332_v19  ;;  %v386_v19 = vld [vmem:[%s5237_s15 + $0xb8] sm:$0xff] }
  0x5b   : > { %4637 = vmatmul.msk.f32.gmra.mxu2 %vm399_vm0, %v386_v19 }
  0x62   : > { %4648 = vmatmul.msk.f32.gmra.mxu1 %vm609_vm1, %v333_v21 }
  0x6a   : > { %4649 = vmatmul.msk.f32.gmra.mxu1 %vm609_vm1, %v334_v23  ;;  %v388_v23 = vld [vmem:[%s5237_s15 + $0xc8] sm:$0xff] }
  0x6b   : > { %4639 = vmatmul.msk.f32.gmra.mxu3 %vm399_vm0, %v388_v23 }
  0x72   : > { %4650 = vmatmul.msk.f32.gmra.mxu1 %vm609_vm1, %v335_v24 }
  0x7a   : > { %4651 = vmatmul.msk.f32.gmra.mxu1 %vm609_vm1, %v336_v25 }
  0x82   : > { %4652 = vmatmul.msk.f32.gmra.mxu1 %vm609_vm1, %v337_v26  ;;  %v353_v26 = vld [vmem:[%s5275_s22 + $0xb0] sm:$0xff] }
  0x8a   : > { %4653 = vmatmul.msk.f32.gmra.mxu1 %vm609_vm1, %v338_v27  ;;  %v389_v27 = vld [vmem:[%s5237_s15 + $0xd0] sm:$0xff] }
  0x8b   : > { %4640 = vmatmul.msk.f32.gmra.mxu3 %vm399_vm0, %v389_v27  ;;  %v361_v27 = vld [vmem:[%s5275_s22 + $0xf0] sm:$0xff] }
  0x8f   : > { %v5299_v28 = vpop.f32.mrf.mxu1 }
  0x90   : > { %v513_v43 = vpop.f32.mrf.mxu0 }
  0x92   : > { %4654 = vmatmul.msk.f32.gmra.mxu1 %vm609_vm1, %v339_v29 }
  0x93   : > { %4641 = vmatmul.msk.f32.gmra.mxu3 %vm399_vm0, %v390_v40 }
  0x97   : > { %v5303_v30 = vpop.f32.mrf.mxu1 }
  0x98   : > { %v516_v47 = vpop.f32.mrf.mxu0 }
  0x9a   : > { %4655 = vmatmul.msk.f32.gmra.mxu1 %vm609_vm1, %v340_v31 }
  0x9b   : > { %4642 = vmatmul.msk.f32.gmra.mxu3 %vm399_vm0, %v391_v48 }
  0x9f   : > { %v5307_v32 = vpop.f32.mrf.mxu1  ;;  %v5480_v23 = vpop.f32.mrf.mxu2 }
  0xa0   : > { %v519_v54 = vpop.f32.mrf.mxu0 }
  0xa2   : > { %4656 = vmatmul.msk.f32.gmra.mxu1 %vm609_vm1, %v341_v33 }
  0xa7   : > { %v5311_v34 = vpop.f32.mrf.mxu1 }
  0xa8   : > { %v522_v60 = vpop.f32.mrf.mxu0 }
  0xaa   : > { %4657 = vmatmul.msk.f32.gmra.mxu1 %vm609_vm1, %v342_v35 }
  0xaf   : > { %v5315_v36 = vpop.f32.mrf.mxu1 }
  0xb0   : > { %v525_v7 = vpop.f32.mrf.mxu0 }
  0xb2   : > { %4658 = vmatmul.msk.f32.gmra.mxu1 %vm609_vm1, %v343_v37  ;;  %v354_v37 = vld [vmem:[%s5275_s22 + $0xb8] sm:$0xff] }
  0xb7   : > { %v5319_v38 = vpop.f32.mrf.mxu1 }
  0xb8   : > { %v528_v17 = vpop.f32.mrf.mxu0 }
  0xba   : > { %4659 = vmatmul.msk.f32.gmra.mxu1 %vm609_vm1, %v344_v39 }
  0xbf   : > { %v5325_v41 = vpop.f32.mrf.mxu1 }
  0xc0   : > { %v5394_v24 = vpop.f32.mrf.mxu0 }
  0xc2   : > { %4660 = vmatmul.msk.f32.gmra.mxu1 %vm609_vm1, %v345_v42 }
  0xc7   : > { %v5331_v45 = vpop.f32.mrf.mxu1 }
  0xc8   : > { %v534_v31 = vpop.f32.mrf.mxu0 }
  0xca   : > { %4661 = vmatmul.msk.f32.gmra.mxu1 %vm609_vm1, %v346_v46 }
  0xcf   : > { %v723_v50 = vpop.f32.mrf.mxu1 }
  0xd0   : > { %v724_v52 = vadd.f32 %v723_v50, %v513_v43 }
  0xd2   : > { %v5344_v53 = vadd.f32 %v5339_v49, %v724_v52  ;;  %4662 = vmatmul.msk.f32.gmra.mxu1 %vm609_vm1, %v347_v51  ;;  %v356_v52 = vld [vmem:[%s5275_s22 + $0xc8] sm:$0xff] }
  0xd4   : > { %v860_v55 = vsel %vm859_vm2, %v5344_v53, -inf }
  0xd5   : > { %861 = vmax.xlane.f32.xlu0 %v860_v55 }
  0xd7   : > { %v726_v57 = vpop.f32.mrf.mxu1 }
  0xd8   : > { %v727_v61 = vadd.f32 %v726_v57, %v516_v47  ;;  %v355_v47 = vld [vmem:[%s5275_s22 + $0xc0] sm:$0xff] }
  0xda   : > { %4663 = vmatmul.msk.f32.gmra.mxu1 %vm609_vm1, %v348_v58  ;;  %v5361_v2 = vadd.f32 %v5339_v49, %v727_v61  ;;  %v357_v58 = vld [vmem:[%s5275_s22 + $0xd0] sm:$0xff] }
  0xdc   : > { %v4853_v6 = vpack.i.bf16 %v5361_v2, %v5344_v53  ;;  %v863_v50 = vsel %vm859_vm2, %v5361_v2, -inf }
  0xdf   : > { %v729_v62 = vpop.f32.mrf.mxu1 }
  0xe0   : > { %v730_v0 = vadd.f32 %v729_v62, %v519_v54  ;;  %v392_v54 = vld [vmem:[%s5237_s15 + $0xe8] sm:$0xff] }
  0xe1   : > { %4643 = vmatmul.msk.f32.gmra.mxu3 %vm399_vm0, %v392_v54 }
  0xe2   : > { %v5357_v1 = vadd.f32 %v5339_v49, %v730_v0  ;;  %4664 = vmatmul.msk.f32.gmra.mxu1 %vm609_vm1, %v349_v63  ;;  %v858_v63 = vld [vmem:[%s7327_s7 + $0x18] sm:$0xff]  ;;  %v857_v0 = vld [vmem:[%s7327_s7 + $0x10] sm:$0xff] }
  0xe3   : > { %1160 = vmatpush.msrb.mxu2 %v858_v63 }
  0xe4   : > { %v866_v4 = vsel %vm859_vm2, %v5357_v1, -inf }
  0xe5   : > { %867 = vmax.xlane.f32.xlu1 %v866_v4  ;;  %1161 = vmatpush.msrb.mxu2 %v857_v0  ;;  %v359_v4 = vld [vmem:[%s5275_s22 + $0xe0] sm:$0xff]  ;;  %v5536_v0 = vpop.f32.mrf.mxu3 }
  0xe7   : > { %v732_v5 = vpop.f32.mrf.mxu1 }
  0xe8   : > { %v733_v9 = vadd.f32 %v732_v5, %v522_v60  ;;  %v856_v5 = vld [vmem:[%s7327_s7 + $0x8] sm:$0xff] }
  0xe9   : > { %4854 = vrot.lane.b32.xlu0 %v4853_v6, %s5171_s25  ;;  %1162 = vmatpush.msrb.mxu2 %v856_v5  ;;  %v855_v6 = vld [vmem:[%s7327_s7] sm:$0xff] }
  0xea   : > { %v5372_v10 = vadd.f32 %v5339_v49, %v733_v9  ;;  %4665 = vmatmul.msk.f32.gmra.mxu1 %vm609_vm1, %v350_v8  ;;  %v360_v9 = vld [vmem:[%s5275_s22 + $0xe8] sm:$0xff] }
  0xeb   : > { %1163 = vmatpush.msrb.mxu2 %v855_v6 }
  0xec   : > { %v869_v11 = vsel %vm859_vm2, %v5372_v10, -inf  ;;  %v4858_v62 = vpack.i.bf16 %v5372_v10, %v5357_v1 }
  0xed   : > { %870 = vmax.xlane.f32.xlu1 %v869_v11 }
  0xef   : > { %v735_v13 = vpop.f32.mrf.mxu1 }
  0xf0   : > { %v736_v15 = vadd.f32 %v735_v13, %v525_v7 }
  0xf2   : > { %v5383_v18 = vadd.f32 %v5339_v49, %v736_v15  ;;  %4666 = vmatmul.msk.f32.gmra.mxu1 %vm609_vm1, %v351_v14 }
  0xf4   : > { %v872_v20 = vsel %vm859_vm2, %v5383_v18, -inf }
  0xf5   : > { %873 = vmax.xlane.f32.xlu2 %v872_v20 }
  0xf7   : > { %v738_v21 = vpop.f32.mrf.mxu1 }
  0xf8   : > { %v739_v29 = vadd.f32 %v738_v21, %v528_v17 }
  0xfa   : > { %4667 = vmatmul.msk.f32.gmra.mxu1 %vm609_vm1, %v352_v22  ;;  %v5403_v33 = vadd.f32 %v5339_v49, %v739_v29  ;;  %v394_v29 = vld [vmem:[%s5237_s15 + $0xf8] sm:$0xff] }
  0xfc   : > { %v4863_v43 = vpack.i.bf16 %v5403_v33, %v5383_v18  ;;  %v875_v7 = vsel %vm859_vm2, %v5403_v33, -inf }
  0xff   : > { %v5396_v25 = vpop.f32.mrf.mxu1 }
 0x102   : > { %4668 = vmatmul.msk.f32.gmra.mxu1 %vm609_vm1, %v353_v26 }
 0x107   : > { %v744_v35 = vpop.f32.mrf.mxu1 }
 0x108   : > { %v745_v39 = vadd.f32 %v744_v35, %v534_v31 }
 0x10a   : > { %v5409_v42 = vadd.f32 %v5339_v49, %v745_v39  ;;  %4669 = vmatmul.msk.f32.gmra.mxu1 %vm609_vm1, %v354_v37  ;;  %v564_v37 = vpop.f32.mrf.mxu2 }
 0x10c   : > { %v881_v44 = vsel %vm859_vm2, %v5409_v42, -inf }
 0x10d   : > { %4864 = vrot.lane.b32.xlu2 %v4863_v43, %s5171_s25  ;;  %882 = vmax.xlane.f32.xlu1 %v881_v44  ;;  %v362_v43 = vld [vmem:[%s5275_s22 + $0xf8] sm:$0xff] }
 0x10f   : > { %v747_v46 = vpop.f32.mrf.mxu1 }
 0x110   : > { %v748_v56 = vadd.f32 %v747_v46, %v5299_v28 }
 0x112   : > { %4670 = vmatmul.msk.f32.gmra.mxu1 %vm609_vm1, %v355_v47  ;;  %v5434_v60 = vadd.f32 %v5339_v49, %v748_v56 }
 0x113   : > { %864 = vmax.xlane.f32.xlu0 %v863_v50 }
 0x114   : > { %v884_v12 = vsel %vm859_vm2, %v5434_v60, -inf }
 0x117   : > { %v750_v51 = vpop.f32.mrf.mxu1 }
 0x118   : > { %v751_v55 = vadd.f32 %v750_v51, %v5303_v30  ;;  %v358_v30 = vld [vmem:[%s5275_s22 + $0xd8] sm:$0xff] }
 0x11a   : > { %4671 = vmatmul.msk.f32.gmra.mxu1 %vm609_vm1, %v356_v52  ;;  %v5431_v59 = vadd.f32 %v5339_v49, %v751_v55 }
 0x11c   : > { %v4873_v61 = vpack.i.bf16 %v5434_v60, %v5431_v59 }
 0x11f   : > { %v753_v57 = vpop.f32.mrf.mxu1 }
 0x120   : > { %v754_v16 = vadd.f32 %v753_v57, %v5307_v32  ;;  %v393_v32 = vld [vmem:[%s5237_s15 + $0xf0] sm:$0xff] }
 0x121   : > { %4644 = vmatmul.msk.f32.gmra.mxu3 %vm399_vm0, %v393_v32 }
 0x122   : > { %4672 = vmatmul.msk.f32.gmra.mxu1 %vm609_vm1, %v357_v58  ;;  %v5478_v21 = vadd.f32 %v5339_v49, %v754_v16  ;;  %v5549_v16 = vpop.f32.mrf.mxu3 }
 0x126   : > { %4874 = vrot.lane.b32.xlu1 %v4873_v61, %s5171_s25 }
 0x127   : > { %v756_v28 = vpop.f32.mrf.mxu1  ;;  %4859 = vrot.lane.b32.xlu0 %v4858_v62, %s5171_s25 }
 0x128   : > { %v757_v11 = vadd.f32 %v756_v28, %v5311_v34  ;;  %v742_v34 = vadd.f32 %v5396_v25, %v5394_v24  ;;  %v890_v24 = vsel %vm859_vm2, %v5478_v21, -inf }
 0x129   : > { %4645 = vmatmul.msk.f32.gmra.mxu3 %vm399_vm0, %v394_v29 }
 0x12a   : > { %4673 = vmatmul.msk.f32.gmra.mxu1 %vm609_vm1, %v358_v30  ;;  %v5467_v14 = vadd.f32 %v5339_v49, %v757_v11  ;;  %v5483_v26 = vadd.f32 %v5339_v49, %v742_v34 }
 0x12c   : > { %v893_v15 = vsel %vm859_vm2, %v5467_v14, -inf  ;;  %v4868_v52 = vpack.i.bf16 %v5409_v42, %v5483_v26  ;;  %v4878_v54 = vpack.i.bf16 %v5478_v21, %v5467_v14 }
 0x12f   : > { %v759_v3 = vpop.f32.mrf.mxu1 }
 0x130   : > { %v760_v39 = vadd.f32 %v759_v3, %v5315_v36  ;;  %v5512_v36 = vpop.f32.mrf.mxu2 }
 0x132   : > { %4674 = vmatmul.msk.f32.gmra.mxu1 %vm609_vm1, %v359_v4  ;;  %v5506_v46 = vadd.f32 %v5339_v49, %v760_v39 }
 0x134   : > { %v896_v39 = vsel %vm859_vm2, %v5506_v46, -inf }
 0x136   : > { %876 = vmax.xlane.f32.xlu2 %v875_v7 }
 0x137   : > { %v762_v8 = vpop.f32.mrf.mxu1 }
 0x138   : > { %v763_v35 = vadd.f32 %v762_v8, %v5319_v38  ;;  %v5524_v56 = vpop.f32.mrf.mxu2 }
 0x13a   : > { %4675 = vmatmul.msk.f32.gmra.mxu1 %vm609_vm1, %v360_v9  ;;  %v5503_v44 = vadd.f32 %v5339_v49, %v763_v35 }
 0x13c   : > { %v4883_v38 = vpack.i.bf16 %v5506_v46, %v5503_v44 }
 0x13e   : > { %885 = vmax.xlane.f32.xlu2 %v884_v12 }
 0x13f   : > { %v765_v13 = vpop.f32.mrf.mxu1 }
 0x140   : > { %v573_v58 = vpop.f32.mrf.mxu2  ;;  %v766_v28 = vadd.f32 %v765_v13, %v5325_v41 }
 0x142   : > { %4676 = vmatmul.msk.f32.gmra.mxu1 %vm609_vm1, %v361_v27  ;;  %v5534_v63 = vadd.f32 %v5339_v49, %v766_v28 }
 0x144   : > { %v902_v6 = vsel %vm859_vm2, %v5534_v63, -inf }
 0x146   : > { %894 = vmax.xlane.f32.xlu2 %v893_v15 }
 0x147   : > { %v5472_v17 = vpop.f32.mrf.mxu1 }
 0x148   : > { %v862_v19 = vpop.xlane.xlu0 %861  ;;  %v5528_v62 = vpop.f32.mrf.mxu2  ;;  %v769_v35 = vadd.f32 %v5472_v17, %v5331_v45 }
 0x149   : > { %v956_v20 = vsub.f32 %v5344_v53, %v862_v19  ;;  %v878_v53 = vsel %vm859_vm2, %v5483_v26, -inf }
 0x14a   : > { %4677 = vmatmul.msk.f32.gmra.mxu1 %vm609_vm1, %v362_v43  ;;  %v5585_v45 = vadd.f32 %v5339_v49, %v769_v35 }
 0x14b   : > { %v988_v22 = vmul.f32 1.442695, %v956_v20 }
 0x14d   : > { %4935 = vpow2.f32 %v988_v22 }
 0x14f   : > { %v771_v25 = vpop.f32.mrf.mxu1 }
 0x150   : > { %891 = vmax.xlane.f32.xlu1 %v890_v24  ;;  %v5541_v8 = vpop.f32.mrf.mxu2  ;;  %v772_v22 = vadd.f32 %v771_v25, %v5480_v23 }
 0x151   : > { %879 = vmax.xlane.f32.xlu0 %v878_v53  ;;  %v899_v53 = vsel %vm859_vm2, %v5503_v44, -inf }
 0x152   : > { %v5567_v29 = vadd.f32 %v5339_v49, %v772_v22  ;;  %v4888_v22 = vpack.i.bf16 %v5534_v63, %v5585_v45 }
 0x153   : > { %v5494_v31 = vpop.eup %4935 }
 0x154   : > { %4678 = vmatmul.msk.f32.vlgmr.msrb.gmra.mxu2 %vm859_vm2, %v5494_v31 }
 0x157   : > { %v774_v40 = vpop.f32.mrf.mxu1 }
 0x158   : > { %v775_v3 = vadd.f32 %v774_v40, %v564_v37  ;;  %v868_v4 = vpop.xlane.xlu1 %867  ;;  %v582_v24 = vpop.f32.mrf.mxu2 }
 0x159   : > { %v958_v12 = vsub.f32 %v5357_v1, %v868_v4 }
 0x15a   : > { %v5544_v41 = vadd.f32 %v5339_v49, %v775_v3 }
 0x15b   : > { %v4855_v47 = vpop.permute.xlu0 %4854  ;;  %v992_v34 = vmul.f32 1.442695, %v958_v12 }
 0x15c   : > { %v4857_v48 = vunpack.i.h.bf16 %v4855_v47  ;;  %v4856_v50 = vunpack.i.l.bf16 %v4855_v47  ;;  %v911_v15 = vsel %vm859_vm2, %v5544_v41, -inf }
 0x15e   : > { %4884 = vrot.lane.b32.xlu2 %v4883_v38, %s5171_s25  ;;  %2496 = vmatpush.msrb.mxu3 %v4857_v48  ;;  %v908_v38 = vsel %vm859_vm2, %v5567_v29, -inf }
 0x15f   : > { %v5514_v51 = vpop.f32.mrf.mxu1 }
 0x160   : > { %2497 = vmatpush.msrb.mxu3 %v4856_v50  ;;  %v871_v20 = vpop.xlane.xlu1 %870 }
 0x161   : > { %v959_v27 = vsub.f32 %v5372_v10, %v871_v20  ;;  %v591_v10 = vpop.f32.mrf.mxu3 }
 0x163   : > { %v994_v40 = vmul.f32 1.442695, %v959_v27 }
 0x165   : > { %4869 = vrot.lane.b32.xlu0 %v4868_v52, %s5171_s25 }
 0x167   : > { %v5521_v55 = vpop.f32.mrf.mxu1 }
 0x168   : > { %v874_v37 = vpop.xlane.xlu2 %873 }
 0x169   : > { %4879 = vrot.lane.b32.xlu1 %v4878_v54, %s5171_s25  ;;  %v960_v52 = vsub.f32 %v5383_v18, %v874_v37  ;;  %v5598_v18 = vpop.f32.mrf.mxu3 }
 0x16b   : > { %v996_v28 = vmul.f32 1.442695, %v960_v52 }
 0x16f   : > { %v783_v57 = vpop.f32.mrf.mxu1 }
 0x170   : > { %v784_v13 = vadd.f32 %v783_v57, %v573_v58  ;;  %v905_v58 = vsel %vm859_vm2, %v5585_v45, -inf }
 0x172   : > { %v5557_v1 = vadd.f32 %v5339_v49, %v784_v13 }
 0x174   : > { %v920_v23 = vsel %vm859_vm2, %v5557_v1, -inf }
 0x177   : > { %v5526_v61 = vpop.f32.mrf.mxu1 }
 0x17f   : > { %v5531_v30 = vpop.f32.mrf.mxu1 }
 0x186   : > { %v865_v5 = vpop.xlane.xlu0 %864 }
 0x187   : > { %v957_v7 = vsub.f32 %v5361_v2, %v865_v5  ;;  %903 = vmax.xlane.f32.xlu2 %v902_v6  ;;  %v792_v9 = vpop.f32.mrf.mxu1  ;;  %v887_v2 = vsel %vm859_vm2, %v5431_v59, -inf  ;;  %v5596_v6 = vpop.permute.xlu2 %4864 }
 0x188   : > { %v793_v25 = vadd.f32 %v792_v9, %v582_v24  ;;  %v4893_v24 = vpack.i.bf16 %v5567_v29, %v5544_v41 }
 0x189   : > { %v990_v11 = vmul.f32 1.442695, %v957_v7 }
 0x18a   : > { %v5578_v47 = vadd.f32 %v5339_v49, %v793_v25 }
 0x18b   : > { %4937 = vpow2.f32 %v990_v11 }
 0x18c   : > { %4939 = vpow2.f32 %v992_v34  ;;  %v929_v57 = vsel %vm859_vm2, %v5578_v47, -inf }
 0x18d   : > { %4941 = vpow2.f32 %v994_v40  ;;  %v883_v40 = vpop.xlane.xlu1 %882 }
 0x18e   : > { %4943 = vpow2.f32 %v996_v28 }
 0x18f   : > { %912 = vmax.xlane.f32.xlu2 %v911_v15  ;;  %888 = vmax.xlane.f32.xlu0 %v887_v2  ;;  %v5553_v19 = vpop.f32.mrf.mxu1  ;;  %v597_v2 = vpop.f32.mrf.mxu3 }
 0x191   : > { %v5559_v32 = vpop.eup %4937 }
 0x192   : > { %4679 = vmatmul.msk.f32.gmra.mxu2 %vm859_vm2, %v5559_v32  ;;  %v5582_v48 = vpop.eup %4939 }
 0x193   : > { %900 = vmax.xlane.f32.xlu1 %v899_v53  ;;  %v5594_v5 = vpop.eup %4941 }
 0x194   : > { %v5607_v12 = vpop.eup %4943 }
 0x197   : > { %921 = vmax.xlane.f32.xlu2 %v920_v23  ;;  %897 = vmax.xlane.f32.xlu0 %v896_v39  ;;  %v5575_v43 = vpop.f32.mrf.mxu1 }
 0x199   : > { %v4860_v50 = vpop.permute.xlu0 %4859 }
 0x19a   : > { %v4862_v17 = vunpack.i.h.bf16 %v4860_v50  ;;  %4680 = vmatmul.msk.f32.gmra.mxu2 %vm859_vm2, %v5582_v48  ;;  %v4861_v54 = vunpack.i.l.bf16 %v4860_v50 }
 0x19b   : > { %909 = vmax.xlane.f32.xlu1 %v908_v38  ;;  %v963_v38 = vsub.f32 %v5409_v42, %v883_v40 }
 0x19c   : > { %2577 = vmatpush.msra.mxu3 %v4862_v17 }
 0x19d   : > { %v1002_v50 = vmul.f32 1.442695, %v963_v38  ;;  %v5707_v38 = vpop.permute.xlu1 %4874 }
 0x19e   : > { %2578 = vmatpush.msra.mxu3 %v4861_v54 }
 0x19f   : > { %930 = vmax.xlane.f32.xlu2 %v929_v57  ;;  %906 = vmax.xlane.f32.xlu0 %v905_v58  ;;  %v801_v3 = vpop.f32.mrf.mxu1  ;;  %v778_v57 = vadd.f32 %v5514_v51, %v5512_v36  ;;  %v790_v51 = vadd.f32 %v5531_v30, %v5541_v8  ;;  %v799_v30 = vadd.f32 %v5575_v43, %v5549_v16 }
 0x1a0   : > { %v802_v4 = vadd.f32 %v801_v3, %v591_v10 }
 0x1a1   : > { %v5639_v42 = vadd.f32 %v5339_v49, %v778_v57 }
 0x1a2   : > { %4681 = vmatmul.msk.f32.gmra.mxu2 %vm859_vm2, %v5594_v5  ;;  %v5603_v7 = vadd.f32 %v5339_v49, %v802_v4 }
 0x1a3   : > { %v914_v36 = vsel %vm859_vm2, %v5639_v42, -inf }
 0x1a4   : > { %v938_v9 = vsel %vm859_vm2, %v5603_v7, -inf }
 0x1a7   : > { %939 = vmax.xlane.f32.xlu2 %v938_v9  ;;  %v804_v11 = vpop.f32.mrf.mxu1  ;;  %v5662_v9 = vadd.f32 %v5339_v49, %v790_v51 }
 0x1a9   : > { %v877_v13 = vpop.xlane.xlu2 %876  ;;  %v926_v8 = vsel %vm859_vm2, %v5662_v9, -inf }
 0x1aa   : > { %v961_v15 = vsub.f32 %v5403_v33, %v877_v13  ;;  %4682 = vmatmul.msk.f32.gmra.mxu2 %vm859_vm2, %v5607_v12  ;;  %v600_v33 = vpop.f32.mrf.mxu3 }
 0x1ac   : > { %v998_v34 = vmul.f32 1.442695, %v961_v15 }
 0x1ae   : > { %4945 = vpow2.f32 %v998_v34 }
 0x1af   : > { %v807_v20 = vpop.f32.mrf.mxu1 }
 0x1b1   : > { %v886_v17 = vpop.xlane.xlu2 %885 }
 0x1b2   : > { %v964_v54 = vsub.f32 %v5434_v60, %v886_v17  ;;  %v787_v60 = vadd.f32 %v5526_v61, %v5528_v62  ;;  %v796_v61 = vadd.f32 %v5553_v19, %v5536_v0  ;;  %v603_v15 = vpop.f32.mrf.mxu3  ;;  %v805_v0 = vadd.f32 %v804_v11, %v5598_v18 }
 0x1b3   : > { %4889 = vrot.lane.b32.xlu0 %v4888_v22, %s5171_s25  ;;  %v5678_v22 = vadd.f32 %v5339_v49, %v799_v30 }
 0x1b4   : > { %v5617_v53 = vpop.eup %4945  ;;  %4894 = vrot.lane.b32.xlu1 %v4893_v24, %s5171_s25  ;;  %v1004_v58 = vmul.f32 1.442695, %v964_v54  ;;  %v5675_v13 = vadd.f32 %v5339_v49, %v796_v61  ;;  %v808_v24 = vadd.f32 %v807_v20, %v597_v2  ;;  %v5686_v43 = vadd.f32 %v5339_v49, %v805_v0 }
 0x1b5   : > { %4683 = vmatmul.msk.f32.gmra.mxu2 %vm859_vm2, %v5617_v53  ;;  %v935_v16 = vsel %vm859_vm2, %v5678_v22, -inf }
 0x1b6   : > { %v932_v19 = vsel %vm859_vm2, %v5675_v13, -inf  ;;  %v941_v18 = vsel %vm859_vm2, %v5686_v43, -inf }
 0x1b7   : > { %v810_v27 = vpop.f32.mrf.mxu1 }
 0x1b8   : > { %v811_v23 = vadd.f32 %v810_v27, %v600_v33  ;;  %v5689_v33 = vadd.f32 %v5339_v49, %v808_v24 }
 0x1ba   : > { %v5623_v25 = vadd.f32 %v5339_v49, %v811_v23  ;;  %7356 = vst [vmem:[#allocation3_spill] sm:$0xff] %v5689_v33  ;;  %v606_v27 = vpop.f32.mrf.mxu3  ;;  %v944_v11 = vsel %vm859_vm2, %v5689_v33, -inf }
 0x1bc   : > { %7355 = vst [vmem:[#allocation2_spill] sm:$0xff] %v5623_v25  ;;  %v947_v35 = vsel %vm859_vm2, %v5623_v25, -inf }
 0x1bd   : > { %948 = vmax.xlane.f32.xlu2 %v947_v35 }
 0x1bf   : > { %v813_v34 = vpop.f32.mrf.mxu1 }
 0x1c0   : > { %v814_v35 = vadd.f32 %v813_v34, %v603_v15 }
 0x1c2   : > { %v5696_v20 = vadd.f32 %v5339_v49, %v814_v35 }
 0x1c3   : > { %v892_v57 = vpop.xlane.xlu1 %891 }
 0x1c4   : > { %v880_v37 = vpop.xlane.xlu0 %879  ;;  %7357 = vst [vmem:[#allocation4_spill] sm:$0xff] %v5696_v20  ;;  %v950_v40 = vsel %vm859_vm2, %v5696_v20, -inf }
 0x1c5   : > { %v962_v39 = vsub.f32 %v5483_v26, %v880_v37  ;;  %v781_v26 = vadd.f32 %v5521_v55, %v5524_v56  ;;  %v5657_v56 = vadd.f32 %v5339_v49, %v787_v60 }
 0x1c7   : > { %v1000_v10 = vmul.f32 1.442695, %v962_v39  ;;  %v5644_v3 = vadd.f32 %v5339_v49, %v781_v26  ;;  %v923_v62 = vsel %vm859_vm2, %v5657_v56, -inf  ;;  %v816_v23 = vpop.f32.mrf.mxu1  ;;  %v966_v26 = vsub.f32 %v5478_v21, %v892_v57 }
 0x1c8   : > { %v817_v2 = vadd.f32 %v816_v23, %v606_v27 }
 0x1c9   : > { %4947 = vpow2.f32 %v1000_v10  ;;  %v917_v55 = vsel %vm859_vm2, %v5644_v3, -inf  ;;  %v1008_v60 = vmul.f32 1.442695, %v966_v26 }
 0x1ca   : > { %4949 = vpow2.f32 %v1002_v50  ;;  %v5699_v37 = vadd.f32 %v5339_v49, %v817_v2 }
 0x1cb   : > { %4951 = vpow2.f32 %v1004_v58 }
 0x1cc   : > { %7358 = vst [vmem:[#allocation5_spill] sm:$0xff] %v5699_v37  ;;  %v953_v10 = vsel %vm859_vm2, %v5699_v37, -inf }
 0x1cf   : > { %v5629_v52 = vpop.eup %4947 }
 0x1d0   : > { %4684 = vmatmul.msk.f32.gmra.mxu2 %vm859_vm2, %v5629_v52  ;;  %v5641_v28 = vpop.eup %4949 }
 0x1d1   : > { %v5659_v4 = vpop.eup %4951 }
 0x1d7   : > { %v5701_v39 = vpop.permute.xlu0 %4869  ;;  %v1165_v50 = vpop.f32.mrf.mxu2 }
 0x1d8   : > { %4685 = vmatmul.msk.f32.gmra.mxu2 %vm859_vm2, %v5641_v28  ;;  %4953 = vrcp.f32 %v1165_v50  ;;  %v1272_v27 = vand.u32 2147483648, %v1165_v50  ;;  %vm1266_vm4 = vweird.f32 %v1165_v50  ;;  %v1270_v23 = vand.u32 2147483647, %v1165_v50 }
 0x1da   : > { %vm1271_vm6 = vcmp.eq.f32.partialorder %v1270_v23, 8.507059e+37 }
 0x1db   : > { %v5711_v51 = vpop.permute.xlu1 %4879 }
 0x1dd   : > { %915 = vmax.xlane.f32.xlu0 %v914_v36 }
 0x1de   : > { %918 = vmax.xlane.f32.xlu1 %v917_v55  ;;  %v4954_v58 = vpop.eup %4953  ;;  %v895_v55 = vpop.xlane.xlu2 %894 }
 0x1df   : > { %v1262_v36 = vmul.f32 %v4954_v58, %v1165_v50  ;;  %vm1267_vm3 = vweird.f32 %v4954_v58 }
 0x1e0   : > { %4686 = vmatmul.msk.f32.gmra.mxu2 %vm859_vm2, %v5659_v4  ;;  %vm1268_vm5 = vmor %vm1266_vm4, %vm1267_vm3 }
 0x1e1   : > { %v1263_v30 = vsub.f32 1.0, %v1262_v36 }
 0x1e5   : > { %924 = vmax.xlane.f32.xlu0 %v923_v62  ;;  %v4913_v62 = vpack.i.bf16 %v5686_v43, %v5578_v47 }
 0x1e6   : > { %927 = vmax.xlane.f32.xlu1 %v926_v8  ;;  %v1264_v8 = vmul.f32 %v4954_v58, %v1263_v30  ;;  %v5729_v2 = vpop.permute.xlu2 %4884 }
 0x1e7   : > { %7359 = vst [vmem:[#allocation6_spill] sm:$0xff] %v5729_v2 }
 0x1ed   : > { %933 = vmax.xlane.f32.xlu0 %v932_v19  ;;  %v4903_v19 = vpack.i.bf16 %v5675_v13, %v5678_v22 }
 0x1ee   : > { %936 = vmax.xlane.f32.xlu1 %v935_v16 }
 0x1f5   : > { %942 = vmax.xlane.f32.xlu0 %v941_v18 }
 0x1f6   : > { %945 = vmax.xlane.f32.xlu1 %v944_v11 }
 0x1fd   : > { %951 = vmax.xlane.f32.xlu0 %v950_v40  ;;  %v1273_v40 = vor.u32 1.1754944e-38, %v1272_v27 }
 0x1fe   : > { %954 = vmax.xlane.f32.xlu1 %v953_v10 }
 0x202   : > { %v889_v17 = vpop.xlane.xlu0 %888 }
 0x203   : > { %v965_v54 = vsub.f32 %v5431_v59, %v889_v17  ;;  %v967_v59 = vsub.f32 %v5467_v14, %v895_v55  ;;  %v1265_v14 = vadd.f32 %v4954_v58, %v1264_v8  ;;  %v904_v8 = vpop.xlane.xlu2 %903 }
 0x205   : > { %v1006_v49 = vmul.f32 1.442695, %v965_v54  ;;  %v1010_v21 = vmul.f32 1.442695, %v967_v59  ;;  %v1269_v18 = vsel %vm1268_vm5, %v4954_v58, %v1265_v14  ;;  %v4908_v54 = vpack.i.bf16 %v5557_v1, %v5657_v56 }
 0x206   : > { %v901_v15 = vpop.xlane.xlu1 %900 }
 0x207   : > { %4955 = vpow2.f32 %v1006_v49  ;;  %v969_v26 = vsub.f32 %v5503_v44, %v901_v15 }
 0x208   : > { %4957 = vpow2.f32 %v1008_v60 }
 0x209   : > { %v1014_v30 = vmul.f32 1.442695, %v969_v26 }
 0x20a   : > { %v898_v34 = vpop.xlane.xlu0 %897 }
 0x20b   : > { %v968_v16 = vsub.f32 %v5506_v46, %v898_v34  ;;  %v1274_v46 = vsel %vm1271_vm6, %v1273_v40, %v1269_v18 }
 0x20c   : > { %v1709_v55 = vmul.f32 0.7711054, %v1274_v46 }
 0x20d   : > { %v5713_v61 = vpop.eup %4955  ;;  %v1012_v11 = vmul.f32 1.442695, %v968_v16 }
 0x20e   : > { %4687 = vmatmul.msk.f32.gmra.mxu2 %vm859_vm2, %v5713_v61  ;;  %v5723_v24 = vpop.eup %4957  ;;  %v5735_v49 = vpop.xlane.xlu1 %909  ;;  %v5744_v27 = vmul.f32 %v5494_v31, %v1709_v55 }
 0x210   : > { %7360 = vst [vmem:[#allocation7_spill] sm:$0xff] %v5744_v27  ;;  %v1773_v31 = vsel %vm859_vm2, %v5744_v27, -inf }
 0x211   : > { %4914 = vrot.lane.b32.xlu0 %v4913_v62, %s5171_s25 }
 0x215   : > { %v1168_v0 = vpop.f32.mrf.mxu2 }
 0x216   : > { %4959 = vrcp.f32 %v1168_v0  ;;  %4688 = vmatmul.msk.f32.gmra.mxu2 %vm859_vm2, %v5723_v24  ;;  %v1286_v58 = vand.u32 2147483648, %v1168_v0  ;;  %v1284_v36 = vand.u32 2147483647, %v1168_v0  ;;  %vm1280_vm8 = vweird.f32 %v1168_v0 }
 0x217   : > { %4904 = vrot.lane.b32.xlu1 %v4903_v19, %s5171_s25  ;;  %4961 = vpow2.f32 %v1010_v21 }
 0x218   : > { %v1287_v21 = vor.u32 1.1754944e-38, %v1286_v58  ;;  %vm1285_vm10 = vcmp.eq.f32.partialorder %v1284_v36, 8.507059e+37  ;;  %v907_v36 = vpop.xlane.xlu0 %906 }
 0x21c   : > { %v4960_v35 = vpop.eup %4959 }
 0x21d   : > { %v1276_v10 = vmul.f32 %v4960_v35, %v1168_v0  ;;  %v1171_v17 = vpop.f32.mrf.mxu2  ;;  %v5733_v57 = vpop.eup %4961  ;;  %vm1281_vm7 = vweird.f32 %v4960_v35  ;;  %v970_v0 = vsub.f32 %v5534_v63, %v904_v8 }
 0x21e   : > { %4963 = vrcp.f32 %v1171_v17  ;;  %4689 = vmatmul.msk.f32.gmra.mxu2 %vm859_vm2, %v5733_v57  ;;  %vm1282_vm9 = vmor %vm1280_vm8, %vm1281_vm7  ;;  %vm1294_vm12 = vweird.f32 %v1171_v17 }
 0x21f   : > { %v1277_v50 = vsub.f32 1.0, %v1276_v10  ;;  %4909 = vrot.lane.b32.xlu1 %v4908_v54, %s5171_s25  ;;  %4965 = vpow2.f32 %v1012_v11  ;;  %v1300_v10 = vand.u32 2147483648, %v1171_v17  ;;  %v1016_v58 = vmul.f32 1.442695, %v970_v0 }
 0x221   : > { %v1278_v60 = vmul.f32 %v4960_v35, %v1277_v50  ;;  %v1298_v50 = vand.u32 2147483647, %v1171_v17 }
 0x223   : > { %v1279_v62 = vadd.f32 %v4960_v35, %v1278_v60  ;;  %vm1299_vm14 = vcmp.eq.f32.partialorder %v1298_v50, 8.507059e+37  ;;  %v972_v60 = vsub.f32 %v5567_v29, %v5735_v49 }
 0x224   : > { %v4964_v59 = vpop.eup %4963 }
 0x225   : > { %v1283_v34 = vsel %vm1282_vm9, %v4960_v35, %v1279_v62  ;;  %v1290_v19 = vmul.f32 %v4964_v59, %v1171_v17  ;;  %v1174_v14 = vpop.f32.mrf.mxu2  ;;  %v5741_v16 = vpop.eup %4965  ;;  %vm1295_vm11 = vweird.f32 %v4964_v59  ;;  %v1301_v17 = vor.u32 1.1754944e-38, %v1300_v10 }
 0x226   : > { %v1288_v44 = vsel %vm1285_vm10, %v1287_v21, %v1283_v34  ;;  %4967 = vrcp.f32 %v1174_v14  ;;  %v4895_v15 = vpop.permute.xlu1 %4894  ;;  %4690 = vmatmul.msk.f32.gmra.mxu2 %vm859_vm2, %v5741_v16  ;;  %vm5756_vm13 = vmor %vm1294_vm12, %vm1295_vm11  ;;  %vm1308_vm0 = vweird.f32 %v1174_v14 }
 0x227   : > { %v1710_v23 = vmul.f32 0.7711054, %v1288_v44  ;;  %v1291_v18 = vsub.f32 1.0, %v1290_v19  ;;  %4969 = vpow2.f32 %v1014_v30  ;;  %v4896_v35 = vunpack.i.l.bf16 %v4895_v15 }
 0x228   : > { %v4897_v54 = vunpack.i.h.bf16 %v4895_v15  ;;  %v971_v19 = vsub.f32 %v5585_v45, %v907_v36  ;;  %v1314_v15 = vand.u32 2147483648, %v1174_v14 }
 0x229   : > { %v5750_v11 = vmul.f32 %v5559_v32, %v1710_v23  ;;  %v1292_v40 = vmul.f32 %v4964_v59, %v1291_v18  ;;  %3144 = vmatpush.msrb.mxu0 %v4896_v35  ;;  %v1312_v23 = vand.u32 2147483647, %v1174_v14 }
 0x22b   : > { %7361 = vst [vmem:[#allocation8_spill] sm:$0xff] %v5750_v11  ;;  %v1293_v46 = vadd.f32 %v4964_v59, %v1292_v40  ;;  %v1774_v26 = vsel %vm859_vm2, %v5750_v11, -inf  ;;  %3145 = vmatpush.msrb.mxu0 %v4897_v54  ;;  %v1018_v54 = vmul.f32 1.442695, %v971_v19  ;;  %vm1313_vm4 = vcmp.eq.f32.partialorder %v1312_v23, 8.507059e+37 }
 0x22c   : > { %v4968_v63 = vpop.eup %4967  ;;  %v1775_v32 = vmax.f32 %v1773_v31, %v1774_v26  ;;  %v1315_v31 = vor.u32 1.1754944e-38, %v1314_v15  ;;  %v913_v15 = vpop.xlane.xlu2 %912 }
 0x22d   : > { %v1297_v55 = vsel %vm5756_vm13, %v4964_v59, %v1293_v46  ;;  %v1304_v62 = vmul.f32 %v4968_v63, %v1174_v14  ;;  %v5762_v30 = vpop.f32.mrf.mxu2  ;;  %v5764_v21 = vpop.eup %4969  ;;  %vm1309_vm15 = vweird.f32 %v4968_v63 }
 0x22e   : > { %4971 = vrcp.f32 %v5762_v30  ;;  %4691 = vmatmul.msk.f32.gmra.mxu2 %vm859_vm2, %v5764_v21  ;;  %v1776_v34 = vrot.slane %v1775_v32, 4  ;;  %v1302_v44 = vsel %vm1299_vm14, %v1301_v17, %v1297_v55  ;;  %vm1310_vm3 = vmor %vm1308_vm0, %vm1309_vm15  ;;  %vm1322_vm6 = vweird.f32 %v5762_v30 }
 0x22f   : > { %v1305_v8 = vsub.f32 1.0, %v1304_v62  ;;  %4973 = vpow2.f32 %v1016_v58  ;;  %v1711_v0 = vmul.f32 0.7711054, %v1302_v44 }
 0x230   : > { %v1777_v18 = vmax.f32 %v1775_v32, %v1776_v34  ;;  %4975 = vpow2.f32 %v1018_v54  ;;  %v1020_v34 = vmul.f32 1.442695, %v972_v60 }
 0x231   : > { %v1306_v59 = vmul.f32 %v4968_v63, %v1305_v8  ;;  %v5778_v14 = vmul.f32 %v5582_v48, %v1711_v0 }
 0x232   : > { %v1778_v40 = vrot.slane %v1777_v18, 2 }
 0x233   : > { %v1307_v35 = vadd.f32 %v4968_v63, %v1306_v59  ;;  %7364 = vst [vmem:[#allocation9_spill] sm:$0xff] %v5778_v14  ;;  %v1782_v29 = vsel %vm859_vm2, %v5778_v14, -inf }
 0x234   : > { %v4972_v10 = vpop.eup %4971  ;;  %v1779_v58 = vmax.f32 %v1777_v18, %v1778_v40  ;;  %v1326_v18 = vand.u32 2147483647, %v5762_v30 }
 0x235   : > { %v1311_v46 = vsel %vm1310_vm3, %v4968_v63, %v1307_v35  ;;  %v1318_v50 = vmul.f32 %v4972_v10, %v5762_v30  ;;  %v5771_v26 = vpop.eup %4973  ;;  %vm1323_vm5 = vweird.f32 %v4972_v10 }
 0x236   : > { %v1316_v45 = vsel %vm1313_vm4, %v1315_v31, %v1311_v46  ;;  %4692 = vmatmul.msk.f32.gmra.mxu2 %vm859_vm2, %v5771_v26  ;;  %v1780_v55 = vrot.slane %v1779_v58, 1  ;;  %v5790_v23 = vpop.eup %4975  ;;  %vm1324_vm7 = vmor %vm1322_vm6, %vm1323_vm5  ;;  %v973_v31 = vsub.f32 %v5544_v41, %v913_v15  ;;  %vm1327_vm8 = vcmp.eq.f32.partialorder %v1326_v18, 8.507059e+37 }
 0x237   : > { %v1712_v32 = vmul.f32 0.7711054, %v1316_v45  ;;  %v1319_v36 = vsub.f32 1.0, %v1318_v50 }
 0x238   : > { %v1180_v63 = vpop.f32.mrf.mxu2  ;;  %v1781_v8 = vmax.f32 %v1779_v58, %v1780_v55  ;;  %v1022_v55 = vmul.f32 1.442695, %v973_v31 }
 0x239   : > { %v5781_v62 = vmul.f32 %v5594_v5, %v1712_v32  ;;  %v1320_v17 = vmul.f32 %v4972_v10, %v1319_v36  ;;  %4977 = vrcp.f32 %v1180_v63  ;;  %v1328_v5 = vand.u32 2147483648, %v5762_v30 }
 0x23a   : > { %v1917_v48 = vsub.f32 %v5744_v27, %v1781_v8  ;;  %v1918_v44 = vsub.f32 %v5750_v11, %v1781_v8  ;;  %4979 = vpow2.f32 %v1020_v34  ;;  %v1342_v32 = vand.u32 2147483648, %v1180_v63 }
 0x23b   : > { %7365 = vst [vmem:[#allocation10_spill] sm:$0xff] %v5781_v62  ;;  %v1783_v49 = vsel %vm859_vm2, %v5781_v62, -inf  ;;  %v1321_v19 = vadd.f32 %v4972_v10, %v1320_v17  ;;  %v1329_v45 = vor.u32 1.1754944e-38, %v1328_v5  ;;  %v1340_v8 = vand.u32 2147483647, %v1180_v63  ;;  %v5807_v5 = vpop.permute.xlu0 %4889 }
 0x23c   : > { %v1784_v59 = vmax.f32 %v1782_v29, %v1783_v49  ;;  %v1949_v0 = vmul.f32 1.442695, %v1917_v48  ;;  %v1951_v35 = vmul.f32 1.442695, %v1918_v44  ;;  %vm1336_vm10 = vweird.f32 %v1180_v63  ;;  %7366 = vst [vmem:[#allocation11_spill] sm:$0xff] %v5807_v5 }
 0x23d   : > { %v1325_v46 = vsel %vm1324_vm7, %v4972_v10, %v1321_v19  ;;  %v1343_v48 = vor.u32 1.1754944e-38, %v1342_v32  ;;  %vm1341_vm12 = vcmp.eq.f32.partialorder %v1340_v8, 8.507059e+37 }
 0x23e   : > { %4693 = vmatmul.msk.f32.gmra.mxu2 %vm859_vm2, %v5790_v23  ;;  %v1785_v54 = vrot.slane %v1784_v59, 4  ;;  %4981 = vpow2.f32 %v1949_v0  ;;  %v1330_v30 = vsel %vm1327_vm8, %v1329_v45, %v1325_v46 }
 0x23f   : > { %v4978_v40 = vpop.eup %4977  ;;  %4983 = vpow2.f32 %v1951_v35  ;;  %v1713_v41 = vmul.f32 0.7711054, %v1330_v30 }
 0x240   : > { %v1332_v50 = vmul.f32 %v4978_v40, %v1180_v63  ;;  %v1786_v58 = vmax.f32 %v1784_v59, %v1785_v54  ;;  %vm1337_vm9 = vweird.f32 %v4978_v40  ;;  %v5797_v34 = vpop.eup %4979  ;;  %4985 = vpow2.f32 %v1022_v55 }
 0x241   : > { %vm1338_vm11 = vmor %vm1336_vm10, %vm1337_vm9  ;;  %v5812_v31 = vmul.f32 %v5607_v12, %v1713_v41 }
 0x242   : > { %v1333_v60 = vsub.f32 1.0, %v1332_v50  ;;  %v1787_v36 = vrot.slane %v1786_v58, 2 }
 0x243   : > { %7367 = vst [vmem:[#allocation12_spill] sm:$0xff] %v5812_v31 }
 0x244   : > { %v1334_v17 = vmul.f32 %v4978_v40, %v1333_v60  ;;  %v1788_v29 = vmax.f32 %v1786_v58, %v1787_v36  ;;  %v5799_v49 = vpop.eup %4981  ;;  %v1791_v36 = vsel %vm859_vm2, %v5812_v31, -inf }
 0x245   : > { %v5801_v19 = vpop.eup %4983  ;;  %v2013_v44 = vsel %vm859_vm2, %v5799_v49, 0.0 }
 0x246   : > { %v1335_v10 = vadd.f32 %v4978_v40, %v1334_v17  ;;  %4694 = vmatmul.msk.f32.gmra.mxu2 %vm859_vm2, %v5797_v34  ;;  %v1789_v15 = vrot.slane %v1788_v29, 1  ;;  %v2014_v18 = vsel %vm859_vm2, %v5801_v19, 0.0  ;;  %v5819_v32 = vpop.eup %4985 }
 0x247   : > { %v2015_v0 = vadd.f32 %v2014_v18, %v2013_v44 }
 0x248   : > { %v1339_v59 = vsel %vm1338_vm11, %v4978_v40, %v1335_v10  ;;  %v1790_v35 = vmax.f32 %v1788_v29, %v1789_v15 }
 0x249   : > { %v1344_v63 = vsel %vm1341_vm12, %v1343_v48, %v1339_v59  ;;  %v2016_v46 = vrot.slane %v2015_v0, 4 }
 0x24a   : > { %v1714_v54 = vmul.f32 0.7711054, %v1344_v63  ;;  %v1919_v50 = vsub.f32 %v5778_v14, %v1790_v35  ;;  %v1920_v45 = vsub.f32 %v5781_v62, %v1790_v35 }
 0x24b   : > { %v2017_v40 = vadd.f32 %v2016_v46, %v2015_v0 }
 0x24c   : > { %v5817_v58 = vmul.f32 %v5617_v53, %v1714_v54  ;;  %v1953_v60 = vmul.f32 1.442695, %v1919_v50  ;;  %v1955_v30 = vmul.f32 1.442695, %v1920_v45  ;;  %v922_v50 = vpop.xlane.xlu2 %921 }
 0x24d   : > { %v2018_v55 = vrot.slane %v2017_v40, 2 }
 0x24e   : > { %7368 = vst [vmem:[#allocation13_spill] sm:$0xff] %v5817_v58  ;;  %v1792_v12 = vsel %vm859_vm2, %v5817_v58, -inf  ;;  %4695 = vmatmul.msk.f32.gmra.mxu2 %vm859_vm2, %v5819_v32  ;;  %4987 = vpow2.f32 %v1953_v60 }
 0x24f   : > { %v1793_v17 = vmax.f32 %v1791_v36, %v1792_v12  ;;  %4989 = vpow2.f32 %v1955_v30  ;;  %v2019_v29 = vadd.f32 %v2018_v55, %v2017_v40  ;;  %v976_v12 = vsub.f32 %v5557_v1, %v922_v50 }
 0x250   : > { %v916_v8 = vpop.xlane.xlu0 %915 }
 0x251   : > { %v974_v53 = vsub.f32 %v5639_v42, %v916_v8  ;;  %v1794_v41 = vrot.slane %v1793_v17, 4  ;;  %v919_v10 = vpop.xlane.xlu1 %918  ;;  %v2020_v15 = vrot.slane %v2019_v29, 1 }
 0x252   : > { %v975_v63 = vsub.f32 %v5644_v3, %v919_v10 }
 0x253   : > { %v1024_v48 = vmul.f32 1.442695, %v974_v53  ;;  %v1183_v44 = vpop.f32.mrf.mxu2  ;;  %v1795_v59 = vmax.f32 %v1793_v17, %v1794_v41  ;;  %v5831_v0 = vadd.f32 %v2020_v15, %v2019_v29 }
 0x254   : > { %4991 = vrcp.f32 %v1183_v44  ;;  %v5828_v18 = vpop.eup %4987  ;;  %v1026_v60 = vmul.f32 1.442695, %v975_v63  ;;  %v1354_v63 = vand.u32 2147483647, %v1183_v44  ;;  %vm1350_vm14 = vweird.f32 %v1183_v44 }
 0x255   : > { %4993 = vpow2.f32 %v1024_v48  ;;  %v1796_v35 = vrot.slane %v1795_v59, 2  ;;  %v5833_v54 = vpop.eup %4989  ;;  %v2022_v46 = vsel %vm859_vm2, %v5828_v18, 0.0  ;;  %v2168_v11 = vand.u32 2147483648, %v5831_v0 }
 0x256   : > { %4995 = vrcp.f32 %v5831_v0  ;;  %v2023_v45 = vsel %vm859_vm2, %v5833_v54, 0.0  ;;  %vm5856_vm0 = vcmp.eq.f32.partialorder %v1354_v63, 8.507059e+37  ;;  %vm2162_vm3 = vweird.f32 %v5831_v0 }
 0x257   : > { %v1797_v40 = vmax.f32 %v1795_v59, %v1796_v35  ;;  %v2024_v30 = vadd.f32 %v2023_v45, %v2022_v46  ;;  %v1028_v59 = vmul.f32 1.442695, %v976_v12  ;;  %v1356_v46 = vand.u32 2147483648, %v1183_v44 }
 0x258   : > { %v925_v48 = vpop.xlane.xlu0 %924 }
 0x259   : > { %v2025_v53 = vrot.slane %v2024_v30, 4  ;;  %v1798_v29 = vrot.slane %v1797_v40, 1 }
 0x25a   : > { %v4992_v36 = vpop.eup %4991 }
 0x25b   : > { %v5841_v55 = vpop.eup %4993  ;;  %v1346_v17 = vmul.f32 %v4992_v36, %v1183_v44  ;;  %v5843_v8 = vpop.f32.mrf.mxu2  ;;  %v2026_v15 = vadd.f32 %v2025_v53, %v2024_v30  ;;  %v1799_v45 = vmax.f32 %v1797_v40, %v1798_v29  ;;  %vm1351_vm13 = vweird.f32 %v4992_v36 }
 0x25c   : > { %4997 = vrcp.f32 %v5843_v8  ;;  %4696 = vmatmul.msk.f32.gmra.mxu2 %vm859_vm2, %v5841_v55  ;;  %v4996_v41 = vpop.eup %4995  ;;  %vm5852_vm15 = vmor %vm1350_vm14, %vm1351_vm13  ;;  %v1357_v40 = vor.u32 1.1754944e-38, %v1356_v46  ;;  %v928_v53 = vpop.xlane.xlu1 %927  ;;  %v2166_v44 = vand.u32 2147483647, %v5831_v0  ;;  %v1368_v63 = vand.u32 2147483647, %v5843_v8 }
 0x25d   : > { %4999 = vpow2.f32 %v1026_v60  ;;  %v1347_v10 = vsub.f32 1.0, %v1346_v17  ;;  %v2158_v1 = vmul.f32 %v4996_v41, %v5831_v0  ;;  %v2027_v50 = vrot.slane %v2026_v15, 2 }
 0x25e   : > { %5001 = vpow2.f32 %v1028_v59  ;;  %vm2163_vm4 = vweird.f32 %v4996_v41  ;;  %vm2167_vm7 = vcmp.eq.f32.partialorder %v2166_v44, 8.507059e+37  ;;  %vm1364_vm8 = vweird.f32 %v5843_v8 }
 0x25f   : > { %v1348_v35 = vmul.f32 %v4992_v36, %v1347_v10  ;;  %v2159_v62 = vsub.f32 1.0, %v2158_v1  ;;  %v2028_v17 = vadd.f32 %v2027_v50, %v2026_v15  ;;  %v1921_v10 = vsub.f32 %v5812_v31, %v1799_v45  ;;  %vm2164_vm6 = vmor %vm2162_vm3, %vm2163_vm4 }
 0x260   : > { %v977_v15 = vsub.f32 %v5657_v56, %v925_v48  ;;  %v2169_v1 = vor.u32 1.1754944e-38, %v2168_v11  ;;  %v5874_v31 = vpop.xlane.xlu0 %933  ;;  %vm1369_vm10 = vcmp.eq.f32.partialorder %v1368_v63, 8.507059e+37 }
 0x261   : > { %v1349_v14 = vadd.f32 %v4992_v36, %v1348_v35  ;;  %v2160_v60 = vmul.f32 %v4996_v41, %v2159_v62  ;;  %v1370_v35 = vand.u32 2147483648, %v5843_v8  ;;  %v2029_v50 = vrot.slane %v2028_v17, 1 }
 0x262   : > { %v4998_v27 = vpop.eup %4997  ;;  %v1957_v56 = vmul.f32 1.442695, %v1921_v10  ;;  %v978_v10 = vsub.f32 %v5662_v9, %v928_v53  ;;  %v931_v53 = vpop.xlane.xlu2 %930 }
 0x263   : > { %v5850_v5 = vpop.eup %4999  ;;  %v1360_v29 = vmul.f32 %v4998_v27, %v5843_v8  ;;  %v1353_v62 = vsel %vm5852_vm15, %v4992_v36, %v1349_v14  ;;  %v2161_v46 = vadd.f32 %v4996_v41, %v2160_v60  ;;  %v1922_v14 = vsub.f32 %v5817_v58, %v1799_v45 }
 0x264   : > { %4697 = vmatmul.msk.f32.gmra.mxu2 %vm859_vm2, %v5850_v5  ;;  %v1358_v36 = vsel %vm5856_vm0, %v1357_v40, %v1353_v62  ;;  %vm1365_vm5 = vweird.f32 %v4998_v27  ;;  %v5878_v48 = vpop.eup %5001  ;;  %v1030_v60 = vmul.f32 1.442695, %v977_v15  ;;  %v1371_v40 = vor.u32 1.1754944e-38, %v1370_v35 }
 0x265   : > { %v1361_v59 = vsub.f32 1.0, %v1360_v29  ;;  %v2165_v11 = vsel %vm2164_vm6, %v4996_v41, %v2161_v46  ;;  %v2030_v29 = vadd.f32 %v2029_v50, %v2028_v17  ;;  %v1715_v12 = vmul.f32 0.7711054, %v1358_v36  ;;  %vm1366_vm9 = vmor %vm1364_vm8, %vm1365_vm5  ;;  %v5885_v17 = vpop.xlane.xlu1 %936 }
 0x266   : > { %v2170_v45 = vsel %vm2167_vm7, %v2169_v1, %v2165_v11  ;;  %v1959_v0 = vmul.f32 1.442695, %v1922_v14  ;;  %v1032_v15 = vmul.f32 1.442695, %v978_v10 }
 0x267   : > { %v1362_v30 = vmul.f32 %v4998_v27, %v1361_v59  ;;  %v2381_v62 = vmul.f32 0.7711054, %v2170_v45  ;;  %5003 = vrcp.f32 %v2030_v29  ;;  %v5888_v44 = vmul.f32 %v5629_v52, %v1715_v12 }
 0x268   : > { %5005 = vpow2.f32 %v1957_v56  ;;  %v2182_v36 = vand.u32 2147483648, %v2030_v29  ;;  %vm2176_vm12 = vweird.f32 %v2030_v29 }
 0x269   : > { %v1363_v2 = vadd.f32 %v4998_v27, %v1362_v30  ;;  %v2397_v41 = vmul.f32 %v5799_v49, %v2381_v62  ;;  %5007 = vpow2.f32 %v1030_v60  ;;  %7373 = vst [vmem:[#allocation14_spill] sm:$0xff] %v5888_v44  ;;  %v5895_v49 = vpop.xlane.xlu0 %942  ;;  %v2398_v14 = vmul.f32 %v5801_v19, %v2381_v62 }
 0x26a   : > { %5009 = vpow2.f32 %v1959_v0  ;;  %v2180_v60 = vand.u32 2147483647, %v2030_v29  ;;  %v2183_v0 = vor.u32 1.1754944e-38, %v2182_v36 }
 0x26b   : > { %v1367_v59 = vsel %vm1366_vm9, %v4998_v27, %v1363_v2  ;;  %2429 = vxpose.xlu2.b32.start [1/2] (short) (narrow) %v2397_v41, 32  ;;  %5011 = vpow2.f32 %v1032_v15 }
 0x26c   : > { %v1372_v58 = vsel %vm1369_vm10, %v1371_v40, %v1367_v59  ;;  %4698 = vmatmul.msk.f32.gmra.mxu2 %vm859_vm2, %v5878_v48  ;;  %vm2181_vm14 = vcmp.eq.f32.partialorder %v2180_v60, 8.507059e+37 }
 0x26d   : > { %v1716_v8 = vmul.f32 0.7711054, %v1372_v58  ;;  %v5004_v27 = vpop.eup %5003  ;;  %v1800_v58 = vsel %vm859_vm2, %v5888_v44, -inf  ;;  %v5913_v12 = vpop.xlane.xlu1 %945 }
 0x26e   : > { %v5893_v63 = vpop.eup %5005  ;;  %v2172_v1 = vmul.f32 %v5004_v27, %v2030_v29  ;;  %vm2177_vm11 = vweird.f32 %v5004_v27  ;;  %v980_v29 = vsub.f32 %v5675_v13, %v5874_v31 }
 0x26f   : > { %v5891_v2 = vmul.f32 %v5641_v28, %v1716_v8  ;;  %v5901_v52 = vpop.eup %5007  ;;  %v979_v28 = vsub.f32 %v5578_v47, %v931_v53  ;;  %v2031_v30 = vsel %vm859_vm2, %v5893_v63, 0.0  ;;  %vm2178_vm13 = vmor %vm2176_vm12, %vm2177_vm11 }
 0x270   : > { %v2173_v46 = vsub.f32 1.0, %v2172_v1  ;;  %v5909_v56 = vpop.eup %5009 }
 0x271   : > { %7374 = vst [vmem:[#allocation15_spill] sm:$0xff] %v5891_v2  ;;  %v1801_v35 = vsel %vm859_vm2, %v5891_v2, -inf  ;;  %v2032_v47 = vsel %vm859_vm2, %v5909_v56, 0.0  ;;  %v1034_v59 = vmul.f32 1.442695, %v979_v28  ;;  %v5915_v53 = vpop.eup %5011  ;;  %v5917_v1 = vpop.xlane.xlu0 %951 }
 0x272   : > { %v1802_v50 = vmax.f32 %v1800_v58, %v1801_v35  ;;  %v2174_v11 = vmul.f32 %v5004_v27, %v2173_v46  ;;  %v2033_v40 = vadd.f32 %v2032_v47, %v2031_v30  ;;  %v5923_v28 = vpop.f32.mrf.mxu2 }
 0x273   : > { %2430 = vxpose.xlu2.b32.end [2/2] (short) (narrow) %v2398_v14, 32  ;;  %5013 = vpow2.f32 %v1034_v59  ;;  %vm1378_vm6 = vweird.f32 %v5923_v28 }
 0x274   : > { %4699 = vmatmul.msk.f32.gmra.mxu2 %vm859_vm2, %v5901_v52  ;;  %v1803_v45 = vrot.slane %v1802_v50, 4  ;;  %v2175_v19 = vadd.f32 %v5004_v27, %v2174_v11  ;;  %v2034_v41 = vrot.slane %v2033_v40, 4  ;;  %v1036_v11 = vmul.f32 1.442695, %v980_v29 }
 0x275   : > { %5015 = vrcp.f32 %v5923_v28  ;;  %v5927_v60 = vpop.xlane.xlu1 %954 }
 0x276   : > { %v1804_v62 = vmax.f32 %v1802_v50, %v1803_v45  ;;  %v2179_v10 = vsel %vm2178_vm13, %v5004_v27, %v2175_v19  ;;  %v2035_v35 = vadd.f32 %v2034_v41, %v2033_v40  ;;  %5017 = vpow2.f32 %v1036_v11 }
 0x277   : > { %v2184_v15 = vsel %vm2181_vm14, %v2183_v0, %v2179_v10  ;;  %v981_v0 = vsub.f32 %v5678_v22, %v5885_v17 }
 0x278   : > { %v1805_v8 = vrot.slane %v1804_v62, 2  ;;  %v2382_v58 = vmul.f32 0.7711054, %v2184_v15  ;;  %v2036_v50 = vrot.slane %v2035_v35, 2 }
 0x279   : > { %v5931_v47 = vpop.eup %5013  ;;  %v1038_v15 = vmul.f32 1.442695, %v981_v0 }
 0x27a   : > { %v1806_v46 = vmax.f32 %v1804_v62, %v1805_v8  ;;  %v2399_v27 = vmul.f32 %v5828_v18, %v2382_v58  ;;  %v2037_v36 = vadd.f32 %v2036_v50, %v2035_v35  ;;  %v2400_v10 = vmul.f32 %v5833_v54, %v2382_v58  ;;  %v940_v8 = vpop.xlane.xlu2 %939 }
 0x27b   : > { %v5941_v41 = vpop.eup %5015 }
 0x27c   : > { %4700 = vmatmul.msk.f32.gmra.mxu2 %vm859_vm2, %v5915_v53  ;;  %v1807_v14 = vrot.slane %v1806_v46, 1  ;;  %2511 = vxpose.xlu1.b32.start [1/2] (short) (narrow) %v2399_v27, 32  ;;  %v2038_v45 = vrot.slane %v2037_v36, 1  ;;  %v1374_v35 = vmul.f32 %v5941_v41, %v5923_v28  ;;  %v5945_v29 = vpop.eup %5017  ;;  %v982_v27 = vsub.f32 %v5603_v7, %v940_v8 }
 0x27d   : > { %vm1379_vm5 = vweird.f32 %v5941_v41 }
 0x27e   : > { %v1808_v30 = vmax.f32 %v1806_v46, %v1807_v14  ;;  %v2039_v18 = vadd.f32 %v2038_v45, %v2037_v36  ;;  %v1375_v36 = vsub.f32 1.0, %v1374_v35  ;;  %v1040_v11 = vmul.f32 1.442695, %v982_v27  ;;  %vm1380_vm7 = vmor %vm1378_vm6, %vm1379_vm5 }
 0x280   : > { %v1923_v13 = vsub.f32 %v5888_v44, %v1808_v30  ;;  %v1924_v31 = vsub.f32 %v5891_v2, %v1808_v30  ;;  %5019 = vrcp.f32 %v2039_v18  ;;  %v1376_v0 = vmul.f32 %v5941_v41, %v1375_v36 }
 0x281   : > { %vm2190_vm0 = vweird.f32 %v2039_v18 }
 0x282   : > { %v1961_v40 = vmul.f32 1.442695, %v1923_v13  ;;  %v1963_v62 = vmul.f32 1.442695, %v1924_v31  ;;  %v2196_v31 = vand.u32 2147483648, %v2039_v18 }
 0x283   : > { %v5933_v19 = vpop.permute.xlu0 %4914 }
 0x284   : > { %7375 = vst [vmem:[#allocation16_spill] sm:$0xff] %v5933_v19  ;;  %v4916_v59 = vunpack.i.l.bf16 %v5933_v19  ;;  %4701 = vmatmul.msk.f32.gmra.mxu2 %vm859_vm2, %v5931_v47  ;;  %5021 = vpow2.f32 %v1961_v40  ;;  %2512 = vxpose.xlu1.b32.end [2/2] (short) (narrow) %v2400_v10, 32 }
 0x285   : > { %5023 = vpow2.f32 %v1963_v62 }
 0x286   : > { %3387 = vmatpush.msra.mxu2 %v4916_v59  ;;  %v5020_v17 = vpop.eup %5019  ;;  %5025 = vpow2.f32 %v1038_v15  ;;  %v2194_v59 = vand.u32 2147483647, %v2039_v18 }
 0x287   : > { %v2186_v50 = vmul.f32 %v5020_v17, %v2039_v18  ;;  %vm2191_vm15 = vweird.f32 %v5020_v17  ;;  %5027 = vpow2.f32 %v1040_v11  ;;  %v983_v18 = vsub.f32 %v5686_v43, %v5895_v49 }
 0x288   : > { %vm2192_vm3 = vmor %vm2190_vm0, %vm2191_vm15  ;;  %vm2195_vm4 = vcmp.eq.f32.partialorder %v2194_v59, 8.507059e+37 }
 0x289   : > { %v4905_v46 = vpop.permute.xlu1 %4904  ;;  %v2187_v45 = vsub.f32 1.0, %v2186_v50  ;;  %v1042_v43 = vmul.f32 1.442695, %v983_v18 }
 0x28a   : > { %v4906_v22 = vunpack.i.l.bf16 %v4905_v46  ;;  %v5948_v54 = vpop.eup %5021  ;;  %v4907_v58 = vunpack.i.h.bf16 %v4905_v46 }
 0x28b   : > { %v5952_v14 = vpop.eup %5023  ;;  %v2040_v30 = vsel %vm859_vm2, %v5948_v54, 0.0  ;;  %v2188_v62 = vmul.f32 %v5020_v17, %v2187_v45  ;;  %v1384_v45 = vand.u32 2147483648, %v5923_v28 }
 0x28c   : > { %3468 = vmatpush.msra.mxu0 %v4906_v22  ;;  %4702 = vmatmul.msk.f32.gmra.mxu2 %vm859_vm2, %v5945_v29  ;;  %v2041_v13 = vsel %vm859_vm2, %v5952_v14, 0.0  ;;  %v5959_v27 = vpop.eup %5025  ;;  %v2197_v22 = vor.u32 1.1754944e-38, %v2196_v31  ;;  %v1382_v31 = vand.u32 2147483647, %v5923_v28 }
 0x28d   : > { %v2042_v40 = vadd.f32 %v2041_v13, %v2040_v30  ;;  %v2189_v15 = vadd.f32 %v5020_v17, %v2188_v62  ;;  %v1377_v30 = vadd.f32 %v5941_v41, %v1376_v0  ;;  %v5970_v62 = vpop.eup %5027  ;;  %v1385_v49 = vor.u32 1.1754944e-38, %v1384_v45 }
 0x28e   : > { %3469 = vmatpush.msra.mxu0 %v4907_v58  ;;  %vm1383_vm8 = vcmp.eq.f32.partialorder %v1382_v31, 8.507059e+37 }
 0x28f   : > { %v2043_v8 = vrot.slane %v2042_v40, 4  ;;  %v2193_v58 = vsel %vm2192_vm3, %v5020_v17, %v2189_v15 }
 0x290   : > { %v2198_v11 = vsel %vm2195_vm4, %v2197_v22, %v2193_v58 }
 0x291   : > { %v4910_v10 = vpop.permute.xlu1 %4909  ;;  %v1192_v46 = vpop.f32.mrf.mxu2  ;;  %v2044_v36 = vadd.f32 %v2043_v8, %v2042_v40  ;;  %v2383_v13 = vmul.f32 0.7711054, %v2198_v11 }
 0x292   : > { %v4911_v35 = vunpack.i.l.bf16 %v4910_v10  ;;  %5029 = vrcp.f32 %v1192_v46  ;;  %v4912_v50 = vunpack.i.h.bf16 %v4910_v10  ;;  %v1381_v10 = vsel %vm1380_vm7, %v5941_v41, %v1377_v30  ;;  %v949_v30 = vpop.xlane.xlu2 %948 }
 0x293   : > { %v2045_v17 = vrot.slane %v2044_v36, 2  ;;  %v2401_v40 = vmul.f32 %v5893_v63, %v2383_v13  ;;  %v1386_v28 = vsel %vm1383_vm8, %v1385_v49, %v1381_v10  ;;  %v984_v41 = vsub.f32 %v5689_v33, %v5913_v12 }
 0x294   : > { %3306 = vmatpush.msra.mxu1 %v4911_v35  ;;  %4703 = vmatmul.msk.f32.gmra.mxu2 %vm859_vm2, %v5959_v27  ;;  %v1398_v58 = vand.u32 2147483648, %v1192_v46  ;;  %v1717_v18 = vmul.f32 0.7711054, %v1386_v28  ;;  %vm1392_vm10 = vweird.f32 %v1192_v46  ;;  %v2402_v45 = vmul.f32 %v5909_v56, %v2383_v13 }
 0x295   : > { %v2046_v59 = vadd.f32 %v2045_v17, %v2044_v36  ;;  %2592 = vxpose.xlu0.b32.start [1/2] (short) (narrow) %v2401_v40, 32  ;;  %v1396_v36 = vand.u32 2147483647, %v1192_v46  ;;  %v1044_v31 = vmul.f32 1.442695, %v984_v41 }
 0x296   : > { %3307 = vmatpush.msra.mxu1 %v4912_v50  ;;  %v1399_v40 = vor.u32 1.1754944e-38, %v1398_v58  ;;  %v5993_v56 = vmul.f32 %v5659_v4, %v1717_v18 }
 0x297   : > { %v2047_v35 = vrot.slane %v2046_v59, 1  ;;  %vm1397_vm12 = vcmp.eq.f32.partialorder %v1396_v36, 8.507059e+37 }
 0x298   : > { %v5030_v0 = vpop.eup %5029  ;;  %7376 = vst [vmem:[#allocation17_spill] sm:$0xff] %v5993_v56  ;;  %v1809_v36 = vsel %vm859_vm2, %v5993_v56, -inf }
 0x299   : > { %v1388_v8 = vmul.f32 %v5030_v0, %v1192_v46  ;;  %v5974_v15 = vpop.f32.mrf.mxu2  ;;  %v5979_v63 = vadd.f32 %v2047_v35, %v2046_v59  ;;  %vm1393_vm9 = vweird.f32 %v5030_v0  ;;  %v985_v59 = vsub.f32 %v5623_v25, %v949_v30 }
 0x29a   : > { %5031 = vrcp.f32 %v5974_v15  ;;  %vm1394_vm11 = vmor %vm1392_vm10, %vm1393_vm9  ;;  %v1410_v58 = vand.u32 2147483647, %v5974_v15  ;;  %v1412_v4 = vand.u32 2147483648, %v5974_v15  ;;  %vm1406_vm14 = vweird.f32 %v5974_v15 }
 0x29b   : > { %v1389_v22 = vsub.f32 1.0, %v1388_v8  ;;  %5033 = vpow2.f32 %v1042_v43  ;;  %v1046_v28 = vmul.f32 1.442695, %v985_v59  ;;  %v2208_v18 = vand.u32 2147483647, %v5979_v63 }
 0x29c   : > { %4704 = vmatmul.msk.f32.gmra.mxu2 %vm859_vm2, %v5970_v62  ;;  %5035 = vrcp.f32 %v5979_v63  ;;  %vm1411_vm3 = vcmp.eq.f32.partialorder %v1410_v58, 8.507059e+37  ;;  %vm2204_vm4 = vweird.f32 %v5979_v63 }
 0x29d   : > { %v1390_v50 = vmul.f32 %v5030_v0, %v1389_v22  ;;  %2593 = vxpose.xlu0.b32.end [2/2] (short) (narrow) %v2402_v45, 32  ;;  %vm2209_vm5 = vcmp.eq.f32.partialorder %v2208_v18, 8.507059e+37 }
 0x29f   : > { %v1391_v11 = vadd.f32 %v5030_v0, %v1390_v50 }
 0x2a0   : > { %v5032_v17 = vpop.eup %5031 }
 0x2a1   : > { %v1395_v10 = vsel %vm1394_vm11, %v5030_v0, %v1391_v11  ;;  %v1402_v12 = vmul.f32 %v5032_v17, %v5974_v15  ;;  %v5987_v43 = vpop.f32.mrf.mxu2  ;;  %v5989_v49 = vpop.eup %5033  ;;  %vm1407_vm13 = vweird.f32 %v5032_v17 }
 0x2a2   : > { %v1400_v8 = vsel %vm1397_vm12, %v1399_v40, %v1395_v10  ;;  %5037 = vrcp.f32 %v5987_v43  ;;  %v5036_v46 = vpop.eup %5035  ;;  %vm6009_vm15 = vmor %vm1406_vm14, %vm1407_vm13  ;;  %v2210_v40 = vand.u32 2147483648, %v5979_v63  ;;  %vm1420_vm8 = vweird.f32 %v5987_v43 }
 0x2a3   : > { %v1718_v13 = vmul.f32 0.7711054, %v1400_v8  ;;  %v1403_v35 = vsub.f32 1.0, %v1402_v12  ;;  %5039 = vpow2.f32 %v1044_v31  ;;  %v2200_v0 = vmul.f32 %v5036_v46, %v5979_v63 }
 0x2a4   : > { %4705 = vmatmul.msk.f32.gmra.mxu2 %vm859_vm2, %v5989_v49  ;;  %5041 = vpow2.f32 %v1046_v28  ;;  %vm2205_vm0 = vweird.f32 %v5036_v46 }
 0x2a5   : > { %v5999_v22 = vmul.f32 %v5713_v61, %v1718_v13  ;;  %v1404_v41 = vmul.f32 %v5032_v17, %v1403_v35  ;;  %v2201_v50 = vsub.f32 1.0, %v2200_v0  ;;  %v986_v13 = vsub.f32 %v5696_v20, %v5917_v1  ;;  %vm2206_vm6 = vmor %vm2204_vm4, %vm2205_vm0 }
 0x2a6   : > { %v1413_v35 = vor.u32 1.1754944e-38, %v1412_v4  ;;  %v1424_v1 = vand.u32 2147483647, %v5987_v43 }
 0x2a7   : > { %7377 = vst [vmem:[#allocation18_spill] sm:$0xff] %v5999_v22  ;;  %v1405_v30 = vadd.f32 %v5032_v17, %v1404_v41  ;;  %v1810_v11 = vsel %vm859_vm2, %v5999_v22, -inf  ;;  %v2202_v31 = vmul.f32 %v5036_v46, %v2201_v50  ;;  %v1426_v41 = vand.u32 2147483648, %v5987_v43 }
 0x2a8   : > { %v5038_v61 = vpop.eup %5037  ;;  %v1811_v59 = vmax.f32 %v1809_v36, %v1810_v11  ;;  %v2211_v50 = vor.u32 1.1754944e-38, %v2210_v40  ;;  %v987_v40 = vsub.f32 %v5699_v37, %v5927_v60  ;;  %vm1425_vm10 = vcmp.eq.f32.partialorder %v1424_v1, 8.507059e+37 }
 0x2a9   : > { %v1409_v10 = vsel %vm6009_vm15, %v5032_v17, %v1405_v30  ;;  %v1416_v15 = vmul.f32 %v5038_v61, %v5987_v43  ;;  %v6017_v12 = vpop.f32.mrf.mxu2  ;;  %v6019_v8 = vpop.eup %5039  ;;  %v2203_v28 = vadd.f32 %v5036_v46, %v2202_v31  ;;  %vm1421_vm7 = vweird.f32 %v5038_v61 }
 0x2aa   : > { %5043 = vrcp.f32 %v6017_v12  ;;  %v1414_v17 = vsel %vm1411_vm3, %v1413_v35, %v1409_v10  ;;  %v1812_v36 = vrot.slane %v1811_v59, 4  ;;  %v6029_v45 = vpop.eup %5041  ;;  %v1048_v10 = vmul.f32 1.442695, %v986_v13  ;;  %vm1422_vm9 = vmor %vm1420_vm8, %vm1421_vm7 }
 0x2ab   : > { %v1417_v0 = vsub.f32 1.0, %v1416_v15  ;;  %v2207_v58 = vsel %vm2206_vm6, %v5036_v46, %v2203_v28  ;;  %v1719_v15 = vmul.f32 0.7711054, %v1414_v17  ;;  %v1427_v35 = vor.u32 1.1754944e-38, %v1426_v41 }
 0x2ac   : > { %4706 = vmatmul.msk.f32.gmra.mxu2 %vm859_vm2, %v6019_v8  ;;  %v2212_v4 = vsel %vm2209_vm5, %v2211_v50, %v2207_v58  ;;  %v1813_v11 = vmax.f32 %v1811_v59, %v1812_v36  ;;  %vm1434_vm12 = vweird.f32 %v6017_v12 }
 0x2ad   : > { %v1418_v30 = vmul.f32 %v5038_v61, %v1417_v0  ;;  %v2384_v63 = vmul.f32 0.7711054, %v2212_v4  ;;  %v6042_v60 = vmul.f32 %v5723_v24, %v1719_v15 }
 0x2ae   : > { %v1814_v0 = vrot.slane %v1813_v11, 2 }
 0x2af   : > { %v1419_v31 = vadd.f32 %v5038_v61, %v1418_v30  ;;  %v2403_v59 = vmul.f32 %v5948_v54, %v2384_v63  ;;  %7380 = vst [vmem:[#allocation19_spill] sm:$0xff] %v6042_v60 }
 0x2b0   : > { %v6032_v18 = vpop.eup %5043  ;;  %v1815_v13 = vmax.f32 %v1813_v11, %v1814_v0 }
 0x2b1   : > { %v1423_v2 = vsel %vm1422_vm9, %v5038_v61, %v1419_v31  ;;  %v1430_v46 = vmul.f32 %v6032_v18, %v6017_v12  ;;  %v1204_v28 = vpop.f32.mrf.mxu2  ;;  %2673 = vxpose.xlu1.b32.start [1/2] (short) (narrow) %v2403_v59, 32  ;;  %v1050_v61 = vmul.f32 1.442695, %v987_v40  ;;  %vm1435_vm11 = vweird.f32 %v6032_v18 }
 0x2b2   : > { %v1428_v17 = vsel %vm1425_vm10, %v1427_v35, %v1423_v2  ;;  %5045 = vrcp.f32 %v1204_v28  ;;  %v1816_v36 = vrot.slane %v1815_v13, 1  ;;  %v1818_v2 = vsel %vm859_vm2, %v6042_v60, -inf  ;;  %vm6065_vm13 = vmor %vm1434_vm12, %vm1435_vm11 }
 0x2b3   : > { %v1720_v43 = vmul.f32 0.7711054, %v1428_v17  ;;  %v1431_v50 = vsub.f32 1.0, %v1430_v46  ;;  %5047 = vpow2.f32 %v1048_v10  ;;  %v1440_v10 = vand.u32 2147483648, %v6017_v12 }
 0x2b4   : > { %4707 = vmatmul.msk.f32.gmra.mxu2 %vm859_vm2, %v6029_v45  ;;  %5049 = vpow2.f32 %v1050_v61  ;;  %v1817_v24 = vmax.f32 %v1815_v13, %v1816_v36  ;;  %v1438_v40 = vand.u32 2147483647, %v6017_v12  ;;  %v1454_v46 = vand.u32 2147483648, %v1204_v28 }
 0x2b5   : > { %v6045_v41 = vmul.f32 %v5733_v57, %v1720_v43  ;;  %v1432_v54 = vmul.f32 %v6032_v18, %v1431_v50  ;;  %v2404_v57 = vmul.f32 %v5952_v14, %v2384_v63  ;;  %v1452_v63 = vand.u32 2147483647, %v1204_v28 }
 0x2b6   : > { %v1925_v59 = vsub.f32 %v5993_v56, %v1817_v24  ;;  %v1926_v17 = vsub.f32 %v5999_v22, %v1817_v24  ;;  %v1441_v13 = vor.u32 1.1754944e-38, %v1440_v10  ;;  %vm1439_vm15 = vcmp.eq.f32.partialorder %v1438_v40, 8.507059e+37 }
 0x2b7   : > { %7381 = vst [vmem:[#allocation20_spill] sm:$0xff] %v6045_v41  ;;  %v1819_v30 = vsel %vm859_vm2, %v6045_v41, -inf  ;;  %v1433_v4 = vadd.f32 %v6032_v18, %v1432_v54  ;;  %vm1448_vm0 = vweird.f32 %v1204_v28  ;;  %vm1453_vm4 = vcmp.eq.f32.partialorder %v1452_v63, 8.507059e+37 }
 0x2b8   : > { %v5046_v1 = vpop.eup %5045  ;;  %v1820_v58 = vmax.f32 %v1818_v2, %v1819_v30  ;;  %v1965_v54 = vmul.f32 1.442695, %v1925_v59  ;;  %v1455_v24 = vor.u32 1.1754944e-38, %v1454_v46 }
 0x2b9   : > { %v1444_v11 = vmul.f32 %v5046_v1, %v1204_v28  ;;  %v6055_v15 = vpop.f32.mrf.mxu2  ;;  %v6057_v31 = vpop.eup %5047  ;;  %2674 = vxpose.xlu1.b32.end [2/2] (short) (narrow) %v2404_v57, 32  ;;  %v1437_v12 = vsel %vm6065_vm13, %v6032_v18, %v1433_v4  ;;  %vm1449_vm14 = vweird.f32 %v5046_v1  ;;  %v1967_v57 = vmul.f32 1.442695, %v1926_v17 }
 0x2ba   : > { %7382 = vst [vmem:[#allocation21_spill] sm:$0xff] %v6057_v31  ;;  %5051 = vrcp.f32 %v6055_v15  ;;  %v1821_v0 = vrot.slane %v1820_v58, 4  ;;  %v6074_v61 = vpop.eup %5049  ;;  %vm1450_vm3 = vmor %vm1448_vm0, %vm1449_vm14  ;;  %v1466_v46 = vand.u32 2147483647, %v6055_v15  ;;  %v1468_v59 = vand.u32 2147483648, %v6055_v15 }
 0x2bb   : > { %v1445_v35 = vsub.f32 1.0, %v1444_v11  ;;  %v1442_v11 = vsel %vm1439_vm15, %v1441_v13, %v1437_v12  ;;  %5053 = vpow2.f32 %v1965_v54  ;;  %vm1462_vm6 = vweird.f32 %v6055_v15 }
 0x2bc   : > { %4708 = vmatmul.msk.f32.gmra.mxu2 %vm859_vm2, %v6057_v31  ;;  %v1822_v50 = vmax.f32 %v1820_v58, %v1821_v0  ;;  %v1721_v10 = vmul.f32 0.7711054, %v1442_v11  ;;  %vm1467_vm8 = vcmp.eq.f32.partialorder %v1466_v46, 8.507059e+37 }
 0x2bd   : > { %v1446_v43 = vmul.f32 %v5046_v1, %v1445_v35 }
 0x2be   : > { %v1823_v2 = vrot.slane %v1822_v50, 2 }
 0x2bf   : > { %v1447_v36 = vadd.f32 %v5046_v1, %v1446_v43  ;;  %v6089_v43 = vmul.f32 %v5741_v16, %v1721_v10  ;;  %v1469_v16 = vor.u32 1.1754944e-38, %v1468_v59 }
 0x2c0   : > { %v5052_v30 = vpop.eup %5051  ;;  %v1824_v35 = vmax.f32 %v1822_v50, %v1823_v2 }
 0x2c1   : > { %v1451_v44 = vsel %vm1450_vm3, %v5046_v1, %v1447_v36  ;;  %v1458_v18 = vmul.f32 %v5052_v30, %v6055_v15  ;;  %v1210_v4 = vpop.f32.mrf.mxu2  ;;  %vm1463_vm5 = vweird.f32 %v5052_v30  ;;  %7386 = vst [vmem:[#allocation23_spill] sm:$0xff] %v6089_v43 }
 0x2c2   : > { %v1456_v58 = vsel %vm1453_vm4, %v1455_v24, %v1451_v44  ;;  %5055 = vrcp.f32 %v1210_v4  ;;  %v1825_v28 = vrot.slane %v1824_v35, 1  ;;  %v6084_v44 = vpop.eup %5053  ;;  %vm6091_vm7 = vmor %vm1462_vm6, %vm1463_vm5  ;;  %vm1476_vm10 = vweird.f32 %v1210_v4 }
 0x2c3   : > { %v1722_v0 = vmul.f32 0.7711054, %v1456_v58  ;;  %v1459_v40 = vsub.f32 1.0, %v1458_v18  ;;  %5057 = vpow2.f32 %v1967_v57  ;;  %v2049_v57 = vsel %vm859_vm2, %v6084_v44, 0.0 }
 0x2c4   : > { %4709 = vmatmul.msk.f32.gmra.mxu2 %vm859_vm2, %v6074_v61  ;;  %v1826_v1 = vmax.f32 %v1824_v35, %v1825_v28  ;;  %v1482_v35 = vand.u32 2147483648, %v1210_v4 }
 0x2c5   : > { %v6080_v14 = vmul.f32 %v5764_v21, %v1722_v0  ;;  %v1460_v63 = vmul.f32 %v5052_v30, %v1459_v40 }
 0x2c6   : > { %v1927_v12 = vsub.f32 %v6042_v60, %v1826_v1  ;;  %v1928_v13 = vsub.f32 %v6045_v41, %v1826_v1 }
 0x2c7   : > { %7385 = vst [vmem:[#allocation22_spill] sm:$0xff] %v6080_v14  ;;  %v1461_v17 = vadd.f32 %v5052_v30, %v1460_v63  ;;  %v1828_v15 = vsel %vm859_vm2, %v6080_v14, -inf  ;;  %v1480_v63 = vand.u32 2147483647, %v1210_v4 }
 0x2c8   : > { %v5056_v50 = vpop.eup %5055  ;;  %v1969_v11 = vmul.f32 1.442695, %v1927_v12  ;;  %v1971_v10 = vmul.f32 1.442695, %v1928_v13 }
 0x2c9   : > { %v1465_v54 = vsel %vm6091_vm7, %v5052_v30, %v1461_v17  ;;  %v1472_v36 = vmul.f32 %v5056_v50, %v1210_v4  ;;  %v6098_v2 = vpop.f32.mrf.mxu2  ;;  %v6102_v24 = vpop.eup %5057  ;;  %v1827_v30 = vsel %vm859_vm2, %v6089_v43, -inf  ;;  %vm1477_vm9 = vweird.f32 %v5056_v50 }
 0x2ca   : > { %5059 = vrcp.f32 %v6098_v2  ;;  %v1470_v58 = vsel %vm1467_vm8, %v1469_v16, %v1465_v54  ;;  %v2050_v0 = vsel %vm859_vm2, %v6102_v24, 0.0  ;;  %v1829_v40 = vmax.f32 %v1827_v30, %v1828_v15  ;;  %vm1478_vm11 = vmor %vm1476_vm10, %vm1477_vm9 }
 0x2cb   : > { %v1473_v18 = vsub.f32 1.0, %v1472_v36  ;;  %5061 = vpow2.f32 %v1969_v11  ;;  %v2051_v1 = vadd.f32 %v2050_v0, %v2049_v57  ;;  %v1723_v59 = vmul.f32 0.7711054, %v1470_v58 }
 0x2cc   : > { %5063 = vpow2.f32 %v1971_v10  ;;  %v1830_v46 = vrot.slane %v1829_v40, 4  ;;  %v1483_v36 = vor.u32 1.1754944e-38, %v1482_v35  ;;  %vm1481_vm12 = vcmp.eq.f32.partialorder %v1480_v63, 8.507059e+37 }
 0x2cd   : > { %v1474_v28 = vmul.f32 %v5056_v50, %v1473_v18  ;;  %v2052_v12 = vrot.slane %v2051_v1, 4  ;;  %v6117_v58 = vmul.f32 %v5771_v26, %v1723_v59  ;;  %vm1490_vm13 = vweird.f32 %v6098_v2 }
 0x2ce   : > { %v1831_v11 = vmax.f32 %v1829_v40, %v1830_v46  ;;  %v1496_v26 = vand.u32 2147483648, %v6098_v2 }
 0x2cf   : > { %v1475_v17 = vadd.f32 %v5056_v50, %v1474_v28  ;;  %v2053_v18 = vadd.f32 %v2052_v12, %v2051_v1  ;;  %7389 = vst [vmem:[#allocation24_spill] sm:$0xff] %v6117_v58  ;;  %v1494_v1 = vand.u32 2147483647, %v6098_v2  ;;  %v1836_v59 = vsel %vm859_vm2, %v6117_v58, -inf }
 0x2d0   : > { %v5060_v21 = vpop.eup %5059  ;;  %v1832_v40 = vrot.slane %v1831_v11, 2 }
 0x2d1   : > { %v6111_v54 = vpop.eup %5061  ;;  %v1479_v13 = vsel %vm1478_vm11, %v5056_v50, %v1475_v17  ;;  %v1486_v15 = vmul.f32 %v5060_v21, %v6098_v2  ;;  %v1216_v16 = vpop.f32.mrf.mxu2  ;;  %v2054_v0 = vrot.slane %v2053_v18, 2  ;;  %vm1491_vm14 = vweird.f32 %v5060_v21 }
 0x2d2   : > { %v1484_v30 = vsel %vm1481_vm12, %v1483_v36, %v1479_v13  ;;  %5065 = vrcp.f32 %v1216_v16  ;;  %v2058_v4 = vsel %vm859_vm2, %v6111_v54, 0.0  ;;  %v6119_v35 = vpop.eup %5063  ;;  %vm1492_vm15 = vmor %vm1490_vm13, %vm1491_vm14  ;;  %vm1495_vm0 = vcmp.eq.f32.partialorder %v1494_v1, 8.507059e+37 }
 0x2d3   : > { %v1724_v57 = vmul.f32 0.7711054, %v1484_v30  ;;  %v1487_v10 = vsub.f32 1.0, %v1486_v15  ;;  %v2059_v63 = vsel %vm859_vm2, %v6119_v35, 0.0  ;;  %v2055_v13 = vadd.f32 %v2054_v0, %v2053_v18 }
 0x2d4   : > { %v2060_v46 = vadd.f32 %v2059_v63, %v2058_v4  ;;  %v1833_v30 = vmax.f32 %v1831_v11, %v1832_v40  ;;  %v1497_v4 = vor.u32 1.1754944e-38, %v1496_v26  ;;  %v1508_v2 = vand.u32 2147483647, %v1216_v16 }
 0x2d5   : > { %v6122_v50 = vmul.f32 %v5790_v23, %v1724_v57  ;;  %v1488_v28 = vmul.f32 %v5060_v21, %v1487_v10  ;;  %v1510_v63 = vand.u32 2147483648, %v1216_v16  ;;  %v2056_v56 = vrot.slane %v2055_v13, 1 }
 0x2d6   : > { %v2061_v36 = vrot.slane %v2060_v46, 4  ;;  %v1834_v20 = vrot.slane %v1833_v30, 1  ;;  %vm1504_vm4 = vweird.f32 %v1216_v16  ;;  %vm1509_vm6 = vcmp.eq.f32.partialorder %v1508_v2, 8.507059e+37 }
 0x2d7   : > { %7390 = vst [vmem:[#allocation25_spill] sm:$0xff] %v6122_v50  ;;  %v1489_v17 = vadd.f32 %v5060_v21, %v1488_v28  ;;  %v1837_v23 = vsel %vm859_vm2, %v6122_v50, -inf  ;;  %v1511_v40 = vor.u32 1.1754944e-38, %v1510_v63  ;;  %v6135_v26 = vadd.f32 %v2056_v56, %v2055_v13 }
 0x2d8   : > { %v5066_v12 = vpop.eup %5065  ;;  %v1838_v15 = vmax.f32 %v1836_v59, %v1837_v23  ;;  %v2062_v41 = vadd.f32 %v2061_v36, %v2060_v46  ;;  %v1835_v46 = vmax.f32 %v1833_v30, %v1834_v20  ;;  %v4898_v2 = vpack.i.bf16 %v5639_v42, %v5644_v3 }
 0x2d9   : > { %v1500_v57 = vmul.f32 %v5066_v12, %v1216_v16  ;;  %v1493_v10 = vsel %vm1492_vm15, %v5060_v21, %v1489_v17  ;;  %vm1505_vm3 = vweird.f32 %v5066_v12  ;;  %vm2218_vm13 = vweird.f32 %v6135_v26 }
 0x2da   : > { %v1839_v60 = vrot.slane %v1838_v15, 4  ;;  %v2063_v22 = vrot.slane %v2062_v41, 2  ;;  %v1498_v37 = vsel %vm1495_vm0, %v1497_v4, %v1493_v10  ;;  %vm1506_vm5 = vmor %vm1504_vm4, %vm1505_vm3  ;;  %v1930_v56 = vsub.f32 %v6080_v14, %v1835_v46 }
 0x2db   : > { %v1501_v28 = vsub.f32 1.0, %v1500_v57  ;;  %v1725_v21 = vmul.f32 0.7711054, %v1498_v37 }
 0x2dc   : > { %v1840_v33 = vmax.f32 %v1838_v15, %v1839_v60  ;;  %v2064_v11 = vadd.f32 %v2063_v22, %v2062_v41 }
 0x2dd   : > { %v1502_v19 = vmul.f32 %v5066_v12, %v1501_v28  ;;  %v6138_v60 = vmul.f32 %v5797_v34, %v1725_v21 }
 0x2de   : > { %v2065_v1 = vrot.slane %v2064_v11, 1  ;;  %v1841_v59 = vrot.slane %v1840_v33, 2 }
 0x2df   : > { %v6133_v18 = vpop.f32.mrf.mxu2  ;;  %v1503_v0 = vadd.f32 %v5066_v12, %v1502_v19  ;;  %7391 = vst [vmem:[#allocation26_spill] sm:$0xff] %v6138_v60  ;;  %v1929_v19 = vsub.f32 %v6089_v43, %v1835_v46 }
 0x2e0   : > { %v2066_v36 = vadd.f32 %v2065_v1, %v2064_v11  ;;  %v1842_v10 = vmax.f32 %v1840_v33, %v1841_v59  ;;  %v1845_v33 = vsel %vm859_vm2, %v6138_v60, -inf  ;;  %vm1518_vm14 = vweird.f32 %v6133_v18 }
 0x2e1   : > { %v1507_v17 = vsel %vm1506_vm5, %v5066_v12, %v1503_v0  ;;  %v1973_v16 = vmul.f32 1.442695, %v1929_v19 }
 0x2e2   : > { %v1512_v23 = vsel %vm1509_vm6, %v1511_v40, %v1507_v17  ;;  %5067 = vrcp.f32 %v2066_v36  ;;  %v1843_v20 = vrot.slane %v1842_v10, 1  ;;  %v2236_v42 = vand.u32 2147483647, %v2066_v36 }
 0x2e3   : > { %v1726_v57 = vmul.f32 0.7711054, %v1512_v23  ;;  %5069 = vrcp.f32 %v6135_v26  ;;  %v2238_v3 = vand.u32 2147483648, %v2066_v36  ;;  %vm2232_vm8 = vweird.f32 %v2066_v36 }
 0x2e4   : > { %5071 = vrcp.f32 %v6133_v18  ;;  %v1844_v41 = vmax.f32 %v1842_v10, %v1843_v20  ;;  %vm2237_vm10 = vcmp.eq.f32.partialorder %v2236_v42, 8.507059e+37  ;;  %v1522_v42 = vand.u32 2147483647, %v6133_v18 }
 0x2e5   : > { %v6142_v37 = vmul.f32 %v5819_v32, %v1726_v57  ;;  %v1975_v32 = vmul.f32 1.442695, %v1930_v56  ;;  %5073 = vpow2.f32 %v1973_v16  ;;  %v2224_v16 = vand.u32 2147483648, %v6135_v26 }
 0x2e6   : > { %v1931_v28 = vsub.f32 %v6117_v58, %v1844_v41  ;;  %v1932_v63 = vsub.f32 %v6122_v50, %v1844_v41  ;;  %vm6237_vm5 = vcmp.eq.f32.partialorder %v1522_v42, 8.507059e+37 }
 0x2e7   : > { %7392 = vst [vmem:[#allocation27_spill] sm:$0xff] %v6142_v37  ;;  %v6146_v22 = vpop.f32.mrf.mxu2  ;;  %v1846_v34 = vsel %vm859_vm2, %v6142_v37, -inf  ;;  %5075 = vpow2.f32 %v1975_v32 }
 0x2e8   : > { %v1847_v12 = vmax.f32 %v1845_v33, %v1846_v34  ;;  %v5068_v13 = vpop.eup %5067  ;;  %5077 = vrcp.f32 %v6146_v22  ;;  %v1977_v46 = vmul.f32 1.442695, %v1931_v28  ;;  %v1979_v23 = vmul.f32 1.442695, %v1932_v63 }
 0x2e9   : > { %v6153_v15 = vpop.eup %5069  ;;  %v2228_v30 = vmul.f32 %v5068_v13, %v2066_v36  ;;  %vm2233_vm7 = vweird.f32 %v5068_v13  ;;  %v2239_v34 = vor.u32 1.1754944e-38, %v2238_v3  ;;  %v1524_v28 = vand.u32 2147483648, %v6133_v18 }
 0x2ea   : > { %v1848_v4 = vrot.slane %v1847_v12, 4  ;;  %v6159_v11 = vpop.eup %5071  ;;  %v2214_v40 = vmul.f32 %v6153_v15, %v6135_v26  ;;  %vm2234_vm9 = vmor %vm2232_vm8, %vm2233_vm7  ;;  %vm2219_vm11 = vweird.f32 %v6153_v15  ;;  %vm1532_vm0 = vweird.f32 %v6146_v22 }
 0x2eb   : > { %v2229_v0 = vsub.f32 1.0, %v2228_v30  ;;  %v1514_v17 = vmul.f32 %v6159_v11, %v6133_v18  ;;  %v6171_v10 = vpop.eup %5073  ;;  %vm1519_vm12 = vweird.f32 %v6159_v11 }
 0x2ec   : > { %4899 = vrot.lane.b32.xlu2 %v4898_v2, %s5171_s25  ;;  %v1849_v1 = vmax.f32 %v1847_v12, %v1848_v4  ;;  %v2215_v41 = vsub.f32 1.0, %v2214_v40  ;;  %v2222_v2 = vand.u32 2147483647, %v6135_v26 }
 0x2ed   : > { %v2230_v59 = vmul.f32 %v5068_v13, %v2229_v0  ;;  %v6174_v33 = vpop.eup %5075  ;;  %v1515_v32 = vsub.f32 1.0, %v1514_v17 }
 0x2ee   : > { %v1850_v56 = vrot.slane %v1849_v1, 2  ;;  %v6177_v12 = vpop.eup %5077  ;;  %vm6243_vm6 = vcmp.eq.f32.partialorder %v2222_v2, 8.507059e+37 }
 0x2ef   : > { %v6163_v21 = vpop.f32.mrf.mxu2  ;;  %v2231_v20 = vadd.f32 %v5068_v13, %v2230_v59  ;;  %v1528_v17 = vmul.f32 %v6177_v12, %v6146_v22  ;;  %v1516_v59 = vmul.f32 %v6159_v11, %v1515_v32  ;;  %vm1533_vm15 = vweird.f32 %v6177_v12 }
 0x2f0   : > { %5079 = vrcp.f32 %v6163_v21  ;;  %v1851_v63 = vmax.f32 %v1849_v1, %v1850_v56  ;;  %v6195_v1 = vor.u32 1.1754944e-38, %v2224_v16  ;;  %v2216_v56 = vmul.f32 %v6153_v15, %v2215_v41 }
 0x2f1   : > { %5081 = vpow2.f32 %v1977_v46  ;;  %v2235_v30 = vsel %vm2234_vm9, %v5068_v13, %v2231_v20  ;;  %v2067_v46 = vsel %vm859_vm2, %v6171_v10, 0.0  ;;  %v2068_v13 = vsel %vm859_vm2, %v6174_v33, 0.0  ;;  %vm6262_vm9 = vmor %vm2218_vm13, %vm2219_vm11 }
 0x2f2   : > { %5083 = vpow2.f32 %v1979_v23  ;;  %v2240_v36 = vsel %vm2237_vm10, %v2239_v34, %v2235_v30  ;;  %v6202_v30 = vor.u32 1.1754944e-38, %v1524_v28  ;;  %v2069_v19 = vadd.f32 %v2068_v13, %v2067_v46  ;;  %vm6270_vm10 = vmor %vm1518_vm14, %vm1519_vm12 }
 0x2f3   : > { %v2386_v40 = vmul.f32 0.7711054, %v2240_v36  ;;  %v1852_v36 = vrot.slane %v1851_v63, 1  ;;  %v1529_v41 = vsub.f32 1.0, %v1528_v17  ;;  %v6218_v13 = vadd.f32 %v6159_v11, %v1516_v59  ;;  %vm6290_vm12 = vmor %vm1532_vm0, %vm1533_vm15 }
 0x2f4   : > { %vm1546_vm3 = vweird.f32 %v6163_v21  ;;  %v1552_v58 = vand.u32 2147483648, %v6163_v21 }
 0x2f5   : > { %v2407_v20 = vmul.f32 %v6111_v54, %v2386_v40  ;;  %v2408_v43 = vmul.f32 %v6119_v35, %v2386_v40 }
 0x2f6   : > { %v6179_v4 = vpop.eup %5079 }
 0x2f7   : > { %v1542_v0 = vmul.f32 %v6179_v4, %v6163_v21  ;;  %v6185_v3 = vpop.f32.mrf.mxu2  ;;  %v6200_v34 = vpop.eup %5081  ;;  %2835 = vxpose.xlu0.b32.start [1/2] (short) (narrow) %v2407_v20, 32  ;;  %vm1547_vm4 = vweird.f32 %v6179_v4 }
 0x2f8   : > { %5085 = vrcp.f32 %v6185_v3  ;;  %v6205_v57 = vpop.eup %5083  ;;  %v2076_v54 = vsel %vm859_vm2, %v6200_v34, 0.0  ;;  %v1564_v14 = vand.u32 2147483647, %v6185_v3  ;;  %vm6249_vm7 = vmor %vm1546_vm3, %vm1547_vm4  ;;  %v1566_v42 = vand.u32 2147483648, %v6185_v3 }
 0x2f9   : > { %v1543_v23 = vsub.f32 1.0, %v1542_v0  ;;  %v1853_v0 = vmax.f32 %v1851_v63, %v1852_v36  ;;  %v2077_v46 = vsel %vm859_vm2, %v6205_v57, 0.0  ;;  %v2070_v36 = vrot.slane %v2069_v19, 4 }
 0x2fa   : > { %v2078_v20 = vadd.f32 %v2077_v46, %v2076_v54  ;;  %v1530_v54 = vmul.f32 %v6177_v12, %v1529_v41  ;;  %v1550_v46 = vand.u32 2147483647, %v6163_v21  ;;  %v1553_v21 = vor.u32 1.1754944e-38, %v1552_v58 }
 0x2fb   : > { %v1544_v32 = vmul.f32 %v6179_v4, %v1543_v23  ;;  %v6222_v23 = vadd.f32 %v6153_v15, %v2216_v56  ;;  %v1933_v17 = vsub.f32 %v6138_v60, %v1853_v0  ;;  %v1934_v63 = vsub.f32 %v6142_v37, %v1853_v0 }
 0x2fc   : > { %v2079_v56 = vrot.slane %v2078_v20, 4  ;;  %v1531_v40 = vadd.f32 %v6177_v12, %v1530_v54  ;;  %vm1551_vm3 = vcmp.eq.f32.partialorder %v1550_v46, 8.507059e+37  ;;  %vm1560_vm4 = vweird.f32 %v6185_v3 }
 0x2fd   : > { %v1545_v28 = vadd.f32 %v6179_v4, %v1544_v32  ;;  %v1981_v41 = vmul.f32 1.442695, %v1933_v17  ;;  %v1983_v25 = vmul.f32 1.442695, %v1934_v63  ;;  %v2221_v18 = vsel %vm6262_vm9, %v6153_v15, %v6222_v23 }
 0x2fe   : > { %v5086_v16 = vpop.eup %5085  ;;  %v2080_v31 = vadd.f32 %v2079_v56, %v2078_v20  ;;  %vm1565_vm13 = vcmp.eq.f32.partialorder %v1564_v14, 8.507059e+37  ;;  %v7406_v46 = vunpack.i.h.bf16 %v5596_v6  ;;  %v7408_v17 = vunpack.i.l.bf16 %v5596_v6 }
 0x2ff   : > { %v1556_v59 = vmul.f32 %v5086_v16, %v6185_v3  ;;  %v6231_v50 = vpop.f32.mrf.mxu2  ;;  %v1549_v35 = vsel %vm6249_vm7, %v6179_v4, %v1545_v28  ;;  %vm1561_vm8 = vweird.f32 %v5086_v16  ;;  %2836 = vxpose.xlu0.b32.end [2/2] (short) (narrow) %v2408_v43, 32  ;;  %vm2469_vm7 = vcmask 130048  }
 0x300   : > { %5087 = vrcp.f32 %v6231_v50  ;;  %v1554_v60 = vsel %vm1551_vm3, %v1553_v21, %v1549_v35  ;;  %vm1562_vm11 = vmor %vm1560_vm4, %vm1561_vm8  ;;  %v1521_v28 = vsel %vm6270_vm10, %v6159_v11, %v6218_v13  ;;  %v7405_v11 = vand.u32 2147483648, %v6146_v22 }
 0x301   : > { %v1557_v32 = vsub.f32 1.0, %v1556_v59  ;;  %v2071_v59 = vadd.f32 %v2070_v36, %v2069_v19  ;;  %5089 = vpow2.f32 %v1981_v41  ;;  %v2081_v19 = vrot.slane %v2080_v31, 2 }
 0x302   : > { %5091 = vpow2.f32 %v1983_v25  ;;  %v1567_v25 = vor.u32 1.1754944e-38, %v1566_v42  ;;  %v1539_v13 = vor.u32 1.1754944e-38, %v7405_v11  ;;  %v1526_v41 = vsel %vm6237_vm5, %v6202_v30, %v1521_v28 }
 0x303   : > { %v1558_v2 = vmul.f32 %v5086_v16, %v1557_v32  ;;  %v2082_v4 = vadd.f32 %v2081_v19, %v2080_v31  ;;  %v2072_v15 = vrot.slane %v2071_v59, 2  ;;  %v1535_v31 = vsel %vm6290_vm12, %v6177_v12, %v1531_v40 }
 0x304   : > { %v2445_v63 = vpop.trf.xlu2  ;;  %v7407_v42 = vand.u32 2147483647, %v6146_v22  ;;  %v2226_v35 = vsel %vm6243_vm6, %v6195_v1, %v2221_v18  ;;  %v1727_v43 = vmul.f32 0.7711054, %v1526_v41  ;;  %vm1574_vm0 = vweird.f32 %v6231_v50 }
 0x305   : > { %v1559_v58 = vadd.f32 %v5086_v16, %v1558_v2  ;;  %4710 = vmatmul.msk.f32.vlgmr.msrb.gmra.mxu3 %vm2469_vm7, %v2445_v63  ;;  %v2083_v32 = vrot.slane %v2082_v4, 1  ;;  %v2073_v0 = vadd.f32 %v2072_v15, %v2071_v59 }
 0x306   : > { %v6275_v26 = vpop.eup %5087  ;;  %2658 = vmatpush.msrb.mxu3 %v7406_v46  ;;  %vm1537_vm14 = vcmp.eq.f32.partialorder %v7407_v42, 8.507059e+37  ;;  %v6348_v63 = vmul.f32 %v5841_v55, %v1727_v43  ;;  %v4871_v46 = vunpack.i.l.bf16 %v5701_v39  ;;  %v4918_v55 = vpack.i.bf16 %v5603_v7, %v5662_v9 }
 0x307   : > { %v1563_v20 = vsel %vm1562_vm11, %v5086_v16, %v1559_v58  ;;  %v6294_v36 = vpop.f32.mrf.mxu2  ;;  %v6303_v56 = vpop.eup %5089  ;;  %v1729_v16 = vmul.f32 0.7711054, %v1554_v60  ;;  %v1570_v54 = vmul.f32 %v6275_v26, %v6231_v50  ;;  %v1540_v40 = vsel %vm1537_vm14, %v1539_v13, %v1535_v31 }
 0x308   : > { %v1568_v23 = vsel %vm1565_vm13, %v1567_v25, %v1563_v20  ;;  %5093 = vrcp.f32 %v6294_v36  ;;  %v6309_v12 = vpop.eup %5091  ;;  %v2085_v2 = vsel %vm859_vm2, %v6303_v56, 0.0  ;;  %2659 = vmatpush.msrb.mxu3 %v7408_v17  ;;  %v6328_v19 = vadd.f32 %v2083_v32, %v2082_v4 }
 0x309   : > { %v1730_v14 = vmul.f32 0.7711054, %v1568_v23  ;;  %v2086_v30 = vsel %vm859_vm2, %v6309_v12, 0.0  ;;  %v1571_v37 = vsub.f32 1.0, %v1570_v54  ;;  %v6331_v1 = vmul.f32 %v5878_v48, %v1729_v16 }
 0x30a   : > { %v2087_v22 = vadd.f32 %v2086_v30, %v2085_v2  ;;  %v1728_v60 = vmul.f32 0.7711054, %v1540_v40  ;;  %5095 = vrcp.f32 %v6328_v19  ;;  %v2074_v4 = vrot.slane %v2073_v0, 1 }
 0x30b   : > { %v6322_v21 = vmul.f32 %v5901_v52, %v1730_v14  ;;  %v2385_v52 = vmul.f32 0.7711054, %v2226_v35  ;;  %v1572_v48 = vmul.f32 %v6275_v26, %v1571_v37  ;;  %v1863_v20 = vsel %vm859_vm2, %v6331_v1, -inf }
 0x30c   : > { %v2088_v25 = vrot.slane %v2087_v22, 4  ;;  %v2446_v18 = vpop.trf.xlu2  ;;  %v4872_v31 = vunpack.i.h.bf16 %v5701_v39  ;;  %v6353_v11 = vmul.f32 %v5850_v5, %v1728_v60  ;;  %v6356_v54 = vadd.f32 %v2074_v4, %v2073_v0 }
 0x30d   : > { %v1864_v59 = vsel %vm859_vm2, %v6322_v21, -inf  ;;  %4711 = vmatmul.msk.f32.gmra.mxu3 %vm2469_vm7, %v2446_v18  ;;  %v2405_v16 = vmul.f32 %v6084_v44, %v2385_v52  ;;  %v2406_v32 = vmul.f32 %v6102_v24, %v2385_v52  ;;  %v1573_v5 = vadd.f32 %v6275_v26, %v1572_v48 }
 0x30e   : > { %v6333_v58 = vpop.eup %5093  ;;  %v2089_v3 = vadd.f32 %v2088_v25, %v2087_v22  ;;  %v1865_v13 = vmax.f32 %v1863_v20, %v1864_v59  ;;  %vm1575_vm15 = vweird.f32 %v6275_v26  ;;  %v1854_v44 = vsel %vm859_vm2, %v6348_v63, -inf }
 0x30f   : > { %v1584_v6 = vmul.f32 %v6333_v58, %v6294_v36  ;;  %v6337_v28 = vpop.f32.mrf.mxu2  ;;  %v1578_v40 = vand.u32 2147483647, %v6231_v50  ;;  %v1580_v24 = vand.u32 2147483648, %v6231_v50  ;;  %v1855_v30 = vsel %vm859_vm2, %v6353_v11, -inf  ;;  %vm6381_vm5 = vmor %vm1574_vm0, %vm1575_vm15 }
 0x310   : > { %5097 = vrcp.f32 %v6337_v28  ;;  %v2090_v14 = vrot.slane %v2089_v3, 2  ;;  %v1866_v41 = vrot.slane %v1865_v13, 4  ;;  %v6362_v42 = vpop.eup %5095  ;;  %v1592_v52 = vand.u32 2147483647, %v6294_v36 }
 0x311   : > { %v1585_v23 = vsub.f32 1.0, %v1584_v6  ;;  %5099 = vrcp.f32 %v6356_v54  ;;  %v2256_v50 = vmul.f32 %v6362_v42, %v6328_v19  ;;  %v1577_v6 = vsel %vm6381_vm5, %v6275_v26, %v1573_v5 }
 0x312   : > { %2754 = vxpose.xlu2.b32.start [1/2] (short) (narrow) %v2405_v16, 32  ;;  %v2091_v35 = vadd.f32 %v2090_v14, %v2089_v3  ;;  %v1867_v17 = vmax.f32 %v1865_v13, %v1866_v41  ;;  %v1594_v18 = vand.u32 2147483648, %v6294_v36  ;;  %v1856_v4 = vmax.f32 %v1854_v44, %v1855_v30 }
 0x313   : > { %v1586_v0 = vmul.f32 %v6333_v58, %v1585_v23  ;;  %vm1579_vm6 = vcmp.eq.f32.partialorder %v1578_v40, 8.507059e+37  ;;  %v1581_v48 = vor.u32 1.1754944e-38, %v1580_v24  ;;  %vm1588_vm8 = vweird.f32 %v6294_v36 }
 0x314   : > { %v2447_v22 = vpop.trf.xlu2  ;;  %v2092_v37 = vrot.slane %v2091_v35, 1  ;;  %v1868_v3 = vrot.slane %v1867_v17, 2  ;;  %vm1589_vm9 = vweird.f32 %v6333_v58  ;;  %v2266_v13 = vand.u32 2147483648, %v6328_v19 }
 0x315   : > { %4712 = vmatmul.msk.f32.gmra.mxu3 %vm2469_vm7, %v2447_v22  ;;  %v1587_v20 = vadd.f32 %v6333_v58, %v1586_v0  ;;  %v1582_v23 = vsel %vm1579_vm6, %v1581_v48, %v1577_v6  ;;  %vm6403_vm10 = vcmp.eq.f32.partialorder %v1592_v52, 8.507059e+37  ;;  %v2257_v14 = vsub.f32 1.0, %v2256_v50  ;;  %vm6414_vm3 = vmor %vm1588_vm8, %vm1589_vm9 }
 0x316   : > { %v6368_v2 = vpop.eup %5097  ;;  %v6396_v59 = vadd.f32 %v2092_v37, %v2091_v35  ;;  %v1595_v5 = vor.u32 1.1754944e-38, %v1594_v18  ;;  %v1608_v35 = vand.u32 2147483648, %v6337_v28  ;;  %v1869_v44 = vmax.f32 %v1867_v17, %v1868_v3 }
 0x317   : > { %v6376_v43 = vpop.f32.mrf.mxu2  ;;  %v1598_v25 = vmul.f32 %v6368_v2, %v6337_v28  ;;  %v6407_v41 = vpop.eup %5099  ;;  %v1857_v40 = vrot.slane %v1856_v4, 4  ;;  %vm1602_vm4 = vweird.f32 %v6337_v28  ;;  %v1606_v0 = vand.u32 2147483647, %v6337_v28 }
 0x318   : > { %5101 = vrcp.f32 %v6376_v43  ;;  %vm2260_vm11 = vweird.f32 %v6328_v19  ;;  %v2264_v22 = vand.u32 2147483647, %v6328_v19  ;;  %v6422_v37 = vmul.f32 0.7711054, %v1582_v23 }
 0x319   : > { %5103 = vrcp.f32 %v6396_v59  ;;  %v1599_v16 = vsub.f32 1.0, %v1598_v25  ;;  %v6431_v52 = vor.u32 1.1754944e-38, %v2266_v13  ;;  %v2258_v50 = vmul.f32 %v6362_v42, %v2257_v14 }
 0x31a   : > { %2755 = vxpose.xlu2.b32.end [2/2] (short) (narrow) %v2406_v32, 32  ;;  %v1591_v32 = vsel %vm6414_vm3, %v6333_v58, %v1587_v20  ;;  %v1870_v6 = vrot.slane %v1869_v44, 1  ;;  %v1609_v48 = vor.u32 1.1754944e-38, %v1608_v35  ;;  %v6439_v3 = vmul.f32 %v6407_v41, %v6356_v54 }
 0x31b   : > { %v1600_v25 = vmul.f32 %v6368_v2, %v1599_v16  ;;  %v1858_v20 = vmax.f32 %v1856_v4, %v1857_v40  ;;  %v1596_v13 = vsel %vm6403_vm10, %v1595_v5, %v1591_v32  ;;  %vm1603_vm12 = vweird.f32 %v6368_v2 }
 0x31c   : > { %v2448_v17 = vpop.trf.xlu2  ;;  %vm6444_vm13 = vcmp.eq.f32.partialorder %v1606_v0, 8.507059e+37  ;;  %vm2261_vm14 = vweird.f32 %v6362_v42  ;;  %vm6450_vm15 = vcmp.eq.f32.partialorder %v2264_v22, 8.507059e+37  ;;  %vm1616_vm0 = vweird.f32 %v6376_v43  ;;  %vm6483_vm9 = vmor %vm1602_vm4, %vm1603_vm12 }
 0x31d   : > { %4713 = vmatmul.msk.f32.gmra.mxu3 %vm2469_vm7, %v2448_v17  ;;  %v1622_v4 = vand.u32 2147483648, %v6376_v43  ;;  %v2278_v5 = vand.u32 2147483647, %v6396_v59  ;;  %v1601_v40 = vadd.f32 %v6368_v2, %v1600_v25  ;;  %v2259_v0 = vadd.f32 %v6362_v42, %v2258_v50  ;;  %vm6473_vm8 = vmor %vm2260_vm11, %vm2261_vm14 }
 0x31e   : > { %v6410_v24 = vpop.eup %5101  ;;  %v1871_v32 = vmax.f32 %v1869_v44, %v1870_v6  ;;  %v1859_v17 = vrot.slane %v1858_v20, 2  ;;  %v1732_v6 = vmul.f32 0.7711054, %v1596_v13  ;;  %v1620_v9 = vand.u32 2147483647, %v6376_v43 }
 0x31f   : > { %v1612_v36 = vmul.f32 %v6410_v24, %v6376_v43  ;;  %v6429_v60 = vpop.f32.mrf.mxu2  ;;  %v5104_v18 = vpop.eup %5103  ;;  %vm1617_vm5 = vweird.f32 %v6410_v24  ;;  %v1623_v19 = vor.u32 1.1754944e-38, %v1622_v4  ;;  %vm2274_vm10 = vweird.f32 %v6396_v59 }
 0x320   : > { %5105 = vrcp.f32 %v6429_v60  ;;  %v2270_v16 = vmul.f32 %v5104_v18, %v6396_v59  ;;  %v2527_v26 = vpop.trf.xlu1  ;;  %vm2275_vm6 = vweird.f32 %v5104_v18  ;;  %v1937_v25 = vsub.f32 %v6331_v1, %v1871_v32  ;;  %vm6498_vm3 = vmor %vm1616_vm0, %vm1617_vm5 }
 0x321   : > { %v1613_v58 = vsub.f32 1.0, %v1612_v36  ;;  %v2280_v36 = vand.u32 2147483648, %v6396_v59  ;;  %v1938_v50 = vsub.f32 %v6322_v21, %v1871_v32  ;;  %v2263_v59 = vsel %vm6473_vm8, %v6362_v42, %v2259_v0  ;;  %vm2276_vm4 = vmor %vm2274_vm10, %vm2275_vm6 }
 0x322   : > { %v2271_v30 = vsub.f32 1.0, %v2270_v16  ;;  %v1605_v16 = vsel %vm6483_vm9, %v6368_v2, %v1601_v40  ;;  %vm2279_vm11 = vcmp.eq.f32.partialorder %v2278_v5, 8.507059e+37  ;;  %vm1621_vm12 = vcmp.eq.f32.partialorder %v1620_v9, 8.507059e+37 }
 0x323   : > { %v1614_v35 = vmul.f32 %v6410_v24, %v1613_v58  ;;  %4919 = vrot.lane.b32.xlu1 %v4918_v55, %s5171_s25  ;;  %v1991_v40 = vmul.f32 1.442695, %v1938_v50  ;;  %v1610_v42 = vsel %vm6444_vm13, %v1609_v48, %v1605_v16  ;;  %v1636_v44 = vand.u32 2147483648, %v6429_v60 }
 0x324   : > { %v2272_v15 = vmul.f32 %v5104_v18, %v2271_v30  ;;  %v1733_v39 = vmul.f32 0.7711054, %v1610_v42  ;;  %vm1630_vm13 = vweird.f32 %v6429_v60  ;;  %vm2247_vm9 = vweird.f32 %v6407_v41 }
 0x325   : > { %v1615_v22 = vadd.f32 %v6410_v24, %v1614_v35  ;;  %4714 = vmatmul.msk.f32.vlgmr.msra.gmra.mxu3 %vm2469_vm7, %v2527_v26  ;;  %v2281_v35 = vor.u32 1.1754944e-38, %v2280_v36  ;;  %v1989_v26 = vmul.f32 1.442695, %v1937_v25  ;;  %v2252_v25 = vand.u32 2147483648, %v6356_v54 }
 0x326   : > { %v6463_v58 = vpop.eup %5105  ;;  %v2273_v13 = vadd.f32 %v5104_v18, %v2272_v15  ;;  %2739 = vmatpush.msra.mxu3 %v4872_v31  ;;  %v1860_v15 = vmax.f32 %v1858_v20, %v1859_v17  ;;  %v2268_v31 = vsel %vm6450_vm15, %v6431_v52, %v2263_v59  ;;  %v6524_v20 = vmul.f32 %v5931_v47, %v1732_v6 }
 0x327   : > { %v6489_v55 = vpop.f32.mrf.mxu2  ;;  %v1619_v2 = vsel %vm6498_vm3, %v6410_v24, %v1615_v22  ;;  %v1626_v43 = vmul.f32 %v6463_v58, %v6429_v60  ;;  %v6529_v22 = vmul.f32 0.7711054, %v2268_v31  ;;  %v2250_v52 = vand.u32 2147483647, %v6356_v54 }
 0x328   : > { %5107 = vrcp.f32 %v6489_v55  ;;  %v2277_v4 = vsel %vm2276_vm4, %v5104_v18, %v2273_v13  ;;  %2740 = vmatpush.msra.mxu3 %v4871_v46  ;;  %v2528_v24 = vpop.trf.xlu1  ;;  %v1624_v0 = vsel %vm1621_vm12, %v1623_v19, %v1619_v2  ;;  %v2243_v18 = vsub.f32 1.0, %v6439_v3 }
 0x329   : > { %v2282_v30 = vsel %vm2279_vm11, %v2281_v35, %v2277_v4  ;;  %5109 = vpow2.f32 %v1989_v26  ;;  %v1627_v23 = vsub.f32 1.0, %v1626_v43  ;;  %v1861_v48 = vrot.slane %v1860_v15, 1 }
 0x32a   : > { %v2389_v32 = vmul.f32 0.7711054, %v2282_v30  ;;  %5111 = vpow2.f32 %v1991_v40  ;;  %v1734_v14 = vmul.f32 0.7711054, %v1624_v0  ;;  %v6538_v17 = vmul.f32 %v5915_v53, %v6422_v37 }
 0x32b   : > { %v1862_v47 = vmax.f32 %v1860_v15, %v1861_v48  ;;  %v1628_v50 = vmul.f32 %v6463_v58, %v1627_v23  ;;  %v1873_v53 = vsel %vm859_vm2, %v6524_v20, -inf  ;;  %v6552_v9 = vmul.f32 %v5945_v29, %v1733_v39 }
 0x32c   : > { %v2413_v46 = vmul.f32 %v6303_v56, %v2389_v32  ;;  %v2244_v56 = vmul.f32 %v6407_v41, %v2243_v18  ;;  %v1634_v19 = vand.u32 2147483647, %v6429_v60  ;;  %v6560_v13 = vmul.f32 %v5959_v27, %v1734_v14 }
 0x32d   : > { %4715 = vmatmul.msk.f32.gmra.mxu3 %vm2469_vm7, %v2528_v24  ;;  %v1935_v7 = vsub.f32 %v6348_v63, %v1862_v47  ;;  %v1936_v16 = vsub.f32 %v6353_v11, %v1862_v47  ;;  %v2411_v59 = vmul.f32 %v6200_v34, %v6529_v22  ;;  %v1872_v29 = vsel %vm859_vm2, %v6538_v17, -inf }
 0x32e   : > { %v6526_v5 = vpop.eup %5107  ;;  %3078 = vxpose.xlu0.b32.start [1/2] (short) (narrow) %v2413_v46, 32  ;;  %v1637_v35 = vor.u32 1.1754944e-38, %v1636_v44  ;;  %v1874_v26 = vmax.f32 %v1872_v29, %v1873_v53  ;;  %v1629_v27 = vadd.f32 %v6463_v58, %v1628_v50  ;;  %vm1631_vm14 = vweird.f32 %v6463_v58 }
 0x32f   : > { %v1640_v36 = vmul.f32 %v6526_v5, %v6489_v55  ;;  %v6534_v3 = vpop.f32.mrf.mxu2  ;;  %v6549_v37 = vpop.eup %5109  ;;  %v1985_v40 = vmul.f32 1.442695, %v1935_v7  ;;  %v1881_v30 = vsel %vm859_vm2, %v6552_v9, -inf  ;;  %v2414_v24 = vmul.f32 %v6309_v12, %v2389_v32  ;;  %vm6587_vm0 = vmor %vm1630_vm13, %vm1631_vm14 }
 0x330   : > { %5113 = vrcp.f32 %v6534_v3  ;;  %v6557_v28 = vpop.eup %5111  ;;  %v2529_v2 = vpop.trf.xlu1  ;;  %v2103_v43 = vsel %vm859_vm2, %v6549_v37, 0.0  ;;  %v1987_v31 = vmul.f32 1.442695, %v1936_v16  ;;  %v1875_v0 = vrot.slane %v1874_v26, 4 }
 0x331   : > { %v1641_v6 = vsub.f32 1.0, %v1640_v36  ;;  %v2104_v4 = vsel %vm859_vm2, %v6557_v28, 0.0  ;;  %v1882_v18 = vsel %vm859_vm2, %v6560_v13, -inf  ;;  %vm1644_vm15 = vweird.f32 %v6489_v55 }
 0x332   : > { %2997 = vxpose.xlu2.b32.start [1/2] (short) (narrow) %v2411_v59, 32  ;;  %v2105_v34 = vadd.f32 %v2104_v4, %v2103_v43  ;;  %vm1645_vm5 = vweird.f32 %v6526_v5  ;;  %v1650_v32 = vand.u32 2147483648, %v6489_v55  ;;  %v1633_v14 = vsel %vm6587_vm0, %v6463_v58, %v1629_v27 }
 0x333   : > { %v1642_v15 = vmul.f32 %v6526_v5, %v1641_v6  ;;  %v1648_v47 = vand.u32 2147483647, %v6489_v55  ;;  %v1883_v44 = vmax.f32 %v1881_v30, %v1882_v18  ;;  %v1876_v50 = vmax.f32 %v1874_v26, %v1875_v0  ;;  %vm6602_vm8 = vmor %vm1644_vm15, %vm1645_vm5 }
 0x334   : > { %v2106_v39 = vrot.slane %v2105_v34, 4  ;;  %vm1635_vm6 = vcmp.eq.f32.partialorder %v1634_v19, 8.507059e+37  ;;  %v2412_v7 = vmul.f32 %v6205_v57, %v6529_v22  ;;  %v2245_v59 = vadd.f32 %v6407_v41, %v2244_v56 }
 0x335   : > { %v1643_v12 = vadd.f32 %v6526_v5, %v1642_v15  ;;  %4716 = vmatmul.msk.f32.gmra.mxu3 %vm2469_vm7, %v2529_v2  ;;  %v1638_v58 = vsel %vm1635_vm6, %v1637_v35, %v1633_v14  ;;  %v1884_v19 = vrot.slane %v1883_v44, 4  ;;  %v1651_v2 = vor.u32 1.1754944e-38, %v1650_v32 }
 0x336   : > { %v6573_v42 = vpop.eup %5113  ;;  %3079 = vxpose.xlu0.b32.end [2/2] (short) (narrow) %v2414_v24, 32  ;;  %v2107_v36 = vadd.f32 %v2106_v39, %v2105_v34  ;;  %v1877_v15 = vrot.slane %v1876_v50, 2  ;;  %vm1649_vm10 = vcmp.eq.f32.partialorder %v1648_v47, 8.507059e+37  ;;  %vm2246_vm3 = vweird.f32 %v6356_v54 }
 0x337   : > { %v1654_v23 = vmul.f32 %v6573_v42, %v6534_v3  ;;  %v6583_v48 = vpop.f32.mrf.mxu2  ;;  %v1647_v16 = vsel %vm6602_vm8, %v6526_v5, %v1643_v12  ;;  %vm6619_vm4 = vcmp.eq.f32.partialorder %v2250_v52, 8.507059e+37  ;;  %v1885_v5 = vmax.f32 %v1883_v44, %v1884_v19  ;;  %vm6631_vm11 = vmor %vm2246_vm3, %vm2247_vm9 }
 0x338   : > { %5115 = vrcp.f32 %v6583_v48  ;;  %v2108_v53 = vrot.slane %v2107_v36, 2  ;;  %v2530_v43 = vpop.trf.xlu1  ;;  %v1735_v56 = vmul.f32 0.7711054, %v1638_v58  ;;  %v1652_v35 = vsel %vm1649_vm10, %v1651_v2, %v1647_v16 }
 0x339   : > { %v1655_v60 = vsub.f32 1.0, %v1654_v23  ;;  %5117 = vpow2.f32 %v1985_v40  ;;  %v2608_v34 = vpop.trf.xlu0  ;;  %vm1659_vm12 = vweird.f32 %v6573_v42  ;;  %v1664_v24 = vand.u32 2147483648, %v6534_v3 }
 0x33a   : > { %5119 = vpow2.f32 %v1987_v31  ;;  %2998 = vxpose.xlu2.b32.end [2/2] (short) (narrow) %v2412_v7, 32  ;;  %v2109_v29 = vadd.f32 %v2108_v53, %v2107_v36  ;;  %v2249_v31 = vsel %vm6631_vm11, %v6407_v41, %v2245_v59  ;;  %v2253_v0 = vor.u32 1.1754944e-38, %v2252_v25 }
 0x33b   : > { %v1656_v55 = vmul.f32 %v6573_v42, %v1655_v60  ;;  %v1878_v46 = vmax.f32 %v1876_v50, %v1877_v15  ;;  %v1736_v12 = vmul.f32 0.7711054, %v1652_v35  ;;  %v1886_v32 = vrot.slane %v1885_v5, 2 }
 0x33c   : > { %v2110_v40 = vrot.slane %v2109_v29, 1  ;;  %v6653_v36 = vmul.f32 %v5970_v62, %v1735_v56  ;;  %vm1658_vm13 = vweird.f32 %v6534_v3  ;;  %v1662_v54 = vand.u32 2147483647, %v6534_v3 }
 0x33d   : > { %4717 = vmatmul.msk.f32.gmra.mxu3 %vm2469_vm7, %v2530_v43  ;;  %v1657_v18 = vadd.f32 %v6573_v42, %v1656_v55  ;;  %vm6660_vm14 = vmor %vm1658_vm13, %vm1659_vm12  ;;  %v1665_v25 = vor.u32 1.1754944e-38, %v1664_v24  ;;  %v1676_v47 = vand.u32 2147483647, %v6583_v48  ;;  %v2254_v44 = vsel %vm6619_vm4, %v2253_v0, %v2249_v31 }
 0x33e   : > { %v6614_v4 = vpop.eup %5115  ;;  %v6646_v39 = vadd.f32 %v2110_v40, %v2109_v29  ;;  %v1887_v62 = vmax.f32 %v1885_v5, %v1886_v32  ;;  %v1879_v7 = vrot.slane %v1878_v46, 1  ;;  %v6672_v53 = vmul.f32 %v5989_v49, %v1736_v12 }
 0x33f   : > { %v6623_v22 = vpop.eup %5117  ;;  %v1668_v26 = vmul.f32 %v6614_v4, %v6583_v48  ;;  %v6627_v27 = vpop.f32.mrf.mxu2  ;;  %v1661_v50 = vsel %vm6660_vm14, %v6573_v42, %v1657_v18  ;;  %v1678_v58 = vand.u32 2147483648, %v6583_v48  ;;  %v4876_v59 = vunpack.i.l.bf16 %v5707_v38 }
 0x340   : > { %v6635_v52 = vpop.eup %5119  ;;  %v2094_v14 = vsel %vm859_vm2, %v6623_v22, 0.0  ;;  %5121 = vrcp.f32 %v6646_v39  ;;  %v1888_v16 = vrot.slane %v1887_v62, 1  ;;  %v1890_v19 = vsel %vm859_vm2, %v6653_v36, -inf }
 0x341   : > { %v1669_v23 = vsub.f32 1.0, %v1668_v26  ;;  %v2095_v60 = vsel %vm859_vm2, %v6635_v52, 0.0  ;;  %5123 = vrcp.f32 %v6627_v27  ;;  %vm1663_vm15 = vcmp.eq.f32.partialorder %v1662_v54, 8.507059e+37  ;;  %v2609_v15 = vpop.trf.xlu0 }
 0x342   : > { %v2096_v6 = vadd.f32 %v2095_v60, %v2094_v14  ;;  %v6681_v42 = vmul.f32 0.7711054, %v2254_v44  ;;  %v1666_v55 = vsel %vm1663_vm15, %v1665_v25, %v1661_v50  ;;  %vm1672_vm0 = vweird.f32 %v6583_v48 }
 0x343   : > { %v1670_v3 = vmul.f32 %v6614_v4, %v1669_v23  ;;  %vm1673_vm5 = vweird.f32 %v6614_v4  ;;  %v1889_v57 = vmax.f32 %v1887_v62, %v1888_v16  ;;  %v1880_v5 = vmax.f32 %v1878_v46, %v1879_v7 }
 0x344   : > { %v2097_v49 = vrot.slane %v2096_v6, 4  ;;  %v1891_v56 = vsel %vm859_vm2, %v6672_v53, -inf  ;;  %vm6690_vm6 = vcmp.eq.f32.partialorder %v1676_v47, 8.507059e+37  ;;  %v1679_v26 = vor.u32 1.1754944e-38, %v1678_v58  ;;  %vm6706_vm9 = vmor %vm1672_vm0, %vm1673_vm5 }
 0x345   : > { %4718 = vmatmul.msk.f32.vlgmr.msrb.gmra.mxu3 %vm2469_vm7, %v2608_v34  ;;  %v1671_v29 = vadd.f32 %v6614_v4, %v1670_v3  ;;  %v1737_v40 = vmul.f32 0.7711054, %v1666_v55  ;;  %v7437_v30 = vunpack.i.h.bf16 %v5707_v38  ;;  %vm2302_vm8 = vweird.f32 %v6646_v39 }
 0x346   : > { %v5122_v43 = vpop.eup %5121  ;;  %2820 = vmatpush.msrb.mxu3 %v4876_v59  ;;  %v2306_v24 = vand.u32 2147483647, %v6646_v39  ;;  %v2308_v31 = vand.u32 2147483648, %v6646_v39  ;;  %v1941_v38 = vsub.f32 %v6552_v9, %v1889_v57  ;;  %v1942_v46 = vsub.f32 %v6560_v13, %v1889_v57 }
 0x347   : > { %v6679_v2 = vpop.f32.mrf.mxu2  ;;  %v2298_v34 = vmul.f32 %v5122_v43, %v6646_v39  ;;  %v6700_v0 = vpop.eup %5123  ;;  %v2098_v12 = vadd.f32 %v2097_v49, %v2096_v6  ;;  %v1675_v32 = vsel %vm6706_vm9, %v6614_v4, %v1671_v29  ;;  %vm2303_vm10 = vweird.f32 %v5122_v43 }
 0x348   : > { %5125 = vrcp.f32 %v6679_v2  ;;  %2821 = vmatpush.msrb.mxu3 %v7437_v30  ;;  %v1939_v14 = vsub.f32 %v6538_v17, %v1880_v5  ;;  %v1940_v60 = vsub.f32 %v6524_v20, %v1880_v5  ;;  %v1997_v41 = vmul.f32 1.442695, %v1941_v38  ;;  %vm2304_vm4 = vmor %vm2302_vm8, %vm2303_vm10 }
 0x349   : > { %v2299_v23 = vsub.f32 1.0, %v2298_v34  ;;  %v1999_v25 = vmul.f32 1.442695, %v1942_v46  ;;  %v2099_v47 = vrot.slane %v2098_v12, 2  ;;  %v1682_v44 = vmul.f32 %v6700_v0, %v6627_v27 }
 0x34a   : > { %vm6723_vm3 = vcmp.eq.f32.partialorder %v2306_v24, 8.507059e+37  ;;  %v1892_v4 = vmax.f32 %v1890_v19, %v1891_v56  ;;  %v2309_v6 = vor.u32 1.1754944e-38, %v2308_v31  ;;  %5127 = vpow2.f32 %v1997_v41  ;;  %v2610_v56 = vpop.trf.xlu0 }
 0x34b   : > { %v2300_v54 = vmul.f32 %v5122_v43, %v2299_v23  ;;  %v2100_v7 = vadd.f32 %v2099_v47, %v2098_v12  ;;  %v1680_v58 = vsel %vm6690_vm6, %v1679_v26, %v1675_v32  ;;  %5129 = vpow2.f32 %v1999_v25 }
 0x34c   : > { %v1893_v59 = vrot.slane %v1892_v4, 4  ;;  %v1993_v29 = vmul.f32 1.442695, %v1939_v14  ;;  %v1995_v19 = vmul.f32 1.442695, %v1940_v60  ;;  %v1683_v57 = vsub.f32 1.0, %v1682_v44 }
 0x34d   : > { %4719 = vmatmul.msk.f32.gmra.mxu3 %vm2469_vm7, %v2609_v15  ;;  %v2301_v3 = vadd.f32 %v5122_v43, %v2300_v54  ;;  %v2101_v49 = vrot.slane %v2100_v7, 1  ;;  %v1690_v15 = vand.u32 2147483647, %v6627_v27  ;;  %v1738_v26 = vmul.f32 0.7711054, %v1680_v58 }
 0x34e   : > { %v6717_v48 = vpop.eup %5125  ;;  %v1894_v35 = vmax.f32 %v1892_v4, %v1893_v59  ;;  %5131 = vpow2.f32 %v1993_v29  ;;  %v6739_v39 = vmul.f32 %v6019_v8, %v1737_v40  ;;  %v1684_v46 = vmul.f32 %v6700_v0, %v1683_v57 }
 0x34f   : > { %v1696_v62 = vmul.f32 %v6717_v48, %v6679_v2  ;;  %v2305_v55 = vsel %vm2304_vm4, %v5122_v43, %v2301_v3  ;;  %v6736_v30 = vadd.f32 %v2101_v49, %v2100_v7  ;;  %v1692_v43 = vand.u32 2147483648, %v6627_v27 }
 0x350   : > { %v2310_v5 = vsel %vm6723_vm3, %v2309_v6, %v2305_v55  ;;  %v1895_v24 = vrot.slane %v1894_v35, 2  ;;  %5133 = vpow2.f32 %v1995_v19  ;;  %v6742_v31 = vpop.eup %5127  ;;  %v2409_v8 = vmul.f32 %v6171_v10, %v6681_v42 }
 0x351   : > { %v1697_v16 = vsub.f32 1.0, %v1696_v62  ;;  %v2391_v34 = vmul.f32 0.7711054, %v2310_v5  ;;  %5135 = vrcp.f32 %v6736_v30  ;;  %v6747_v38 = vpop.eup %5129  ;;  %v2121_v40 = vsel %vm859_vm2, %v6742_v31, 0.0 }
 0x352   : > { %v6755_v12 = vmul.f32 %v6029_v45, %v1738_v26  ;;  %vm1686_vm11 = vweird.f32 %v6627_v27  ;;  %v1896_v32 = vmax.f32 %v1894_v35, %v1895_v24  ;;  %v1899_v14 = vsel %vm859_vm2, %v6739_v39, -inf  ;;  %v2611_v29 = vpop.trf.xlu0 }
 0x353   : > { %v1698_v18 = vmul.f32 %v6717_v48, %v1697_v16  ;;  %v2417_v23 = vmul.f32 %v6549_v37, %v2391_v34  ;;  %v2122_v37 = vsel %vm859_vm2, %v6747_v38, 0.0  ;;  %vm6763_vm12 = vcmp.eq.f32.partialorder %v1690_v15, 8.507059e+37 }
 0x354   : > { %v1693_v60 = vor.u32 1.1754944e-38, %v1692_v43  ;;  %v1704_v45 = vand.u32 2147483647, %v6679_v2  ;;  %v2123_v54 = vadd.f32 %v2122_v37, %v2121_v40  ;;  %v6768_v41 = vpop.eup %5131  ;;  %vm1687_vm13 = vweird.f32 %v6700_v0 }
 0x355   : > { %3240 = vxpose.xlu2.b32.start [1/2] (short) (narrow) %v2417_v23, 32  ;;  %4720 = vmatmul.msk.f32.gmra.mxu3 %vm2469_vm7, %v2610_v56  ;;  %v1699_v25 = vadd.f32 %v6717_v48, %v1698_v18  ;;  %vm1701_vm14 = vweird.f32 %v6717_v48  ;;  %v1897_v47 = vrot.slane %v1896_v32, 1  ;;  %v1685_v62 = vadd.f32 %v6700_v0, %v1684_v46  ;;  %vm6801_vm6 = vmor %vm1686_vm11, %vm1687_vm13 }
 0x356   : > { %v6773_v44 = vpop.eup %5133  ;;  %v1706_v50 = vand.u32 2147483648, %v6679_v2  ;;  %v2124_v4 = vrot.slane %v2123_v54, 4  ;;  %v2112_v3 = vsel %vm859_vm2, %v6768_v41, 0.0  ;;  %v1900_v7 = vsel %vm859_vm2, %v6755_v12, -inf }
 0x357   : > { %v6779_v6 = vpop.eup %5135  ;;  %vm1700_vm15 = vweird.f32 %v6679_v2  ;;  %v1898_v58 = vmax.f32 %v1896_v32, %v1897_v47  ;;  %v2113_v16 = vsel %vm859_vm2, %v6773_v44, 0.0  ;;  %vm6790_vm5 = vcmp.eq.f32.partialorder %v1704_v45, 8.507059e+37  ;;  %v2689_v32 = vpop.trf.xlu1 }
 0x358   : > { %2916 = vxpose.xlu1.b32.start [1/2] (short) (narrow) %v2409_v8, 32  ;;  %vm6786_vm0 = vmor %vm1700_vm15, %vm1701_vm14  ;;  %v2418_v49 = vmul.f32 %v6557_v28, %v2391_v34  ;;  %v2125_v19 = vadd.f32 %v2124_v4, %v2123_v54  ;;  %v2284_v57 = vmul.f32 %v6779_v6, %v6736_v30  ;;  %v2114_v56 = vadd.f32 %v2113_v16, %v2112_v3 }
 0x359   : > { %v1703_v15 = vsel %vm6786_vm0, %v6717_v48, %v1699_v25  ;;  %v1943_v5 = vsub.f32 %v6653_v36, %v1898_v58  ;;  %v1944_v28 = vsub.f32 %v6672_v53, %v1898_v58  ;;  %v1689_v35 = vsel %vm6801_vm6, %v6700_v0, %v1685_v62  ;;  %v7450_v58 = vld [vmem:[#allocation21_spill] sm:$0xff] }
 0x35a   : > { %v1707_v26 = vor.u32 1.1754944e-38, %v1706_v50  ;;  %v2126_v34 = vrot.slane %v2125_v19, 2  ;;  %v1901_v27 = vmax.f32 %v1899_v14, %v1900_v7  ;;  %v2410_v43 = vmul.f32 %v6174_v33, %v6681_v42 }
 0x35b   : > { %v2001_v24 = vmul.f32 1.442695, %v1943_v5  ;;  %v2003_v48 = vmul.f32 1.442695, %v1944_v28  ;;  %v2115_v18 = vrot.slane %v2114_v56, 4  ;;  %v2285_v8 = vsub.f32 1.0, %v2284_v57 }
 0x35c   : > { %v1708_v23 = vsel %vm6790_vm5, %v1707_v26, %v1703_v15  ;;  %v2127_v46 = vadd.f32 %v2126_v34, %v2125_v19  ;;  %v1902_v40 = vrot.slane %v1901_v27, 4  ;;  %v1694_v0 = vsel %vm6763_vm12, %v1693_v60, %v1689_v35 }
 0x35d   : > { %3241 = vxpose.xlu2.b32.end [2/2] (short) (narrow) %v2418_v49, 32  ;;  %4721 = vmatmul.msk.f32.gmra.mxu3 %vm2469_vm7, %v2611_v29  ;;  %5137 = vpow2.f32 %v2001_v24  ;;  %v2116_v37 = vadd.f32 %v2115_v18, %v2114_v56  ;;  %v1740_v33 = vmul.f32 0.7711054, %v1708_v23  ;;  %v1739_v42 = vmul.f32 0.7711054, %v1694_v0 }
 0x35e   : > { %v2128_v14 = vrot.slane %v2127_v46, 1  ;;  %5139 = vpow2.f32 %v2003_v48  ;;  %v1903_v45 = vmax.f32 %v1901_v27, %v1902_v40  ;;  %v2286_v25 = vmul.f32 %v6779_v6, %v2285_v8 }
 0x35f   : > { %v2117_v62 = vrot.slane %v2116_v37, 2  ;;  %v4881_v50 = vunpack.i.l.bf16 %v5711_v51  ;;  %v4882_v60 = vunpack.i.h.bf16 %v5711_v51  ;;  %v6829_v4 = vmul.f32 %v6074_v61, %v1740_v33  ;;  %v2690_v19 = vpop.trf.xlu1 }
 0x360   : > { %2917 = vxpose.xlu1.b32.end [2/2] (short) (narrow) %v2410_v43, 32  ;;  %v6820_v54 = vadd.f32 %v2128_v14, %v2127_v46  ;;  %v1904_v47 = vrot.slane %v1903_v45, 2  ;;  %v6835_v16 = vmul.f32 %v7450_v58, %v1739_v42  ;;  %v2287_v59 = vadd.f32 %v6779_v6, %v2286_v25 }
 0x361   : > { %vm2289_vm8 = vweird.f32 %v6779_v6  ;;  %v2292_v51 = vand.u32 2147483647, %v6736_v30  ;;  %v2294_v61 = vand.u32 2147483648, %v6736_v30  ;;  %v2118_v29 = vadd.f32 %v2117_v62, %v2116_v37 }
 0x362   : > { %5141 = vrcp.f32 %v6820_v54  ;;  %v1905_v3 = vmax.f32 %v1903_v45, %v1904_v47  ;;  %vm2288_vm9 = vweird.f32 %v6736_v30  ;;  %v1909_v15 = vsel %vm859_vm2, %v6829_v4, -inf }
 0x363   : > { %v6825_v10 = vpop.eup %5137  ;;  %vm6848_vm10 = vmor %vm2288_vm9, %vm2289_vm8  ;;  %v1908_v56 = vsel %vm859_vm2, %v6835_v16, -inf  ;;  %vm2293_vm3 = vcmp.eq.f32.partialorder %v2292_v51, 8.507059e+37  ;;  %v2295_v27 = vor.u32 1.1754944e-38, %v2294_v61  ;;  %v2119_v43 = vrot.slane %v2118_v29, 1 }
 0x364   : > { %v6832_v7 = vpop.eup %5139  ;;  %v2130_v55 = vsel %vm859_vm2, %v6825_v10, 0.0  ;;  %v1906_v2 = vrot.slane %v1905_v3, 1  ;;  %v2291_v35 = vsel %vm6848_vm10, %v6779_v6, %v2287_v59  ;;  %v1910_v23 = vmax.f32 %v1908_v56, %v1909_v15 }
 0x365   : > { %4722 = vmatmul.msk.f32.vlgmr.msra.gmra.mxu3 %vm2469_vm7, %v2689_v32  ;;  %v2131_v49 = vsel %vm859_vm2, %v6832_v7, 0.0  ;;  %v2336_v8 = vand.u32 2147483648, %v6820_v54  ;;  %v2296_v40 = vsel %vm2293_vm3, %v2295_v27, %v2291_v35  ;;  %v2334_v45 = vand.u32 2147483647, %v6820_v54 }
 0x366   : > { %2901 = vmatpush.msra.mxu3 %v4881_v50  ;;  %v2132_v57 = vadd.f32 %v2131_v49, %v2130_v55  ;;  %v1907_v30 = vmax.f32 %v1905_v3, %v1906_v2  ;;  %v1911_v32 = vrot.slane %v1910_v23, 4  ;;  %v6863_v33 = vadd.f32 %v2119_v43, %v2118_v29 }
 0x367   : > { %vm2330_vm11 = vweird.f32 %v6820_v54  ;;  %v2337_v62 = vor.u32 1.1754944e-38, %v2336_v8  ;;  %v2390_v50 = vmul.f32 0.7711054, %v2296_v40  ;;  %vm2335_vm13 = vcmp.eq.f32.partialorder %v2334_v45, 8.507059e+37 }
 0x368   : > { %2902 = vmatpush.msra.mxu3 %v4882_v60  ;;  %v5142_v28 = vpop.eup %5141  ;;  %v2133_v26 = vrot.slane %v2132_v57, 4  ;;  %v1945_v48 = vsub.f32 %v6739_v39, %v1907_v30  ;;  %v1946_v18 = vsub.f32 %v6755_v12, %v1907_v30  ;;  %v1912_v47 = vmax.f32 %v1910_v23, %v1911_v32  ;;  %v2691_v60 = vpop.trf.xlu1 }
 0x369   : > { %v2326_v34 = vmul.f32 %v5142_v28, %v6820_v54  ;;  %vm2331_vm4 = vweird.f32 %v5142_v28  ;;  %v2415_v54 = vmul.f32 %v6623_v22, %v2390_v50  ;;  %vm2316_vm0 = vweird.f32 %v6863_v33 }
 0x36a   : > { %v2134_v24 = vadd.f32 %v2133_v26, %v2132_v57  ;;  %v2005_v0 = vmul.f32 1.442695, %v1945_v48  ;;  %v2007_v37 = vmul.f32 1.442695, %v1946_v18  ;;  %vm2332_vm12 = vmor %vm2330_vm11, %vm2331_vm4  ;;  %v1913_v59 = vrot.slane %v1912_v47, 2 }
 0x36b   : > { %v2327_v46 = vsub.f32 1.0, %v2326_v34 }
 0x36c   : > { %v2135_v6 = vrot.slane %v2134_v24, 2  ;;  %5143 = vpow2.f32 %v2005_v0  ;;  %v1914_v29 = vmax.f32 %v1912_v47, %v1913_v59 }
 0x36d   : > { %4723 = vmatmul.msk.f32.gmra.mxu3 %vm2469_vm7, %v2690_v19  ;;  %v2328_v14 = vmul.f32 %v5142_v28, %v2327_v46  ;;  %5145 = vpow2.f32 %v2007_v37 }
 0x36e   : > { %v2136_v42 = vadd.f32 %v2135_v6, %v2134_v24  ;;  %5147 = vrcp.f32 %v6863_v33  ;;  %v1915_v56 = vrot.slane %v1914_v29, 1 }
 0x36f   : > { %v2329_v25 = vadd.f32 %v5142_v28, %v2328_v14 }
 0x370   : > { %v2137_v3 = vrot.slane %v2136_v42, 1  ;;  %v2692_v22 = vpop.trf.xlu1  ;;  %v1916_v27 = vmax.f32 %v1914_v29, %v1915_v56 }
 0x371   : > { %v2333_v58 = vsel %vm2332_vm12, %v5142_v28, %v2329_v25 }
 0x372   : > { %v2338_v55 = vsel %vm2335_vm13, %v2337_v62, %v2333_v58  ;;  %v2138_v51 = vadd.f32 %v2137_v3, %v2136_v42  ;;  %v6868_v49 = vpop.eup %5143  ;;  %v1947_v23 = vsub.f32 %v6835_v16, %v1916_v27  ;;  %v1948_v8 = vsub.f32 %v6829_v4, %v1916_v27 }
 0x373   : > { %v2393_v61 = vmul.f32 0.7711054, %v2338_v55  ;;  %v6871_v19 = vpop.eup %5145  ;;  %v2139_v2 = vsel %vm859_vm2, %v6868_v49, 0.0  ;;  %v2320_v42 = vand.u32 2147483647, %v6863_v33 }
 0x374   : > { %5149 = vrcp.f32 %v2138_v51  ;;  %v2140_v15 = vsel %vm859_vm2, %v6871_v19, 0.0  ;;  %v5148_v5 = vpop.eup %5147  ;;  %v2009_v0 = vmul.f32 1.442695, %v1947_v23  ;;  %v2011_v32 = vmul.f32 1.442695, %v1948_v8 }
 0x375   : > { %4724 = vmatmul.msk.f32.gmra.mxu3 %vm2469_vm7, %v2691_v60  ;;  %v2421_v57 = vmul.f32 %v6742_v31, %v2393_v61  ;;  %v2141_v28 = vadd.f32 %v2140_v15, %v2139_v2  ;;  %v2312_v30 = vmul.f32 %v5148_v5, %v6863_v33  ;;  %v2416_v31 = vmul.f32 %v6635_v52, %v2390_v50 }
 0x376   : > { %v2422_v43 = vmul.f32 %v6747_v38, %v2393_v61  ;;  %vm2317_vm14 = vweird.f32 %v5148_v5  ;;  %v2322_v38 = vand.u32 2147483648, %v6863_v33  ;;  %v2350_v45 = vand.u32 2147483648, %v2138_v51 }
 0x377   : > { %3402 = vxpose.xlu0.b32.start [1/2] (short) (narrow) %v2421_v57, 32  ;;  %v2142_v35 = vrot.slane %v2141_v28, 4  ;;  %v2313_v48 = vsub.f32 1.0, %v2312_v30  ;;  %5151 = vpow2.f32 %v2009_v0  ;;  %vm2344_vm5 = vweird.f32 %v2138_v51  ;;  %vm2318_vm6 = vmor %vm2316_vm0, %vm2317_vm14 }
 0x378   : > { %3159 = vxpose.xlu1.b32.start [1/2] (short) (narrow) %v2415_v54, 32  ;;  %v2348_v25 = vand.u32 2147483647, %v2138_v51  ;;  %5153 = vpow2.f32 %v2011_v32  ;;  %v2323_v60 = vor.u32 1.1754944e-38, %v2322_v38  ;;  %v2351_v3 = vor.u32 1.1754944e-38, %v2350_v45 }
 0x379   : > { %v2143_v24 = vadd.f32 %v2142_v35, %v2141_v28  ;;  %v2314_v40 = vmul.f32 %v5148_v5, %v2313_v48  ;;  %vm2321_vm9 = vcmp.eq.f32.partialorder %v2320_v42, 8.507059e+37 }
 0x37a   : > { %v5150_v26 = vpop.eup %5149  ;;  %vm2349_vm10 = vcmp.eq.f32.partialorder %v2348_v25, 8.507059e+37 }
 0x37b   : > { %v2340_v34 = vmul.f32 %v5150_v26, %v2138_v51  ;;  %v2144_v46 = vrot.slane %v2143_v24, 2  ;;  %v2315_v14 = vadd.f32 %v5148_v5, %v2314_v40  ;;  %vm2345_vm15 = vweird.f32 %v5150_v26 }
 0x37c   : > { %vm2346_vm8 = vmor %vm2344_vm5, %vm2345_vm15 }
 0x37d   : > { %4725 = vmatmul.msk.f32.gmra.mxu3 %vm2469_vm7, %v2692_v22  ;;  %v2341_v18 = vsub.f32 1.0, %v2340_v34  ;;  %v2145_v37 = vadd.f32 %v2144_v46, %v2143_v24  ;;  %v2319_v62 = vsel %vm2318_vm6, %v5148_v5, %v2315_v14  ;;  %v6889_v61 = vpop.eup %5151 }
 0x37e   : > { %v2324_v58 = vsel %vm2321_vm9, %v2323_v60, %v2319_v62  ;;  %v6891_v54 = vpop.eup %5153  ;;  %v2148_v57 = vsel %vm859_vm2, %v6889_v61, 0.0 }
 0x37f   : > { %3403 = vxpose.xlu0.b32.end [2/2] (short) (narrow) %v2422_v43, 32  ;;  %v2342_v6 = vmul.f32 %v5150_v26, %v2341_v18  ;;  %v2146_v47 = vrot.slane %v2145_v37, 1  ;;  %v2392_v51 = vmul.f32 0.7711054, %v2324_v58  ;;  %v2149_v2 = vsel %vm859_vm2, %v6891_v54, 0.0 }
 0x380   : > { %3160 = vxpose.xlu1.b32.end [2/2] (short) (narrow) %v2416_v31, 32  ;;  %v2150_v35 = vadd.f32 %v2149_v2, %v2148_v57 }
 0x381   : > { %v2343_v52 = vadd.f32 %v5150_v26, %v2342_v6  ;;  %v2147_v55 = vadd.f32 %v2146_v47, %v2145_v37  ;;  %v2419_v28 = vmul.f32 %v6768_v41, %v2392_v51  ;;  %v2420_v31 = vmul.f32 %v6773_v44, %v2392_v51  ;;  %v6906_v41 = vpop.permute.xlu2 %4899  ;;  %v7453_v44 = vld [vmem:[#allocation6_spill] sm:$0xff] }
 0x382   : > { %v2151_v30 = vrot.slane %v2150_v35, 4  ;;  %v4886_v0 = vunpack.i.l.bf16 %v7453_v44  ;;  %v4887_v14 = vunpack.i.h.bf16 %v7453_v44 }
 0x383   : > { %v2347_v50 = vsel %vm2346_vm8, %v5150_v26, %v2343_v52  ;;  %5155 = vrcp.f32 %v2147_v55  ;;  %v2364_v40 = vand.u32 2147483648, %v2147_v55  ;;  %vm2358_vm4 = vweird.f32 %v2147_v55 }
 0x384   : > { %v2352_v33 = vsel %vm2349_vm10, %v2351_v3, %v2347_v50  ;;  %v2152_v43 = vadd.f32 %v2151_v30, %v2150_v35  ;;  %v2362_v6 = vand.u32 2147483647, %v2147_v55 }
 0x385   : > { %v2394_v29 = vmul.f32 0.7711054, %v2352_v33  ;;  %v2365_v52 = vor.u32 1.1754944e-38, %v2364_v40 }
 0x386   : > { %v2153_v48 = vrot.slane %v2152_v43, 2  ;;  %vm2363_vm12 = vcmp.eq.f32.partialorder %v2362_v6, 8.507059e+37  ;;  %v6946_v6 = vld [vmem:[%s7327_s7 + $0x8] sm:$0xff] }
 0x387   : > { %v2423_v56 = vmul.f32 %v6825_v10, %v2394_v29  ;;  %v2424_v27 = vmul.f32 %v6832_v7, %v2394_v29 }
 0x388   : > { %v6887_v59 = vpop.f32.mrf.mxu3  ;;  %v2154_v23 = vadd.f32 %v2153_v48, %v2152_v43 }
 0x389   : > { %v5156_v26 = vpop.eup %5155 }
 0x38a   : > { %v2354_v34 = vmul.f32 %v5156_v26, %v2147_v55  ;;  %vm2359_vm3 = vweird.f32 %v5156_v26  ;;  %v2155_v37 = vrot.slane %v2154_v23, 1 }
 0x38b   : > { %vm2360_vm11 = vmor %vm2358_vm4, %vm2359_vm3 }
 0x38c   : > { %v2355_v24 = vsub.f32 1.0, %v2354_v34  ;;  %v2156_v42 = vadd.f32 %v2155_v37, %v2154_v23  ;;  %v6938_v23 = vld [vmem:[%s7327_s7 + $0x10] sm:$0xff]  ;;  %v7456_v37 = vld [vmem:[#allocation3_spill] sm:$0xff] }
 0x38e   : > { %v2356_v18 = vmul.f32 %v5156_v26, %v2355_v24  ;;  %5157 = vrcp.f32 %v2156_v42  ;;  %vm2372_vm14 = vweird.f32 %v2156_v42  ;;  %v2376_v35 = vand.u32 2147483647, %v2156_v42  ;;  %v6932_v24 = vld [vmem:[%s7327_s7 + $0x18] sm:$0xff] }
 0x390   : > { %v6902_v22 = vpop.f32.mrf.mxu3  ;;  %v2357_v46 = vadd.f32 %v5156_v26, %v2356_v18  ;;  %vm2377_vm0 = vcmp.eq.f32.partialorder %v2376_v35, 8.507059e+37 }
 0x391   : > { %v3727_v44 = vmul.f32 %v6946_v6, %v6902_v22 }
 0x392   : > { %v2361_v32 = vsel %vm2360_vm11, %v5156_v26, %v2357_v46  ;;  %v7454_v26 = vld [vmem:[#allocation11_spill] sm:$0xff] }
 0x393   : > { %v2366_v45 = vsel %vm2363_vm12, %v2365_v52, %v2361_v32  ;;  %v4891_v30 = vunpack.i.l.bf16 %v7454_v26 }
 0x394   : > { %v2395_v25 = vmul.f32 0.7711054, %v2366_v45  ;;  %v5158_v3 = vpop.eup %5157 }
 0x395   : > { %v6897_v15 = vpop.permute.xlu1 %4919  ;;  %v2368_v55 = vmul.f32 %v5158_v3, %v2156_v42  ;;  %vm2373_vm13 = vweird.f32 %v5158_v3 }
 0x396   : > { %v4921_v5 = vunpack.i.l.bf16 %v6897_v15  ;;  %v2425_v50 = vmul.f32 %v6868_v49, %v2395_v25  ;;  %v2426_v51 = vmul.f32 %v6871_v19, %v2395_v25  ;;  %vm2374_vm15 = vmor %vm2372_vm14, %vm2373_vm13 }
 0x397   : > { %3483 = vxpose.xlu0.b32.start [1/2] (short) (narrow) %v2423_v56, 32  ;;  %v2369_v29 = vsub.f32 1.0, %v2368_v55  ;;  %v2378_v56 = vand.u32 2147483648, %v2156_v42 }
 0x398   : > { %3321 = vxpose.xlu1.b32.start [1/2] (short) (narrow) %v2419_v28, 32  ;;  %3388 = vmatpush.msra.mxu2 %v4921_v5  ;;  %v6908_v10 = vpop.f32.mrf.mxu3 }
 0x399   : > { %v2370_v5 = vmul.f32 %v5158_v3, %v2369_v29  ;;  %v2379_v43 = vor.u32 1.1754944e-38, %v2378_v56  ;;  %v3728_v46 = vmul.f32 %v6938_v23, %v6908_v10  ;;  %v6958_v10 = vld [vmem:[%s7327_s7] sm:$0xff] }
 0x39b   : > { %v2851_v8 = vpop.trf.xlu0  ;;  %v2371_v28 = vadd.f32 %v5158_v3, %v2370_v5 }
 0x39f   : > { %3484 = vxpose.xlu0.b32.end [2/2] (short) (narrow) %v2424_v27, 32  ;;  %v4892_v27 = vunpack.i.h.bf16 %v7454_v26  ;;  %v7457_v26 = vld [vmem:[#allocation16_spill] sm:$0xff] }
 0x3a0   : > { %3322 = vxpose.xlu1.b32.end [2/2] (short) (narrow) %v2420_v31, 32  ;;  %v2508_v38 = vpop.f32.mrf.mxu3  ;;  %v2375_v31 = vsel %vm2374_vm15, %v5158_v3, %v2371_v28 }
 0x3a1   : > { %v3729_v48 = vmul.f32 %v6932_v24, %v2508_v38  ;;  %v2380_v18 = vsel %vm2377_vm0, %v2379_v43, %v2375_v31  ;;  %v7458_v43 = vld [vmem:[#allocation5_spill] sm:$0xff] }
 0x3a2   : > { %v2396_v40 = vmul.f32 0.7711054, %v2380_v18 }
 0x3a3   : > { %v2852_v62 = vpop.trf.xlu0 }
 0x3a4   : > { %v2427_v22 = vmul.f32 %v6889_v61, %v2396_v40  ;;  %v2428_v42 = vmul.f32 %v6891_v54, %v2396_v40 }
 0x3a8   : > { %v6915_v60 = vpop.f32.mrf.mxu3 }
 0x3ab   : > { %v2770_v7 = vpop.trf.xlu2  ;;  %v2853_v33 = vpop.trf.xlu0 }
 0x3ac   : > { %4726 = vmatmul.msk.f32.vlgmr.msrb.gmra.mxu3 %vm2469_vm7, %v2770_v7  ;;  %v7455_v7 = vld [vmem:[#allocation2_spill] sm:$0xff] }
 0x3ad   : > { %2982 = vmatpush.msrb.mxu3 %v4886_v0  ;;  %v4923_v32 = vpack.i.bf16 %v7456_v37, %v7455_v7 }
 0x3af   : > { %2983 = vmatpush.msrb.mxu3 %v4887_v14  ;;  %v3726_v14 = vmul.f32 %v6958_v10, %v6887_v59 }
 0x3b0   : > { %v6919_v57 = vpop.f32.mrf.mxu3 }
 0x3b3   : > { %v2771_v47 = vpop.trf.xlu2  ;;  %v2854_v49 = vpop.trf.xlu0 }
 0x3b4   : > { %4727 = vmatmul.msk.f32.gmra.mxu3 %vm2469_vm7, %v2771_v47 }
 0x3b8   : > { %3564 = vxpose.xlu1.b32.start [1/2] (short) (narrow) %v2425_v50, 32  ;;  %v6923_v34 = vpop.f32.mrf.mxu3 }
 0x3bb   : > { %v2772_v58 = vpop.trf.xlu2 }
 0x3bc   : > { %4728 = vmatmul.msk.f32.gmra.mxu3 %vm2469_vm7, %v2772_v58  ;;  %v4901_v58 = vunpack.i.l.bf16 %v6906_v41 }
 0x3c0   : > { %3565 = vxpose.xlu1.b32.end [2/2] (short) (narrow) %v2426_v51, 32  ;;  %v6962_v52 = vpop.f32.mrf.mxu3 }
 0x3c3   : > { %v2773_v2 = vpop.trf.xlu2 }
 0x3c4   : > { %4729 = vmatmul.msk.f32.gmra.mxu3 %vm2469_vm7, %v2773_v2 }
 0x3c8   : > { %v6969_v25 = vpop.f32.mrf.mxu3 }
 0x3cb   : > { %v6925_v19 = vpop.trf.xlu2 }
 0x3cc   : > { %4730 = vmatmul.msk.f32.vlgmr.msra.gmra.mxu3 %vm2469_vm7, %v2851_v8 }
 0x3cd   : > { %3063 = vmatpush.msra.mxu3 %v4891_v30  ;;  %v4917_v30 = vunpack.i.h.bf16 %v7457_v26 }
 0x3cf   : > { %3064 = vmatpush.msra.mxu3 %v4892_v27 }
 0x3d2   : > { %v3094_v8 = vpop.trf.xlu0 }
 0x3d3   : > { %4742 = vmatmul.msk.f32.vlgmr.msrb.gmra.mxu0 %vm2469_vm7, %v3094_v8  ;;  %v6950_v0 = vpop.trf.xlu2 }
 0x3d4   : > { %3808 = vmatpush.msrb.mxu0 %v3729_v48  ;;  %4731 = vmatmul.msk.f32.gmra.mxu3 %vm2469_vm7, %v2852_v62  ;;  %v2664_v62 = vpop.f32.mrf.mxu3  ;;  %v7459_v48 = vld [vmem:[#allocation4_spill] sm:$0xff] }
 0x3d5   : > { %v4928_v18 = vpack.i.bf16 %v7459_v48, %v7458_v43 }
 0x3d6   : > { %3809 = vmatpush.msrb.mxu0 %v3728_v46  ;;  %4924 = vrot.lane.b32.xlu2 %v4923_v32, %s5171_s25  ;;  %v4922_v46 = vunpack.i.h.bf16 %v6897_v15 }
 0x3d8   : > { %3810 = vmatpush.msrb.mxu0 %v3727_v44  ;;  %3645 = vxpose.xlu1.b32.start [1/2] (short) (narrow) %v2427_v22, 32 }
 0x3da   : > { %v3095_v38 = vpop.trf.xlu0  ;;  %3811 = vmatpush.msrb.mxu0 %v3726_v14 }
 0x3db   : > { %4743 = vmatmul.msk.f32.gmra.mxu0 %vm2469_vm7, %v3095_v38  ;;  %v3015_v45 = vpop.trf.xlu2 }
 0x3dc   : > { %4732 = vmatmul.msk.f32.gmra.mxu3 %vm2469_vm7, %v2853_v33  ;;  %v2667_v3 = vpop.f32.mrf.mxu3  ;;  %v4902_v33 = vunpack.i.h.bf16 %v6906_v41 }
 0x3e0   : > { %3646 = vxpose.xlu1.b32.end [2/2] (short) (narrow) %v2428_v42, 32 }
 0x3e2   : > { %v3096_v59 = vpop.trf.xlu0 }
 0x3e3   : > { %4744 = vmatmul.msk.f32.gmra.mxu0 %vm2469_vm7, %v3096_v59  ;;  %v3016_v61 = vpop.trf.xlu2  ;;  %v3735_v59 = vmul.f32 %v6946_v6, %v2664_v62 }
 0x3e4   : > { %4733 = vmatmul.msk.f32.gmra.mxu3 %vm2469_vm7, %v2854_v49  ;;  %v2670_v55 = vpop.f32.mrf.mxu3 }
 0x3e5   : > { %v3737_v22 = vmul.f32 %v6932_v24, %v2670_v55 }
 0x3ea   : > { %v3097_v47 = vpop.trf.xlu0 }
 0x3eb   : > { %4745 = vmatmul.msk.f32.gmra.mxu0 %vm2469_vm7, %v3097_v47  ;;  %v3734_v47 = vmul.f32 %v6958_v10, %v6969_v25  ;;  %v3731_v25 = vmul.f32 %v6946_v6, %v6919_v57 }
 0x3ec   : > { %v6980_v2 = vpop.f32.mrf.mxu3 }
 0x3ee   : > { %v3256_v50 = vpop.trf.xlu2 }
 0x3ef   : > { %4750 = vmatmul.msk.f32.vlgmr.msra.gmra.mxu1 %vm2469_vm7, %v3256_v50  ;;  %v3733_v50 = vmul.f32 %v6932_v24, %v6962_v52  ;;  %v3730_v52 = vmul.f32 %v6958_v10, %v6915_v60 }
 0x3f4   : > { %v6985_v41 = vpop.f32.mrf.mxu3 }
 0x3f6   : > { %v3257_v51 = vpop.trf.xlu2 }
 0x3f7   : > { %4751 = vmatmul.msk.f32.gmra.mxu1 %vm2469_vm7, %v3257_v51 }
 0x3fc   : > { %v2932_v54 = vpop.trf.xlu1  ;;  %v6988_v35 = vpop.f32.mrf.mxu3 }
 0x3fd   : > { %4734 = vmatmul.msk.f32.vlgmr.msrb.gmra.mxu3 %vm2469_vm7, %v2932_v54 }
 0x3fe   : > { %3225 = vmatpush.msrb.mxu3 %v4901_v58  ;;  %v3258_v5 = vpop.trf.xlu2 }
 0x3ff   : > { %4752 = vmatmul.msk.f32.gmra.mxu1 %vm2469_vm7, %v3258_v5 }
 0x400   : > { %3226 = vmatpush.msrb.mxu3 %v4902_v33 }
 0x404   : > { %v2933_v29 = vpop.trf.xlu1  ;;  %v7000_v44 = vpop.f32.mrf.mxu3 }
 0x405   : > { %4735 = vmatmul.msk.f32.gmra.mxu3 %vm2469_vm7, %v2933_v29 }
 0x406   : > { %v3259_v28 = vpop.trf.xlu2 }
 0x407   : > { %4753 = vmatmul.msk.f32.gmra.mxu1 %vm2469_vm7, %v3259_v28  ;;  %v7462_v28 = vld [vmem:[#allocation17_spill] sm:$0xff] }
 0x40c   : > { %v2934_v49 = vpop.trf.xlu1 }
 0x40d   : > { %4736 = vmatmul.msk.f32.gmra.mxu3 %vm2469_vm7, %v2934_v49 }
 0x414   : > { %v2935_v56 = vpop.trf.xlu1 }
 0x415   : > { %4737 = vmatmul.msk.f32.gmra.mxu3 %vm2469_vm7, %v2935_v56 }
 0x41b   : > { %v3418_v27 = vpop.trf.xlu0 }
 0x41c   : > { %v3175_v31 = vpop.trf.xlu1  ;;  %4758 = vmatmul.msk.f32.vlgmr.msra.gmra.mxu0 %vm2469_vm7, %v3418_v27  ;;  %v7463_v27 = vld [vmem:[#allocation18_spill] sm:$0xff] }
 0x41d   : > { %4738 = vmatmul.msk.f32.vlgmr.msra.gmra.mxu3 %vm2469_vm7, %v6925_v19  ;;  %4929 = vrot.lane.b32.xlu0 %v4928_v18, %s5171_s25 }
 0x41e   : > { %3549 = vmatpush.msra.mxu3 %v4917_v30 }
 0x420   : > { %3550 = vmatpush.msra.mxu3 %v4922_v46 }
 0x423   : > { %v3419_v40 = vpop.trf.xlu0 }
 0x424   : > { %v3176_v8 = vpop.trf.xlu1  ;;  %4759 = vmatmul.msk.f32.gmra.mxu0 %vm2469_vm7, %v3419_v40 }
 0x425   : > { %4739 = vmatmul.msk.f32.gmra.mxu3 %vm2469_vm7, %v6950_v0  ;;  %v3736_v0 = vmul.f32 %v6938_v23, %v2667_v3  ;;  %v7460_v3 = vld [vmem:[#allocation7_spill] sm:$0xff] }
 0x42b   : > { %v3420_v37 = vpop.trf.xlu0 }
 0x42c   : > { %v3177_v7 = vpop.trf.xlu1  ;;  %4760 = vmatmul.msk.f32.gmra.mxu0 %vm2469_vm7, %v3420_v37 }
 0x42d   : > { %4740 = vmatmul.msk.f32.gmra.mxu3 %vm2469_vm7, %v3015_v45 }
 0x42f   : > { %v2823_v15 = vpop.f32.mrf.mxu3 }
 0x430   : > { %v4925_v19 = vpop.permute.xlu2 %4924  ;;  %v3742_v60 = vmul.f32 %v6958_v10, %v2823_v15 }
 0x431   : > { %v4926_v32 = vunpack.i.l.bf16 %v4925_v19  ;;  %v4927_v14 = vunpack.i.h.bf16 %v4925_v19 }
 0x433   : > { %3630 = vmatpush.msrb.mxu1 %v4926_v32  ;;  %v3421_v42 = vpop.trf.xlu0 }
 0x434   : > { %v3178_v38 = vpop.trf.xlu1  ;;  %4761 = vmatmul.msk.f32.gmra.mxu0 %vm2469_vm7, %v3421_v42 }
 0x435   : > { %3631 = vmatpush.msrb.mxu1 %v4927_v14  ;;  %4741 = vmatmul.msk.f32.gmra.mxu3 %vm2469_vm7, %v3016_v61  ;;  %v3732_v61 = vmul.f32 %v6938_v23, %v6923_v34  ;;  %v7461_v34 = vld [vmem:[#allocation8_spill] sm:$0xff] }
 0x437   : > { %3866 = vmatpush.msra.mxu1 %v3737_v22  ;;  %v2826_v45 = vpop.f32.mrf.mxu3 }
 0x438   : > { %v3743_v57 = vmul.f32 %v6946_v6, %v2826_v45 }
 0x439   : > { %3867 = vmatpush.msra.mxu1 %v3736_v0 }
 0x43b   : > { %3868 = vmatpush.msra.mxu1 %v3735_v59  ;;  %v3499_v26 = vpop.trf.xlu0  ;;  %v7464_v59 = vld [vmem:[#allocation26_spill] sm:$0xff] }
 0x43c   : > { %v3337_v58 = vpop.trf.xlu1  ;;  %4774 = vmatmul.msk.f32.vlgmr.msrb.gmra.mxu0 %vm859_vm2, %v7460_v3  ;;  %v7467_v3 = vld [vmem:[#allocation12_spill] sm:$0xff] }
 0x43d   : > { %3869 = vmatpush.msra.mxu1 %v3734_v47  ;;  %4746 = vmatmul.msk.f32.vlgmr.msrb.gmra.mxu3 %vm2469_vm7, %v3175_v31 }
 0x43e   : > { %4754 = vmatmul.msk.f32.vlgmr.msra.gmra.mxu2 %vm2469_vm7, %v3337_v58  ;;  %3837 = vmatpush.msrb.mxu3 %v3733_v50  ;;  %v7465_v58 = vld [vmem:[#allocation27_spill] sm:$0xff] }
 0x43f   : > { %v2829_v62 = vpop.f32.mrf.mxu3 }
 0x440   : > { %3838 = vmatpush.msrb.mxu3 %v3732_v61  ;;  %v3744_v33 = vmul.f32 %v6938_v23, %v2829_v62  ;;  %v7466_v61 = vld [vmem:[#allocation9_spill] sm:$0xff] }
 0x442   : > { %3839 = vmatpush.msrb.mxu3 %v3731_v25 }
 0x443   : > { %v3500_v48 = vpop.trf.xlu0 }
 0x444   : > { %3840 = vmatpush.msrb.mxu3 %v3730_v52  ;;  %v3338_v54 = vpop.trf.xlu1  ;;  %4775 = vmatmul.msk.f32.gmra.mxu0 %vm859_vm2, %v7461_v34  ;;  %v7468_v52 = vld [vmem:[#allocation10_spill] sm:$0xff] }
 0x445   : > { %4747 = vmatmul.msk.f32.gmra.mxu3 %vm2469_vm7, %v3176_v8 }
 0x446   : > { %4755 = vmatmul.msk.f32.gmra.mxu2 %vm2469_vm7, %v3338_v54  ;;  %v7469_v54 = vld [vmem:[#allocation13_spill] sm:$0xff] }
 0x447   : > { %v2832_v55 = vpop.f32.mrf.mxu3 }
 0x448   : > { %v3745_v51 = vmul.f32 %v6932_v24, %v2832_v55 }
 0x44a   : > { %3924 = vmatpush.msra.mxu0 %v3745_v51 }
 0x44b   : > { %v3501_v19 = vpop.trf.xlu0 }
 0x44c   : > { %v3339_v29 = vpop.trf.xlu1  ;;  %3925 = vmatpush.msra.mxu0 %v3744_v33  ;;  %v7470_v33 = vld [vmem:[#allocation19_spill] sm:$0xff] }
 0x44d   : > { %4748 = vmatmul.msk.f32.gmra.mxu3 %vm2469_vm7, %v3177_v7 }
 0x44e   : > { %4756 = vmatmul.msk.f32.gmra.mxu2 %vm2469_vm7, %v3339_v29  ;;  %3926 = vmatpush.msra.mxu0 %v3743_v57 }
 0x44f   : > { %v2904_v49 = vpop.f32.mrf.mxu3 }
 0x450   : > { %v3147_v5 = vpop.f32.mrf.mxu0  ;;  %3927 = vmatpush.msra.mxu0 %v3742_v60  ;;  %v3746_v0 = vmul.f32 %v6958_v10, %v2904_v49 }
 0x451   : > { %4782 = vmatmul.msk.f32.vlgmr.msra.gmra.mxu0 %vm859_vm2, %v7462_v28  ;;  %v3758_v42 = vmul.f32 %v6958_v10, %v3147_v5  ;;  %v7471_v28 = vld [vmem:[#allocation20_spill] sm:$0xff] }
 0x453   : > { %v3502_v47 = vpop.trf.xlu0 }
 0x454   : > { %v3340_v56 = vpop.trf.xlu1 }
 0x455   : > { %4749 = vmatmul.msk.f32.gmra.mxu3 %vm2469_vm7, %v3178_v38 }
 0x456   : > { %4757 = vmatmul.msk.f32.gmra.mxu2 %vm2469_vm7, %v3340_v56  ;;  %v3741_v56 = vmul.f32 %v6932_v24, %v7000_v44  ;;  %v3738_v44 = vmul.f32 %v6958_v10, %v6980_v2 }
 0x457   : > { %v2907_v31 = vpop.f32.mrf.mxu3 }
 0x458   : > { %v3150_v30 = vpop.f32.mrf.mxu0  ;;  %v3747_v38 = vmul.f32 %v6946_v6, %v2907_v31 }
 0x459   : > { %4783 = vmatmul.msk.f32.gmra.mxu0 %vm859_vm2, %v7463_v27  ;;  %v3759_v22 = vmul.f32 %v6946_v6, %v3150_v30 }
 0x45c   : > { %v3580_v43 = vpop.trf.xlu1 }
 0x45d   : > { %4762 = vmatmul.msk.f32.vlgmr.msra.gmra.mxu3 %vm2469_vm7, %v3499_v26  ;;  %4766 = vmatmul.msk.f32.vlgmr.msrb.gmra.mxu1 %vm2469_vm7, %v3580_v43  ;;  %v3740_v26 = vmul.f32 %v6938_v23, %v6988_v35 }
 0x45f   : > { %v2910_v46 = vpop.f32.mrf.mxu3 }
 0x460   : > { %v3153_v18 = vpop.f32.mrf.mxu0  ;;  %v3748_v32 = vmul.f32 %v6938_v23, %v2910_v46 }
 0x461   : > { %v3760_v37 = vmul.f32 %v6938_v23, %v3153_v18 }
 0x464   : > { %v3581_v8 = vpop.trf.xlu1 }
 0x465   : > { %4763 = vmatmul.msk.f32.gmra.mxu3 %vm2469_vm7, %v3500_v48  ;;  %4767 = vmatmul.msk.f32.gmra.mxu1 %vm2469_vm7, %v3581_v8  ;;  %v3739_v48 = vmul.f32 %v6946_v6, %v6985_v41 }
 0x467   : > { %v2913_v7 = vpop.f32.mrf.mxu3 }
 0x468   : > { %v3156_v40 = vpop.f32.mrf.mxu0  ;;  %v3749_v14 = vmul.f32 %v6932_v24, %v2913_v7 }
 0x469   : > { %v3761_v15 = vmul.f32 %v6932_v24, %v3156_v40 }
 0x46a   : > { %3953 = vmatpush.msra.mxu3 %v3749_v14 }
 0x46b   : > { %4040 = vmatpush.msrb.mxu0 %v3761_v15  ;;  %v7472_v15 = vld [vmem:[#allocation23_spill] sm:$0xff] }
 0x46c   : > { %v3582_v45 = vpop.trf.xlu1  ;;  %3954 = vmatpush.msra.mxu3 %v3748_v32  ;;  %v3309_v62 = vpop.f32.mrf.mxu1 }
 0x46d   : > { %4041 = vmatpush.msrb.mxu0 %v3760_v37  ;;  %4764 = vmatmul.msk.f32.gmra.mxu3 %vm2469_vm7, %v3501_v19  ;;  %v3766_v32 = vmul.f32 %v6958_v10, %v3309_v62 }
 0x46e   : > { %4768 = vmatmul.msk.f32.gmra.mxu1 %vm2469_vm7, %v3582_v45  ;;  %3955 = vmatpush.msra.mxu3 %v3747_v38 }
 0x46f   : > { %4042 = vmatpush.msrb.mxu0 %v3759_v22  ;;  %v7473_v22 = vld [vmem:[#allocation22_spill] sm:$0xff] }
 0x470   : > { %3956 = vmatpush.msra.mxu3 %v3746_v0 }
 0x471   : > { %4043 = vmatpush.msrb.mxu0 %v3758_v42 }
 0x472   : > { %4790 = vmatmul.msk.f32.vlgmr.msrb.gmra.mxu0 %vm859_vm2, %v7464_v59 }
 0x474   : > { %v3583_v50 = vpop.trf.xlu1  ;;  %v3312_v55 = vpop.f32.mrf.mxu1 }
 0x475   : > { %4765 = vmatmul.msk.f32.gmra.mxu3 %vm2469_vm7, %v3502_v47  ;;  %v3767_v19 = vmul.f32 %v6946_v6, %v3312_v55 }
 0x476   : > { %4769 = vmatmul.msk.f32.gmra.mxu1 %vm2469_vm7, %v3583_v50 }
 0x47a   : > { %4791 = vmatmul.msk.f32.gmra.mxu0 %vm859_vm2, %v7465_v58  ;;  %v7474_v58 = vld [vmem:[#allocation14_spill] sm:$0xff] }
 0x47c   : > { %v3661_v51 = vpop.trf.xlu1  ;;  %v3315_v5 = vpop.f32.mrf.mxu1 }
 0x47d   : > { %4776 = vmatmul.msk.f32.vlgmr.msrb.gmra.mxu3 %vm859_vm2, %v7466_v61  ;;  %v3768_v7 = vmul.f32 %v6938_v23, %v3315_v5 }
 0x47e   : > { %4778 = vmatmul.msk.f32.vlgmr.msra.gmra.mxu1 %vm859_vm2, %v7467_v3 }
 0x480   : > { %v2985_v25 = vpop.f32.mrf.mxu3 }
 0x481   : > { %v3750_v8 = vmul.f32 %v6958_v10, %v2985_v25 }
 0x484   : > { %v3662_v30 = vpop.trf.xlu1  ;;  %v3318_v46 = vpop.f32.mrf.mxu1 }
 0x485   : > { %4777 = vmatmul.msk.f32.gmra.mxu3 %vm859_vm2, %v7468_v52  ;;  %v3769_v40 = vmul.f32 %v6932_v24, %v3318_v46  ;;  %v4256_v52 = vld [vmem:[%s7325_s5 + $0x10] sm:$0xff] }
 0x486   : > { %4779 = vmatmul.msk.f32.gmra.mxu1 %vm859_vm2, %v7469_v54 }
 0x488   : > { %v2988_v34 = vpop.f32.mrf.mxu3 }
 0x489   : > { %v3751_v35 = vmul.f32 %v6946_v6, %v2988_v34  ;;  %v7475_v34 = vld [vmem:[#allocation15_spill] sm:$0xff] }
 0x48c   : > { %v3663_v37 = vpop.trf.xlu1 }
 0x48d   : > { %4784 = vmatmul.msk.f32.vlgmr.msra.gmra.mxu3 %vm859_vm2, %v7470_v33 }
 0x48f   : > { %v4930_v60 = vpop.permute.xlu0 %4929 }
 0x490   : > { %v2991_v57 = vpop.f32.mrf.mxu3  ;;  %v4931_v29 = vunpack.i.l.bf16 %v4930_v60  ;;  %v4932_v49 = vunpack.i.h.bf16 %v4930_v60 }
 0x491   : > { %v3752_v27 = vmul.f32 %v6938_v23, %v2991_v57  ;;  %v7476_v57 = vld [vmem:[#allocation24_spill] sm:$0xff] }
 0x492   : > { %3711 = vmatpush.msrb.mxu2 %v4931_v29 }
 0x494   : > { %3712 = vmatpush.msrb.mxu2 %v4932_v49  ;;  %v3664_v42 = vpop.trf.xlu1  ;;  %v7477_v49 = vld [vmem:[#allocation25_spill] sm:$0xff] }
 0x495   : > { %4785 = vmatmul.msk.f32.gmra.mxu3 %vm859_vm2, %v7471_v28  ;;  %4770 = vmatmul.msk.f32.vlgmr.msrb.gmra.mxu2 %vm2469_vm7, %v3661_v51  ;;  %v4254_v51 = vld [vmem:[%s7325_s5] sm:$0xff] }
 0x496   : > { %3895 = vmatpush.msra.mxu2 %v3741_v56 }
 0x498   : > { %v2994_v31 = vpop.f32.mrf.mxu3  ;;  %3896 = vmatpush.msra.mxu2 %v3740_v26 }
 0x499   : > { %v3753_v43 = vmul.f32 %v6932_v24, %v2994_v31  ;;  %v3471_v18 = vpop.f32.mrf.mxu0 }
 0x49a   : > { %3897 = vmatpush.msra.mxu2 %v3739_v48  ;;  %v3774_v61 = vmul.f32 %v6958_v10, %v3471_v18 }
 0x49b   : > { %3982 = vmatpush.msrb.mxu1 %v3753_v43 }
 0x49c   : > { %3898 = vmatpush.msra.mxu2 %v3738_v44 }
 0x49d   : > { %3983 = vmatpush.msrb.mxu1 %v3752_v27  ;;  %4771 = vmatmul.msk.f32.gmra.mxu2 %vm2469_vm7, %v3662_v30 }
 0x49f   : > { %3984 = vmatpush.msrb.mxu1 %v3751_v35 }
 0x4a0   : > { %v3066_v41 = vpop.f32.mrf.mxu3 }
 0x4a1   : > { %3985 = vmatpush.msrb.mxu1 %v3750_v8  ;;  %v3474_v2 = vpop.f32.mrf.mxu0  ;;  %v3754_v55 = vmul.f32 %v6958_v10, %v3066_v41 }
 0x4a2   : > { %4786 = vmatmul.msk.f32.vlgmr.msrb.gmra.mxu1 %vm859_vm2, %v7472_v15  ;;  %v3775_v50 = vmul.f32 %v6946_v6, %v3474_v2 }
 0x4a3   : > { %4098 = vmatpush.msra.mxu1 %v3769_v40 }
 0x4a5   : > { %4099 = vmatpush.msra.mxu1 %v3768_v7  ;;  %4772 = vmatmul.msk.f32.gmra.mxu2 %vm2469_vm7, %v3663_v37 }
 0x4a7   : > { %4100 = vmatpush.msra.mxu1 %v3767_v19 }
 0x4a8   : > { %v3069_v14 = vpop.f32.mrf.mxu3 }
 0x4a9   : > { %4101 = vmatpush.msra.mxu1 %v3766_v32  ;;  %v3477_v38 = vpop.f32.mrf.mxu0  ;;  %v3755_v54 = vmul.f32 %v6946_v6, %v3069_v14 }
 0x4aa   : > { %4787 = vmatmul.msk.f32.gmra.mxu1 %vm859_vm2, %v7473_v22  ;;  %v3776_v59 = vmul.f32 %v6938_v23, %v3477_v38 }
 0x4ad   : > { %4773 = vmatmul.msk.f32.gmra.mxu2 %vm2469_vm7, %v3664_v42 }
 0x4b0   : > { %v3072_v0 = vpop.f32.mrf.mxu3 }
 0x4b1   : > { %v3480_v45 = vpop.f32.mrf.mxu0  ;;  %v3756_v62 = vmul.f32 %v6938_v23, %v3072_v0 }
 0x4b2   : > { %4794 = vmatmul.msk.f32.vlgmr.msra.gmra.mxu1 %vm859_vm2, %v6331_v1  ;;  %v3777_v47 = vmul.f32 %v6932_v24, %v3480_v45  ;;  %v4257_v1 = vld [vmem:[%s7325_s5 + $0x18] sm:$0xff] }
 0x4b4   : > { %4156 = vmatpush.msra.mxu0 %v3777_v47 }
 0x4b5   : > { %4780 = vmatmul.msk.f32.vlgmr.msra.gmra.mxu2 %vm859_vm2, %v7474_v58 }
 0x4b6   : > { %4157 = vmatpush.msra.mxu0 %v3776_v59 }
 0x4b8   : > { %v3075_v3 = vpop.f32.mrf.mxu3  ;;  %4158 = vmatpush.msra.mxu0 %v3775_v50 }
 0x4b9   : > { %v3757_v25 = vmul.f32 %v6932_v24, %v3075_v3  ;;  %v3813_v5 = vpop.f32.mrf.mxu0 }
 0x4ba   : > { %4795 = vmatmul.msk.f32.gmra.mxu1 %vm859_vm2, %v6322_v21  ;;  %4159 = vmatpush.msra.mxu0 %v3774_v61  ;;  %v4255_v21 = vld [vmem:[%s7325_s5 + $0x8] sm:$0xff] }
 0x4bb   : > { %4011 = vmatpush.msrb.mxu2 %v3757_v25  ;;  %4798 = vmatmul.msk.f32.vlgmr.msra.gmra.mxu0 %vm859_vm2, %v6552_v9 }
 0x4bc   : > { %4370 = vmatpush.msrb.mxu0 %v4257_v1 }
 0x4bd   : > { %4012 = vmatpush.msrb.mxu2 %v3756_v62 }
 0x4be   : > { %4781 = vmatmul.msk.f32.gmra.mxu2 %vm859_vm2, %v7475_v34  ;;  %4371 = vmatpush.msrb.mxu0 %v4256_v52 }
 0x4bf   : > { %4013 = vmatpush.msrb.mxu2 %v3755_v54 }
 0x4c0   : > { %v3228_v9 = vpop.f32.mrf.mxu3  ;;  %4372 = vmatpush.msrb.mxu0 %v4255_v21 }
 0x4c1   : > { %v3390_v33 = vpop.f32.mrf.mxu2  ;;  %4014 = vmatpush.msrb.mxu2 %v3754_v55  ;;  %v3816_v26 = vpop.f32.mrf.mxu0  ;;  %v3762_v35 = vmul.f32 %v6958_v10, %v3228_v9 }
 0x4c2   : > { %4373 = vmatpush.msrb.mxu0 %v4254_v51  ;;  %v3770_v8 = vmul.f32 %v6958_v10, %v3390_v33 }
 0x4c3   : > { %4799 = vmatmul.msk.f32.gmra.mxu0 %vm859_vm2, %v6560_v13 }
 0x4c6   : > { %4788 = vmatmul.msk.f32.vlgmr.msrb.gmra.mxu2 %vm859_vm2, %v7476_v57 }
 0x4c8   : > { %v3231_v60 = vpop.f32.mrf.mxu3 }
 0x4c9   : > { %v3393_v29 = vpop.f32.mrf.mxu2  ;;  %v3763_v44 = vmul.f32 %v6946_v6, %v3231_v60 }
 0x4ca   : > { %v3771_v46 = vmul.f32 %v6946_v6, %v3393_v29 }
 0x4cb   : > { %4806 = vmatmul.msk.f32.vlgmr.msrb.gmra.mxu0 %vm859_vm2, %v3813_v5 }
 0x4ce   : > { %4789 = vmatmul.msk.f32.gmra.mxu2 %vm859_vm2, %v7477_v49  ;;  %v3929_v45 = vpop.f32.mrf.mxu0 }
 0x4d0   : > { %v3234_v28 = vpop.f32.mrf.mxu3 }
 0x4d1   : > { %v3396_v56 = vpop.f32.mrf.mxu2  ;;  %v3764_v18 = vmul.f32 %v6938_v23, %v3234_v28 }
 0x4d2   : > { %v3772_v13 = vmul.f32 %v6938_v23, %v3396_v56 }
 0x4d3   : > { %4807 = vmatmul.msk.f32.gmra.mxu0 %vm859_vm2, %v3816_v26 }
 0x4d6   : > { %v3932_v50 = vpop.f32.mrf.mxu0 }
 0x4d8   : > { %v3237_v30 = vpop.f32.mrf.mxu3 }
 0x4d9   : > { %v3399_v31 = vpop.f32.mrf.mxu2  ;;  %v3765_v27 = vmul.f32 %v6932_v24, %v3237_v30 }
 0x4da   : > { %v3773_v43 = vmul.f32 %v6932_v24, %v3399_v31  ;;  %v3633_v48 = vpop.f32.mrf.mxu1 }
 0x4db   : > { %4069 = vmatpush.msrb.mxu3 %v3765_v27 }
 0x4dc   : > { %4127 = vmatpush.msra.mxu2 %v3773_v43 }
 0x4dd   : > { %4070 = vmatpush.msrb.mxu3 %v3764_v18 }
 0x4de   : > { %4128 = vmatpush.msra.mxu2 %v3772_v13 }
 0x4df   : > { %4071 = vmatpush.msrb.mxu3 %v3763_v44 }
 0x4e0   : > { %4129 = vmatpush.msra.mxu2 %v3771_v46  ;;  %v3552_v40 = vpop.f32.mrf.mxu3 }
 0x4e1   : > { %4072 = vmatpush.msrb.mxu3 %v3762_v35  ;;  %v3778_v38 = vmul.f32 %v6958_v10, %v3552_v40 }
 0x4e2   : > { %4130 = vmatpush.msra.mxu2 %v3770_v8  ;;  %v3636_v41 = vpop.f32.mrf.mxu1  ;;  %4792 = vmatmul.msk.f32.vlgmr.msrb.gmra.mxu3 %vm859_vm2, %v6348_v63 }
 0x4e3   : > { %4796 = vmatmul.msk.f32.vlgmr.msra.gmra.mxu2 %vm859_vm2, %v6538_v17  ;;  %v3783_v63 = vmul.f32 %v6946_v6, %v3636_v41  ;;  %v3782_v17 = vmul.f32 %v6958_v10, %v3633_v48 }
 0x4e8   : > { %v3555_v7 = vpop.f32.mrf.mxu3 }
 0x4ea   : > { %4793 = vmatmul.msk.f32.gmra.mxu3 %vm859_vm2, %v6353_v11 }
 0x4eb   : > { %v3639_v37 = vpop.f32.mrf.mxu1  ;;  %4797 = vmatmul.msk.f32.gmra.mxu2 %vm859_vm2, %v6524_v20  ;;  %v3779_v20 = vmul.f32 %v6946_v6, %v3555_v7 }
 0x4ec   : > { %v3784_v19 = vmul.f32 %v6938_v23, %v3639_v37 }
 0x4f0   : > { %v3558_v15 = vpop.f32.mrf.mxu3 }
 0x4f1   : > { %v3780_v22 = vmul.f32 %v6938_v23, %v3558_v15 }
 0x4f3   : > { %v3642_v2 = vpop.f32.mrf.mxu1 }
 0x4f4   : > { %v3785_v32 = vmul.f32 %v6932_v24, %v3642_v2 }
 0x4f6   : > { %4214 = vmatpush.msrb.mxu1 %v3785_v32 }
 0x4f8   : > { %4215 = vmatpush.msrb.mxu1 %v3784_v19  ;;  %v3561_v14 = vpop.f32.mrf.mxu3 }
 0x4f9   : > { %v3781_v11 = vmul.f32 %v6932_v24, %v3561_v14 }
 0x4fa   : > { %4216 = vmatpush.msrb.mxu1 %v3783_v63 }
 0x4fb   : > { %4185 = vmatpush.msra.mxu3 %v3781_v11 }
 0x4fc   : > { %4217 = vmatpush.msrb.mxu1 %v3782_v17 }
 0x4fd   : > { %4802 = vmatmul.msk.f32.vlgmr.msrb.gmra.mxu1 %vm859_vm2, %v6739_v39  ;;  %4186 = vmatpush.msra.mxu3 %v3780_v22  ;;  %v3871_v39 = vpop.f32.mrf.mxu1 }
 0x4ff   : > { %4187 = vmatpush.msra.mxu3 %v3779_v20 }
 0x500   : > { %v3842_v42 = vpop.f32.mrf.mxu3 }
 0x501   : > { %4188 = vmatpush.msra.mxu3 %v3778_v38  ;;  %4808 = vmatmul.msk.f32.gmra.mxu0 %vm859_vm2, %v3842_v42 }
 0x502   : > { %4800 = vmatmul.msk.f32.vlgmr.msra.gmra.mxu3 %vm859_vm2, %v6653_v36  ;;  %v4045_v36 = vpop.f32.mrf.mxu0 }
 0x505   : > { %4803 = vmatmul.msk.f32.gmra.mxu1 %vm859_vm2, %v6755_v12  ;;  %v3874_v59 = vpop.f32.mrf.mxu1 }
 0x508   : > { %v3845_v0 = vpop.f32.mrf.mxu3 }
 0x509   : > { %4809 = vmatmul.msk.f32.gmra.mxu0 %vm859_vm2, %v3845_v0 }
 0x50a   : > { %4801 = vmatmul.msk.f32.gmra.mxu3 %vm859_vm2, %v6672_v53  ;;  %v4048_v3 = vpop.f32.mrf.mxu0 }
 0x510   : > { %v3958_v9 = vpop.f32.mrf.mxu3 }
 0x511   : > { %4810 = vmatmul.msk.f32.gmra.mxu0 %vm859_vm2, %v3871_v39 }
 0x518   : > { %v3714_v47 = vpop.f32.mrf.mxu2  ;;  %v3961_v33 = vpop.f32.mrf.mxu3 }
 0x519   : > { %4811 = vmatmul.msk.f32.gmra.mxu0 %vm859_vm2, %v3874_v59  ;;  %v3786_v1 = vmul.f32 %v6958_v10, %v3714_v47 }
 0x51f   : > { %v3987_v51 = vpop.f32.mrf.mxu1 }
 0x520   : > { %v3717_v58 = vpop.f32.mrf.mxu2 }
 0x521   : > { %v3787_v53 = vmul.f32 %v6946_v6, %v3717_v58 }
 0x527   : > { %v3990_v57 = vpop.f32.mrf.mxu1 }
 0x528   : > { %v3720_v61 = vpop.f32.mrf.mxu2 }
 0x529   : > { %v3788_v25 = vmul.f32 %v6938_v23, %v3720_v61  ;;  %v7187_v23 = vld [vmem:[%s7326_s6] ss:$0 sm:$0xff] }
 0x52f   : > { %v4103_v35 = vpop.f32.mrf.mxu1 }
 0x530   : > { %v3723_v12 = vpop.f32.mrf.mxu2 }
 0x531   : > { %v3789_v62 = vmul.f32 %v6932_v24, %v3723_v12 }
 0x533   : > { %4243 = vmatpush.msrb.mxu2 %v3789_v62 }
 0x535   : > { %4244 = vmatpush.msrb.mxu2 %v3788_v25 }
 0x537   : > { %4245 = vmatpush.msrb.mxu2 %v3787_v53  ;;  %v4106_v8 = vpop.f32.mrf.mxu1 }
 0x538   : > { %v3900_v52 = vpop.f32.mrf.mxu2  ;;  %v7174_v54 = vpop.f32.mrf.mxu0 }
 0x539   : > { %4246 = vmatpush.msrb.mxu2 %v3786_v1  ;;  %4812 = vmatmul.msk.f32.gmra.mxu0 %vm859_vm2, %v3900_v52 }
 0x53a   : > { %4804 = vmatmul.msk.f32.vlgmr.msrb.gmra.mxu2 %vm859_vm2, %v6835_v16 }
 0x540   : > { %v7179_v34 = vpop.f32.mrf.mxu0 }
 0x541   : > { %v3903_v24 = vpop.f32.mrf.mxu2 }
 0x542   : > { %4813 = vmatmul.msk.f32.gmra.mxu0 %vm859_vm2, %v3903_v24  ;;  %4805 = vmatmul.msk.f32.gmra.mxu2 %vm859_vm2, %v6829_v4 }
 0x548   : > { %v4375_v6 = vpop.f32.mrf.mxu0 }
 0x549   : > { %v4376_v10 = vadd.f32 %v7187_v23, %v4375_v6  ;;  %v4016_v60 = vpop.f32.mrf.mxu2 }
 0x54a   : > { %4814 = vmatmul.msk.f32.gmra.mxu0 %vm859_vm2, %v3929_v45 }
 0x54b   : > { %v4471_v16 = vmax.f32 %v4376_v10, 0.0 }
 0x54d   : > { %4503 = vst.msk [vmem:[%s7195_s14] sm:$0xff] %vm609_vm1, %v4471_v16 }
 0x550   : > { %v4378_v4 = vpop.f32.mrf.mxu0 }
 0x551   : > { %v4379_v21 = vadd.f32 %v7187_v23, %v4378_v4  ;;  %v4019_v28 = vpop.f32.mrf.mxu2 }
 0x552   : > { %4815 = vmatmul.msk.f32.gmra.mxu0 %vm859_vm2, %v3932_v50 }
 0x553   : > { %v4472_v55 = vmax.f32 %v4379_v21, 0.0 }
 0x555   : > { %4504 = vst.msk [vmem:[%s7195_s14 + $0x8] sm:$0xff] %vm609_vm1, %v4472_v55 }
 0x55a   : > { %4816 = vmatmul.msk.f32.gmra.mxu0 %vm859_vm2, %v3958_v9 }
 0x562   : > { %4817 = vmatmul.msk.f32.gmra.mxu0 %vm859_vm2, %v3961_v33 }
 0x565   : > { %v4074_v18 = vpop.f32.mrf.mxu3 }
 0x566   : > { %v4132_v40 = vpop.f32.mrf.mxu2 }
 0x56a   : > { %4818 = vmatmul.msk.f32.gmra.mxu0 %vm859_vm2, %v3987_v51 }
 0x56d   : > { %v4077_v46 = vpop.f32.mrf.mxu3 }
 0x56e   : > { %v4135_v19 = vpop.f32.mrf.mxu2 }
 0x572   : > { %4819 = vmatmul.msk.f32.gmra.mxu0 %vm859_vm2, %v3990_v57 }
 0x57a   : > { %4820 = vmatmul.msk.f32.gmra.mxu0 %vm859_vm2, %v4016_v60  ;;  %v4219_v58 = vpop.f32.mrf.mxu1 }
 0x57e   : > { %v4381_v29 = vpop.f32.mrf.mxu0 }
 0x57f   : > { %v4382_v5 = vadd.f32 %v7187_v23, %v4381_v29 }
 0x581   : > { %v4473_v49 = vmax.f32 %v4382_v5, 0.0 }
 0x582   : > { %4821 = vmatmul.msk.f32.gmra.mxu0 %vm859_vm2, %v4019_v28  ;;  %v4222_v25 = vpop.f32.mrf.mxu1 }
 0x583   : > { %4505 = vst.msk [vmem:[%s7195_s14 + $0x10] sm:$0xff] %vm609_vm1, %v4473_v49 }
 0x585   : > { %v4190_v38 = vpop.f32.mrf.mxu3 }
 0x586   : > { %v4384_v56 = vpop.f32.mrf.mxu0 }
 0x587   : > { %v4385_v26 = vadd.f32 %v7187_v23, %v4384_v56 }
 0x589   : > { %v4474_v30 = vmax.f32 %v4385_v26, 0.0 }
 0x58a   : > { %4822 = vmatmul.msk.f32.gmra.mxu0 %vm859_vm2, %v4045_v36 }
 0x58b   : > { %4506 = vst.msk [vmem:[%s7195_s14 + $0x18] sm:$0xff] %vm609_vm1, %v4474_v30 }
 0x58d   : > { %v4193_v47 = vpop.f32.mrf.mxu3 }
 0x58e   : > { %v4387_v31 = vpop.f32.mrf.mxu0 }
 0x58f   : > { %v4388_v13 = vadd.f32 %v7187_v23, %v4387_v31 }
 0x591   : > { %v4475_v27 = vmax.f32 %v4388_v13, 0.0 }
 0x592   : > { %4823 = vmatmul.msk.f32.gmra.mxu0 %vm859_vm2, %v4048_v3 }
 0x593   : > { %4507 = vst.msk [vmem:[%s7195_s14 + $0x20] sm:$0xff] %vm609_vm1, %v4475_v27 }
 0x596   : > { %v4390_v43 = vpop.f32.mrf.mxu0 }
 0x597   : > { %v4391_v48 = vadd.f32 %v7187_v23, %v4390_v43 }
 0x599   : > { %v4476_v44 = vmax.f32 %v4391_v48, 0.0 }
 0x59a   : > { %4824 = vmatmul.msk.f32.gmra.mxu0 %vm859_vm2, %v4074_v18 }
 0x59b   : > { %4508 = vst.msk [vmem:[%s7195_s14 + $0x28] sm:$0xff] %vm609_vm1, %v4476_v44 }
 0x5a2   : > { %4825 = vmatmul.msk.f32.gmra.mxu0 %vm859_vm2, %v4077_v46 }
 0x5aa   : > { %4826 = vmatmul.msk.f32.gmra.mxu0 %vm859_vm2, %v4103_v35 }
 0x5b2   : > { %4827 = vmatmul.msk.f32.gmra.mxu0 %vm859_vm2, %v4106_v8 }
 0x5b6   : > { %v4393_v41 = vpop.f32.mrf.mxu0 }
 0x5b7   : > { %v4394_v7 = vadd.f32 %v7187_v23, %v4393_v41 }
 0x5b9   : > { %v4477_v37 = vmax.f32 %v4394_v7, 0.0 }
 0x5ba   : > { %4828 = vmatmul.msk.f32.gmra.mxu0 %vm859_vm2, %v4132_v40 }
 0x5bb   : > { %4509 = vst.msk [vmem:[%s7195_s14 + $0x30] sm:$0xff] %vm609_vm1, %v4477_v37 }
 0x5bd   : > { %v4248_v1 = vpop.f32.mrf.mxu2 }
 0x5bf   : > { %v4396_v15 = vpop.f32.mrf.mxu0 }
 0x5c0   : > { %v4397_v2 = vadd.f32 %v7187_v23, %v4396_v15 }
 0x5c2   : > { %v4478_v32 = vmax.f32 %v4397_v2, 0.0  ;;  %4829 = vmatmul.msk.f32.gmra.mxu0 %vm859_vm2, %v4135_v19 }
 0x5c4   : > { %4510 = vst.msk [vmem:[%s7195_s14 + $0x38] sm:$0xff] %vm609_vm1, %v4478_v32 }
 0x5c5   : > { %v4251_v10 = vpop.f32.mrf.mxu2 }
 0x5c7   : > { %v4399_v63 = vpop.f32.mrf.mxu0 }
 0x5c8   : > { %v4400_v14 = vadd.f32 %v7187_v23, %v4399_v63 }
 0x5ca   : > { %v4479_v17 = vmax.f32 %v4400_v14, 0.0  ;;  %4830 = vmatmul.msk.f32.gmra.mxu0 %vm859_vm2, %v7174_v54 }
 0x5cc   : > { %4511 = vst.msk [vmem:[%s7195_s14 + $0x40] sm:$0xff] %vm609_vm1, %v4479_v17 }
 0x5cf   : > { %v4402_v22 = vpop.f32.mrf.mxu0 }
 0x5d0   : > { %v4403_v11 = vadd.f32 %v7187_v23, %v4402_v22 }
 0x5d2   : > { %v4480_v20 = vmax.f32 %v4403_v11, 0.0  ;;  %4831 = vmatmul.msk.f32.gmra.mxu0 %vm859_vm2, %v7179_v34 }
 0x5d4   : > { %4512 = vst.msk [vmem:[%s7195_s14 + $0x48] sm:$0xff] %vm609_vm1, %v4480_v20 }
 0x5d7   : > { %v4405_v42 = vpop.f32.mrf.mxu0 }
 0x5d8   : > { %v4406_v0 = vadd.f32 %v7187_v23, %v4405_v42 }
 0x5da   : > { %v4481_v39 = vmax.f32 %v4406_v0, 0.0  ;;  %4832 = vmatmul.msk.f32.gmra.mxu0 %vm859_vm2, %v4190_v38 }
 0x5dc   : > { %4513 = vst.msk [vmem:[%s7195_s14 + $0x50] sm:$0xff] %vm609_vm1, %v4481_v39 }
 0x5df   : > { %v4408_v45 = vpop.f32.mrf.mxu0 }
 0x5e0   : > { %v4409_v59 = vadd.f32 %v7187_v23, %v4408_v45 }
 0x5e2   : > { %v4482_v50 = vmax.f32 %v4409_v59, 0.0  ;;  %4833 = vmatmul.msk.f32.gmra.mxu0 %vm859_vm2, %v4193_v47 }
 0x5e4   : > { %4514 = vst.msk [vmem:[%s7195_s14 + $0x58] sm:$0xff] %vm609_vm1, %v4482_v50 }
 0x5e7   : > { %v4411_v36 = vpop.f32.mrf.mxu0 }
 0x5e8   : > { %v4412_v61 = vadd.f32 %v7187_v23, %v4411_v36 }
 0x5ea   : > { %v4483_v3 = vmax.f32 %v4412_v61, 0.0  ;;  %4834 = vmatmul.msk.f32.gmra.mxu0 %vm859_vm2, %v4219_v58 }
 0x5ec   : > { %4515 = vst.msk [vmem:[%s7195_s14 + $0x60] sm:$0xff] %vm609_vm1, %v4483_v3 }
 0x5ef   : > { %v4414_v12 = vpop.f32.mrf.mxu0 }
 0x5f0   : > { %v4415_v62 = vadd.f32 %v7187_v23, %v4414_v12 }
 0x5f2   : > { %v4484_v53 = vmax.f32 %v4415_v62, 0.0  ;;  %4835 = vmatmul.msk.f32.gmra.mxu0 %vm859_vm2, %v4222_v25 }
 0x5f4   : > { %4516 = vst.msk [vmem:[%s7195_s14 + $0x68] sm:$0xff] %vm609_vm1, %v4484_v53 }
 0x5f7   : > { %v4417_v52 = vpop.f32.mrf.mxu0 }
 0x5f8   : > { %v4418_v54 = vadd.f32 %v7187_v23, %v4417_v52 }
 0x5fa   : > { %v4485_v24 = vmax.f32 %v4418_v54, 0.0  ;;  %4836 = vmatmul.msk.f32.gmra.mxu0 %vm859_vm2, %v4248_v1 }
 0x5fc   : > { %4517 = vst.msk [vmem:[%s7195_s14 + $0x70] sm:$0xff] %vm609_vm1, %v4485_v24 }
 0x5ff   : > { %v4420_v34 = vpop.f32.mrf.mxu0 }
 0x600   : > { %v4421_v6 = vadd.f32 %v7187_v23, %v4420_v34 }
 0x602   : > { %v4486_v16 = vmax.f32 %v4421_v6, 0.0  ;;  %4837 = vmatmul.msk.f32.gmra.mxu0 %vm859_vm2, %v4251_v10 }
 0x604   : > { %4518 = vst.msk [vmem:[%s7195_s14 + $0x78] sm:$0xff] %vm609_vm1, %v4486_v16 }
 0x607   : > { %v4423_v4 = vpop.f32.mrf.mxu0 }
 0x608   : > { %v4424_v21 = vadd.f32 %v7187_v23, %v4423_v4 }
 0x60a   : > { %v4487_v55 = vmax.f32 %v4424_v21, 0.0 }
 0x60c   : > { %4519 = vst.msk [vmem:[%s7195_s14 + $0x80] sm:$0xff] %vm609_vm1, %v4487_v55 }
 0x60f   : > { %v4426_v9 = vpop.f32.mrf.mxu0 }
 0x610   : > { %v4427_v33 = vadd.f32 %v7187_v23, %v4426_v9 }
 0x612   : > { %v4488_v51 = vmax.f32 %v4427_v33, 0.0 }
 0x614   : > { %4520 = vst.msk [vmem:[%s7195_s14 + $0x88] sm:$0xff] %vm609_vm1, %v4488_v51 }
 0x617   : > { %v4429_v57 = vpop.f32.mrf.mxu0 }
 0x618   : > { %v4430_v60 = vadd.f32 %v7187_v23, %v4429_v57 }
 0x61a   : > { %v4489_v29 = vmax.f32 %v4430_v60, 0.0 }
 0x61c   : > { %4521 = vst.msk [vmem:[%s7195_s14 + $0x90] sm:$0xff] %vm609_vm1, %v4489_v29 }
 0x61f   : > { %v4432_v5 = vpop.f32.mrf.mxu0 }
 0x620   : > { %v4433_v49 = vadd.f32 %v7187_v23, %v4432_v5 }
 0x622   : > { %v4490_v28 = vmax.f32 %v4433_v49, 0.0 }
 0x624   : > { %4522 = vst.msk [vmem:[%s7195_s14 + $0x98] sm:$0xff] %vm609_vm1, %v4490_v28 }
 0x627   : > { %v4435_v56 = vpop.f32.mrf.mxu0 }
 0x628   : > { %v4436_v26 = vadd.f32 %v7187_v23, %v4435_v56 }
 0x62a   : > { %v4491_v30 = vmax.f32 %v4436_v26, 0.0 }
 0x62c   : > { %4523 = vst.msk [vmem:[%s7195_s14 + $0xa0] sm:$0xff] %vm609_vm1, %v4491_v30 }
 0x62f   : > { %v4438_v31 = vpop.f32.mrf.mxu0 }
 0x630   : > { %v4439_v13 = vadd.f32 %v7187_v23, %v4438_v31 }
 0x632   : > { %v4492_v27 = vmax.f32 %v4439_v13, 0.0 }
 0x634   : > { %4524 = vst.msk [vmem:[%s7195_s14 + $0xa8] sm:$0xff] %vm609_vm1, %v4492_v27 }
 0x637   : > { %v4441_v43 = vpop.f32.mrf.mxu0 }
 0x638   : > { %v4442_v48 = vadd.f32 %v7187_v23, %v4441_v43 }
 0x63a   : > { %v4493_v18 = vmax.f32 %v4442_v48, 0.0 }
 0x63c   : > { %4525 = vst.msk [vmem:[%s7195_s14 + $0xb0] sm:$0xff] %vm609_vm1, %v4493_v18 }
 0x63f   : > { %v4444_v44 = vpop.f32.mrf.mxu0 }
 0x640   : > { %v4445_v46 = vadd.f32 %v7187_v23, %v4444_v44 }
 0x642   : > { %v4494_v35 = vmax.f32 %v4445_v46, 0.0 }
 0x644   : > { %4526 = vst.msk [vmem:[%s7195_s14 + $0xb8] sm:$0xff] %vm609_vm1, %v4494_v35 }
 0x647   : > { %v4447_v8 = vpop.f32.mrf.mxu0 }
 0x648   : > { %v4448_v40 = vadd.f32 %v7187_v23, %v4447_v8 }
 0x64a   : > { %v4495_v41 = vmax.f32 %v4448_v40, 0.0 }
 0x64c   : > { %4527 = vst.msk [vmem:[%s7195_s14 + $0xc0] sm:$0xff] %vm609_vm1, %v4495_v41 }
 0x64f   : > { %v4450_v7 = vpop.f32.mrf.mxu0 }
 0x650   : > { %v4451_v37 = vadd.f32 %v7187_v23, %v4450_v7 }
 0x652   : > { %v4496_v15 = vmax.f32 %v4451_v37, 0.0 }
 0x654   : > { %4528 = vst.msk [vmem:[%s7195_s14 + $0xc8] sm:$0xff] %vm609_vm1, %v4496_v15 }
 0x657   : > { %v4453_v2 = vpop.f32.mrf.mxu0 }
 0x658   : > { %v4454_v19 = vadd.f32 %v7187_v23, %v4453_v2 }
 0x65a   : > { %v4497_v32 = vmax.f32 %v4454_v19, 0.0 }
 0x65c   : > { %4529 = vst.msk [vmem:[%s7195_s14 + $0xd0] sm:$0xff] %vm609_vm1, %v4497_v32 }
 0x65f   : > { %v4456_v63 = vpop.f32.mrf.mxu0 }
 0x660   : > { %v4457_v14 = vadd.f32 %v7187_v23, %v4456_v63 }
 0x662   : > { %v4498_v17 = vmax.f32 %v4457_v14, 0.0 }
 0x664   : > { %4530 = vst.msk [vmem:[%s7195_s14 + $0xd8] sm:$0xff] %vm609_vm1, %v4498_v17 }
 0x667   : > { %v4459_v22 = vpop.f32.mrf.mxu0 }
 0x668   : > { %v4460_v11 = vadd.f32 %v7187_v23, %v4459_v22 }
 0x66a   : > { %v4499_v20 = vmax.f32 %v4460_v11, 0.0 }
 0x66c   : > { %4531 = vst.msk [vmem:[%s7195_s14 + $0xe0] sm:$0xff] %vm609_vm1, %v4499_v20 }
 0x66f   : > { %v4462_v38 = vpop.f32.mrf.mxu0 }
 0x670   : > { %v4463_v42 = vadd.f32 %v7187_v23, %v4462_v38 }
 0x672   : > { %v4500_v0 = vmax.f32 %v4463_v42, 0.0 }
 0x674   : > { %4532 = vst.msk [vmem:[%s7195_s14 + $0xe8] sm:$0xff] %vm609_vm1, %v4500_v0 }
 0x677   : > { %v4465_v39 = vpop.f32.mrf.mxu0 }
 0x678   : > { %v4466_v45 = vadd.f32 %v7187_v23, %v4465_v39 }
 0x67a   : > { %v4501_v59 = vmax.f32 %v4466_v45, 0.0 }
 0x67c   : > { %4533 = vst.msk [vmem:[%s7195_s14 + $0xf0] sm:$0xff] %vm609_vm1, %v4501_v59 }
 0x67f   : > { %v4468_v47 = vpop.f32.mrf.mxu0 }
 0x680   : > { %v4469_v50 = vadd.f32 %v7187_v23, %v4468_v47 }
 0x682   : > { %v4502_v58 = vmax.f32 %v4469_v50, 0.0 }
 0x684   : > { %4534 = vst.msk [vmem:[%s7195_s14 + $0xf8] sm:$0xff] %vm609_vm1, %v4502_v58 }
 0x685 PF: > { %s18_s27 = sadd.s32 1, %s5169_s27  }
 0x686   : > { %p15_p4 = scmp.ge.s32.totalorder %s18_s27, 4  }
 0x688   :  { %17 = sbr.rel (!%p15_p4) target bundleno = 1 (0x1), region = 85 }

</bundles_post_ra>
